<compile_context>
chip_gen: v5e
topology: v5e:2x2
jax: 0.10.0
libtpu: 0.0.40
codegen_flags: <defaults>
</compile_context>

<pallas_src>
import jax
import jax.numpy as jnp
from jax.experimental import pallas as pl
from jax.experimental.pallas import tpu as pltpu


LANES = 128  # pad every output-feature axis to one full vreg lane width


# ----------------------------------------------------------------------------
# Pallas kernels
# ----------------------------------------------------------------------------
def _conv_pool_kernel(p_ref, w_ref, b_ref, o_ref):
    """Fused valid-conv (im2col matmul) + bias + ReLU + 2x2/2 max-pool.

    p_ref holds the stacked im2col patches of the four 2x2 pooling phases,
    shape (4, M, K) with M = Hp*Wp*B pooled output pixels (rows ordered
    (h, w, b)) and K = kh*kw*Cin.  Since
    maxpool(relu(z + b)) == relu(max_phases(z) + b), pooling costs three VPU
    maximums on top of the four MXU matmuls; the max is accumulated
    progressively so only two (M, N) intermediates are live at once.
    """
    w = w_ref[...]
    z = jnp.dot(p_ref[0], w, preferred_element_type=jnp.float32)
    for i in range(1, p_ref.shape[0]):
        z = jnp.maximum(
            z, jnp.dot(p_ref[i], w, preferred_element_type=jnp.float32))
    o_ref[...] = jnp.maximum(z + b_ref[...], 0.0)


def _conv_pool_fc_kernel(q_ref, w2_ref, b2_ref, wf1_ref, bf1_ref,
                         wf2_ref, bf2_ref, wf3_ref, bf3_ref, o_ref, p2_ref):
    """conv2+ReLU+pool2 (same phase-max trick) chained with fc1+fc2+fc3.

    The pooled conv2 activation stays resident in the VMEM scratch p2_ref;
    fc1 consumes it as 25 small per-spatial-position matmuls against the
    compact (25, 32, 128) packed fc1 weight (PyTorch NCHW flatten order is
    baked into the packing, channel axis unpadded)."""
    w2 = w2_ref[...]
    z = jnp.dot(q_ref[0], w2, preferred_element_type=jnp.float32)
    for i in range(1, q_ref.shape[0]):
        z = jnp.maximum(
            z, jnp.dot(q_ref[i], w2, preferred_element_type=jnp.float32))
    p2_ref[...] = jnp.maximum(z + b2_ref[...], 0.0)   # (25*B, 128), rows (h, w, b)

    n_pos = wf1_ref.shape[0]      # 25 spatial positions of the 5x5 pooled map
    c_in = wf1_ref.shape[1]       # 32 real conv2 channels (unpadded)
    bsz = o_ref.shape[0]          # batch
    nf = o_ref.shape[1]           # 128 padded feature lanes

    acc = jnp.zeros((bsz, nf), jnp.float32)
    for p in range(n_pos):        # fc1 as 25 accumulated (B,32)x(32,128) dots
        slab = p2_ref[p * bsz:(p + 1) * bsz, 0:c_in]  # pooled2 at pos h*5+w == p
        acc = acc + jnp.dot(slab, wf1_ref[p], preferred_element_type=jnp.float32)
    h1 = jnp.maximum(acc + bf1_ref[...], 0.0)
    h2 = jnp.maximum(
        jnp.dot(h1, wf2_ref[...], preferred_element_type=jnp.float32) + bf2_ref[...],
        0.0)
    o_ref[...] = (jnp.dot(h2, wf3_ref[...], preferred_element_type=jnp.float32)
                  + bf3_ref[...])


# ----------------------------------------------------------------------------
# Pallas wrappers
# ----------------------------------------------------------------------------
_VMEM = pl.BlockSpec(memory_space=pltpu.MemorySpace.VMEM)


def conv_relu_pool(patches, w, b):
    """Stacked (4, M, K) pooling-phase patches -> pooled conv output (M, 128)."""
    nph, M, K = patches.shape
    N = w.shape[1]
    cost = pl.CostEstimate(
        flops=2 * nph * M * K * N,
        transcendentals=0,
        bytes_accessed=4 * (nph * M * K + K * N + N + M * N))
    return pl.pallas_call(
        _conv_pool_kernel,
        out_shape=jax.ShapeDtypeStruct((M, N), jnp.float32),
        in_specs=[_VMEM] * 3,
        out_specs=_VMEM,
        cost_estimate=cost,
    )(patches, w, b)


def conv_relu_pool_fc(patches, pk, batch):
    """conv2 + pool2 + fc1 + fc2 + fc3 in one kernel -> padded logits (B, 128)."""
    nph, M, K = patches.shape
    N = pk["w2"].shape[1]
    n_pos, c_in, _ = pk["wf1"].shape
    flops = (2 * nph * M * K * N               # conv2 (4 pooling phases)
             + 2 * n_pos * batch * c_in * N    # fc1 (25 per-position matmuls)
             + 2 * 2 * batch * N * N)          # fc2, fc3
    bytes_accessed = 4 * (nph * M * K + K * N + n_pos * c_in * N + 2 * N * N
                          + 4 * N + M * N + batch * N)
    cost = pl.CostEstimate(flops=flops, transcendentals=0,
                           bytes_accessed=bytes_accessed)
    return pl.pallas_call(
        _conv_pool_fc_kernel,
        out_shape=jax.ShapeDtypeStruct((batch, N), jnp.float32),
        in_specs=[_VMEM] * 9,
        out_specs=_VMEM,
        scratch_shapes=[pltpu.VMEM((M, N), jnp.float32)],
        cost_estimate=cost,
    )(patches, pk["w2"], pk["b2"], pk["wf1"], pk["bf1"],
      pk["wf2"], pk["bf2"], pk["wf3"], pk["bf3"])


# ----------------------------------------------------------------------------
# XLA-side glue: channels-last im2col per 2x2 pooling phase (tiny tensors)
# ----------------------------------------------------------------------------
def _pooled_conv_patches(x_hwbc, k):
    """x_hwbc: (H, W, B, C) channels-last activation.

    Returns a stacked (4, Hp*Wp*B, k*k*C) im2col patch tensor (one slab per
    pooling phase (dy, dx)), rows ordered (h_pooled, w_pooled, b) and columns
    ordered (u, v, c) — matching the packed conv weights."""
    H, W, Bn, C = x_hwbc.shape
    Hp, Wp = (H - k + 1) // 2, (W - k + 1) // 2
    phases = []
    for dy in range(2):
        for dx in range(2):
            cols = []
            for u in range(k):
                for v in range(k):
                    sl = jax.lax.slice(
                        x_hwbc,
                        start_indices=(dy + u, dx + v, 0, 0),
                        limit_indices=(dy + u + 2 * Hp - 1,
                                       dx + v + 2 * Wp - 1, Bn, C),
                        strides=(2, 2, 1, 1))            # (Hp, Wp, B, C)
                    cols.append(sl)
            phase = jnp.concatenate(cols, axis=-1)        # (Hp, Wp, B, k*k*C)
            phases.append(phase.reshape(Hp * Wp * Bn, k * k * C))
    return jnp.stack(phases, axis=0)                      # (4, Hp*Wp*B, k*k*C)


# ----------------------------------------------------------------------------
# Parameters (exact PyTorch shapes) and one-time repacking
# ----------------------------------------------------------------------------
def init_params():
    """Deterministic synthetic parameters with the exact PyTorch shapes."""
    keys = jax.random.split(jax.random.PRNGKey(42), 10)

    def init(key, shape, fan_in):
        bound = 1.0 / jnp.sqrt(fan_in)
        return jax.random.uniform(key, shape, jnp.float32, -bound, bound)

    p = {}
    p["conv1_w"] = init(keys[0], (16, 3, 5, 5), 3 * 5 * 5)
    p["conv1_b"] = init(keys[1], (16,), 3 * 5 * 5)
    p["conv2_w"] = init(keys[2], (32, 16, 5, 5), 16 * 5 * 5)
    p["conv2_b"] = init(keys[3], (32,), 16 * 5 * 5)
    p["fc1_w"] = init(keys[4], (120, 32 * 5 * 5), 32 * 5 * 5)
    p["fc1_b"] = init(keys[5], (120,), 32 * 5 * 5)
    p["fc2_w"] = init(keys[6], (84, 120), 120)
    p["fc2_b"] = init(keys[7], (84,), 120)
    p["fc3_w"] = init(keys[8], (10, 84), 84)
    p["fc3_b"] = init(keys[9], (10,), 84)
    return p


def prepare_params(p):
    """Pack PyTorch-shaped params into MXU / lane-friendly layout, once.

    * conv weights -> im2col (k*k*Cin, Cout) with columns ordered (u, v, c)
      and Cout zero-padded to 128 (lane-dense conv outputs).
    * fc1 (120, 800) with input index c*25 + h*5 + w -> compact (25, 32, 128):
      one (Cin=32, Cout_padded=128) block per spatial position, flatten order
      baked in; the channel axis is deliberately NOT padded (4x less HBM
      traffic for the largest weight).
    * fc2 / fc3 transposed to (K, N) and zero-padded to (128, 128).
    """
    def pad_to(a, shape):
        return jnp.pad(a, [(0, s - d) for s, d in zip(shape, a.shape)])

    w1 = jnp.transpose(p["conv1_w"], (2, 3, 1, 0)).reshape(75, 16)   # (u,v,c) x n
    w2 = jnp.transpose(p["conv2_w"], (2, 3, 1, 0)).reshape(400, 32)
    wf1 = jnp.transpose(p["fc1_w"].reshape(120, 32, 25), (2, 1, 0))  # (pos, c, n)

    return {
        "w1": pad_to(w1, (75, LANES)),
        "b1": pad_to(p["conv1_b"], (LANES,)).reshape(1, LANES),
        "w2": pad_to(w2, (400, LANES)),
        "b2": pad_to(p["conv2_b"], (LANES,)).reshape(1, LANES),
        "wf1": pad_to(wf1, (25, 32, LANES)),
        "bf1": pad_to(p["fc1_b"], (LANES,)).reshape(1, LANES),
        "wf2": pad_to(p["fc2_w"].T, (LANES, LANES)),
        "bf2": pad_to(p["fc2_b"], (LANES,)).reshape(1, LANES),
        "wf3": pad_to(p["fc3_w"].T, (LANES, LANES)),
        "bf3": pad_to(p["fc3_b"], (LANES,)).reshape(1, LANES),
    }


# ----------------------------------------------------------------------------
# Forward pass
# ----------------------------------------------------------------------------
@jax.jit
def lenet_forward(packed, x):
    """x: (B, 3, 32, 32) NCHW float32 -> logits (B, 10)."""
    bsz = x.shape[0]
    x_hwbc = jnp.transpose(x, (2, 3, 0, 1))                 # (32, 32, B, 3)

    # conv1 + ReLU + 2x2 max-pool  -> (14*14*B, 128), rows (h, w, b)
    p1 = _pooled_conv_patches(x_hwbc, 5)                    # (4, 196*B, 75)
    act1 = conv_relu_pool(p1, packed["w1"], packed["b1"])

    # conv2 + ReLU + pool + fc1/fc2/fc3 -> (B, 128) padded logits
    act1 = act1[:, :16].reshape(14, 14, bsz, 16)            # (h, w, b, c)
    p2 = _pooled_conv_patches(act1, 5)                      # (4, 25*B, 400)
    out = conv_relu_pool_fc(p2, packed, bsz)
    return out[:, :10]


if __name__ == "__main__":
    # fc1 (32*5*5 inputs) fixes the spatial size at 32x32 with 3 input channels.
    B = 2
    x = jax.random.normal(jax.random.PRNGKey(0), (B, 3, 32, 32), jnp.float32)
    params = init_params()
    packed = prepare_params(params)

    logits = lenet_forward(packed, x)
    logits = jax.block_until_ready(logits)

    assert logits.shape == (B, 10), logits.shape
    assert logits.dtype == jnp.float32
    assert bool(jnp.all(jnp.isfinite(logits)))
    print("KERNEL_OK")
</pallas_src>

<mosaic_0001>
module attributes {stable_mosaic.version = 11 : i64} {
  func.func @_conv_pool_kernel(%arg0: memref<4x392x75xf32, #tpu.memory_space<vmem>>, %arg1: memref<75x128xf32, #tpu.memory_space<vmem>>, %arg2: memref<1x128xf32, #tpu.memory_space<vmem>>, %arg3: memref<392x128xf32, #tpu.memory_space<vmem>>) attributes {dimension_semantics = [], scalar_prefetch = 0 : i64, scratch_operands = 0 : i64, tpu.core_type = #tpu.core_type<tc>} {
    %c0 = arith.constant 0 : index
    %c0_0 = arith.constant 0 : index
    %0 = vector.load %arg1[%c0, %c0_0] : memref<75x128xf32, #tpu.memory_space<vmem>>, vector<75x128xf32>
    %c0_1 = arith.constant 0 : index
    %c0_2 = arith.constant 0 : index
    %c0_3 = arith.constant 0 : index
    %1 = vector.load %arg0[%c0_1, %c0_2, %c0_3] : memref<4x392x75xf32, #tpu.memory_space<vmem>>, vector<1x392x75xf32>
    %2 = vector.shape_cast %1 : vector<1x392x75xf32> to vector<392x75xf32>
    %cst = arith.constant dense<0.000000e+00> : vector<392x128xf32>
    %3 = tpu.matmul %2, %0, %cst {dimension_numbers = #tpu.dot_dimension_numbers<[1], [0], [0], [1], [0, 0, 1, 1], [], []>} : vector<392x75xf32>, vector<75x128xf32>, vector<392x128xf32> -> vector<392x128xf32>
    %c1 = arith.constant 1 : index
    %c0_4 = arith.constant 0 : index
    %c0_5 = arith.constant 0 : index
    %4 = vector.load %arg0[%c1, %c0_4, %c0_5] : memref<4x392x75xf32, #tpu.memory_space<vmem>>, vector<1x392x75xf32>
    %5 = vector.shape_cast %4 : vector<1x392x75xf32> to vector<392x75xf32>
    %cst_6 = arith.constant dense<0.000000e+00> : vector<392x128xf32>
    %6 = tpu.matmul %5, %0, %cst_6 {dimension_numbers = #tpu.dot_dimension_numbers<[1], [0], [0], [1], [0, 0, 1, 1], [], []>} : vector<392x75xf32>, vector<75x128xf32>, vector<392x128xf32> -> vector<392x128xf32>
    %7 = arith.maximumf %3, %6 : vector<392x128xf32>
    %c2 = arith.constant 2 : index
    %c0_7 = arith.constant 0 : index
    %c0_8 = arith.constant 0 : index
    %8 = vector.load %arg0[%c2, %c0_7, %c0_8] : memref<4x392x75xf32, #tpu.memory_space<vmem>>, vector<1x392x75xf32>
    %9 = vector.shape_cast %8 : vector<1x392x75xf32> to vector<392x75xf32>
    %cst_9 = arith.constant dense<0.000000e+00> : vector<392x128xf32>
    %10 = tpu.matmul %9, %0, %cst_9 {dimension_numbers = #tpu.dot_dimension_numbers<[1], [0], [0], [1], [0, 0, 1, 1], [], []>} : vector<392x75xf32>, vector<75x128xf32>, vector<392x128xf32> -> vector<392x128xf32>
    %11 = arith.maximumf %7, %10 : vector<392x128xf32>
    %c3 = arith.constant 3 : index
    %c0_10 = arith.constant 0 : index
    %c0_11 = arith.constant 0 : index
    %12 = vector.load %arg0[%c3, %c0_10, %c0_11] : memref<4x392x75xf32, #tpu.memory_space<vmem>>, vector<1x392x75xf32>
    %13 = vector.shape_cast %12 : vector<1x392x75xf32> to vector<392x75xf32>
    %cst_12 = arith.constant dense<0.000000e+00> : vector<392x128xf32>
    %14 = tpu.matmul %13, %0, %cst_12 {dimension_numbers = #tpu.dot_dimension_numbers<[1], [0], [0], [1], [0, 0, 1, 1], [], []>} : vector<392x75xf32>, vector<75x128xf32>, vector<392x128xf32> -> vector<392x128xf32>
    %15 = arith.maximumf %11, %14 : vector<392x128xf32>
    %c0_13 = arith.constant 0 : index
    %c0_14 = arith.constant 0 : index
    %16 = vector.load %arg2[%c0_13, %c0_14] : memref<1x128xf32, #tpu.memory_space<vmem>>, vector<1x128xf32>
    %17 = vector.broadcast %16 : vector<1x128xf32> to vector<392x128xf32>
    %18 = arith.addf %15, %17 : vector<392x128xf32>
    %cst_15 = arith.constant 0.000000e+00 : f32
    %19 = vector.broadcast %cst_15 : f32 to vector<392x128xf32>
    %20 = arith.maximumf %18, %19 : vector<392x128xf32>
    %c0_16 = arith.constant 0 : index
    %c0_17 = arith.constant 0 : index
    %21 = vector.load %arg3[%c0_16, %c0_17] : memref<392x128xf32, #tpu.memory_space<vmem>>, vector<392x128xf32>
    tpu.vector_store %arg3[%c0_16, %c0_17], %20 {strides = array<i32>} : memref<392x128xf32, #tpu.memory_space<vmem>>, vector<392x128xf32>,
    return
  }
}

module attributes {stable_mosaic.version = 11 : i64} {
  func.func @_conv_pool_fc_kernel(%arg0: memref<4x50x400xf32, #tpu.memory_space<vmem>>, %arg1: memref<400x128xf32, #tpu.memory_space<vmem>>, %arg2: memref<1x128xf32, #tpu.memory_space<vmem>>, %arg3: memref<25x32x128xf32, #tpu.memory_space<vmem>>, %arg4: memref<1x128xf32, #tpu.memory_space<vmem>>, %arg5: memref<128x128xf32, #tpu.memory_space<vmem>>, %arg6: memref<1x128xf32, #tpu.memory_space<vmem>>, %arg7: memref<128x128xf32, #tpu.memory_space<vmem>>, %arg8: memref<1x128xf32, #tpu.memory_space<vmem>>, %arg9: memref<2x128xf32, #tpu.memory_space<vmem>>, %arg10: memref<50x128xf32, #tpu.memory_space<vmem>>) attributes {dimension_semantics = [], scalar_prefetch = 0 : i64, scratch_operands = 1 : i64, tpu.core_type = #tpu.core_type<tc>} {
    %c0 = arith.constant 0 : index
    %c0_0 = arith.constant 0 : index
    %0 = vector.load %arg1[%c0, %c0_0] : memref<400x128xf32, #tpu.memory_space<vmem>>, vector<400x128xf32>
    %c0_1 = arith.constant 0 : index
    %c0_2 = arith.constant 0 : index
    %c0_3 = arith.constant 0 : index
    %1 = vector.load %arg0[%c0_1, %c0_2, %c0_3] : memref<4x50x400xf32, #tpu.memory_space<vmem>>, vector<1x50x400xf32>
    %2 = vector.shape_cast %1 : vector<1x50x400xf32> to vector<50x400xf32>
    %cst = arith.constant dense<0.000000e+00> : vector<50x128xf32>
    %3 = tpu.matmul %2, %0, %cst {dimension_numbers = #tpu.dot_dimension_numbers<[1], [0], [0], [1], [0, 0, 1, 1], [], []>} : vector<50x400xf32>, vector<400x128xf32>, vector<50x128xf32> -> vector<50x128xf32>
    %c1 = arith.constant 1 : index
    %c0_4 = arith.constant 0 : index
    %c0_5 = arith.constant 0 : index
    %4 = vector.load %arg0[%c1, %c0_4, %c0_5] : memref<4x50x400xf32, #tpu.memory_space<vmem>>, vector<1x50x400xf32>
    %5 = vector.shape_cast %4 : vector<1x50x400xf32> to vector<50x400xf32>
    %cst_6 = arith.constant dense<0.000000e+00> : vector<50x128xf32>
    %6 = tpu.matmul %5, %0, %cst_6 {dimension_numbers = #tpu.dot_dimension_numbers<[1], [0], [0], [1], [0, 0, 1, 1], [], []>} : vector<50x400xf32>, vector<400x128xf32>, vector<50x128xf32> -> vector<50x128xf32>
    %7 = arith.maximumf %3, %6 : vector<50x128xf32>
    %c2 = arith.constant 2 : index
    %c0_7 = arith.constant 0 : index
    %c0_8 = arith.constant 0 : index
    %8 = vector.load %arg0[%c2, %c0_7, %c0_8] : memref<4x50x400xf32, #tpu.memory_space<vmem>>, vector<1x50x400xf32>
    %9 = vector.shape_cast %8 : vector<1x50x400xf32> to vector<50x400xf32>
    %cst_9 = arith.constant dense<0.000000e+00> : vector<50x128xf32>
    %10 = tpu.matmul %9, %0, %cst_9 {dimension_numbers = #tpu.dot_dimension_numbers<[1], [0], [0], [1], [0, 0, 1, 1], [], []>} : vector<50x400xf32>, vector<400x128xf32>, vector<50x128xf32> -> vector<50x128xf32>
    %11 = arith.maximumf %7, %10 : vector<50x128xf32>
    %c3 = arith.constant 3 : index
    %c0_10 = arith.constant 0 : index
    %c0_11 = arith.constant 0 : index
    %12 = vector.load %arg0[%c3, %c0_10, %c0_11] : memref<4x50x400xf32, #tpu.memory_space<vmem>>, vector<1x50x400xf32>
    %13 = vector.shape_cast %12 : vector<1x50x400xf32> to vector<50x400xf32>
    %cst_12 = arith.constant dense<0.000000e+00> : vector<50x128xf32>
    %14 = tpu.matmul %13, %0, %cst_12 {dimension_numbers = #tpu.dot_dimension_numbers<[1], [0], [0], [1], [0, 0, 1, 1], [], []>} : vector<50x400xf32>, vector<400x128xf32>, vector<50x128xf32> -> vector<50x128xf32>
    %15 = arith.maximumf %11, %14 : vector<50x128xf32>
    %c0_13 = arith.constant 0 : index
    %c0_14 = arith.constant 0 : index
    %16 = vector.load %arg2[%c0_13, %c0_14] : memref<1x128xf32, #tpu.memory_space<vmem>>, vector<1x128xf32>
    %17 = vector.broadcast %16 : vector<1x128xf32> to vector<50x128xf32>
    %18 = arith.addf %15, %17 : vector<50x128xf32>
    %cst_15 = arith.constant 0.000000e+00 : f32
    %19 = vector.broadcast %cst_15 : f32 to vector<50x128xf32>
    %20 = arith.maximumf %18, %19 : vector<50x128xf32>
    %c0_16 = arith.constant 0 : index
    %c0_17 = arith.constant 0 : index
    %21 = vector.load %arg10[%c0_16, %c0_17] : memref<50x128xf32, #tpu.memory_space<vmem>>, vector<50x128xf32>
    tpu.vector_store %arg10[%c0_16, %c0_17], %20 {strides = array<i32>} : memref<50x128xf32, #tpu.memory_space<vmem>>, vector<50x128xf32>,
    %cst_18 = arith.constant 0.000000e+00 : f32
    %22 = vector.broadcast %cst_18 : f32 to vector<2x128xf32>
    %c0_19 = arith.constant 0 : index
    %c0_20 = arith.constant 0 : index
    %23 = vector.load %arg10[%c0_19, %c0_20] : memref<50x128xf32, #tpu.memory_space<vmem>>, vector<2x32xf32>
    %c0_21 = arith.constant 0 : index
    %c0_22 = arith.constant 0 : index
    %c0_23 = arith.constant 0 : index
    %24 = vector.load %arg3[%c0_21, %c0_22, %c0_23] : memref<25x32x128xf32, #tpu.memory_space<vmem>>, vector<1x32x128xf32>
    %25 = vector.shape_cast %24 : vector<1x32x128xf32> to vector<32x128xf32>
    %cst_24 = arith.constant dense<0.000000e+00> : vector<2x128xf32>
    %26 = tpu.matmul %23, %25, %cst_24 {dimension_numbers = #tpu.dot_dimension_numbers<[1], [0], [0], [1], [0, 0, 1, 1], [], []>} : vector<2x32xf32>, vector<32x128xf32>, vector<2x128xf32> -> vector<2x128xf32>
    %27 = arith.addf %22, %26 : vector<2x128xf32>
    %c2_25 = arith.constant 2 : index
    %c0_26 = arith.constant 0 : index
    %28 = vector.load %arg10[%c2_25, %c0_26] : memref<50x128xf32, #tpu.memory_space<vmem>>, vector<2x32xf32>
    %c1_27 = arith.constant 1 : index
    %c0_28 = arith.constant 0 : index
    %c0_29 = arith.constant 0 : index
    %29 = vector.load %arg3[%c1_27, %c0_28, %c0_29] : memref<25x32x128xf32, #tpu.memory_space<vmem>>, vector<1x32x128xf32>
    %30 = vector.shape_cast %29 : vector<1x32x128xf32> to vector<32x128xf32>
    %cst_30 = arith.constant dense<0.000000e+00> : vector<2x128xf32>
    %31 = tpu.matmul %28, %30, %cst_30 {dimension_numbers = #tpu.dot_dimension_numbers<[1], [0], [0], [1], [0, 0, 1, 1], [], []>} : vector<2x32xf32>, vector<32x128xf32>, vector<2x128xf32> -> vector<2x128xf32>
    %32 = arith.addf %27, %31 : vector<2x128xf32>
    %c4 = arith.constant 4 : index
    %c0_31 = arith.constant 0 : index
    %33 = vector.load %arg10[%c4, %c0_31] : memref<50x128xf32, #tpu.memory_space<vmem>>, vector<2x32xf32>
    %c2_32 = arith.constant 2 : index
    %c0_33 = arith.constant 0 : index
    %c0_34 = arith.constant 0 : index
    %34 = vector.load %arg3[%c2_32, %c0_33, %c0_34] : memref<25x32x128xf32, #tpu.memory_space<vmem>>, vector<1x32x128xf32>
    %35 = vector.shape_cast %34 : vector<1x32x128xf32> to vector<32x128xf32>
    %cst_35 = arith.constant dense<0.000000e+00> : vector<2x128xf32>
    %36 = tpu.matmul %33, %35, %cst_35 {dimension_numbers = #tpu.dot_dimension_numbers<[1], [0], [0], [1], [0, 0, 1, 1], [], []>} : vector<2x32xf32>, vector<32x128xf32>, vector<2x128xf32> -> vector<2x128xf32>
    %37 = arith.addf %32, %36 : vector<2x128xf32>
    %c6 = arith.constant 6 : index
    %c0_36 = arith.constant 0 : index
    %38 = vector.load %arg10[%c6, %c0_36] : memref<50x128xf32, #tpu.memory_space<vmem>>, vector<2x32xf32>
    %c3_37 = arith.constant 3 : index
    %c0_38 = arith.constant 0 : index
    %c0_39 = arith.constant 0 : index
    %39 = vector.load %arg3[%c3_37, %c0_38, %c0_39] : memref<25x32x128xf32, #tpu.memory_space<vmem>>, vector<1x32x128xf32>
    %40 = vector.shape_cast %39 : vector<1x32x128xf32> to vector<32x128xf32>
    %cst_40 = arith.constant dense<0.000000e+00> : vector<2x128xf32>
    %41 = tpu.matmul %38, %40, %cst_40 {dimension_numbers = #tpu.dot_dimension_numbers<[1], [0], [0], [1], [0, 0, 1, 1], [], []>} : vector<2x32xf32>, vector<32x128xf32>, vector<2x128xf32> -> vector<2x128xf32>
    %42 = arith.addf %37, %41 : vector<2x128xf32>
    %c8 = arith.constant 8 : index
    %c0_41 = arith.constant 0 : index
    %43 = vector.load %arg10[%c8, %c0_41] : memref<50x128xf32, #tpu.memory_space<vmem>>, vector<2x32xf32>
    %c4_42 = arith.constant 4 : index
    %c0_43 = arith.constant 0 : index
    %c0_44 = arith.constant 0 : index
    %44 = vector.load %arg3[%c4_42, %c0_43, %c0_44] : memref<25x32x128xf32, #tpu.memory_space<vmem>>, vector<1x32x128xf32>
    %45 = vector.shape_cast %44 : vector<1x32x128xf32> to vector<32x128xf32>
    %cst_45 = arith.constant dense<0.000000e+00> : vector<2x128xf32>
    %46 = tpu.matmul %43, %45, %cst_45 {dimension_numbers = #tpu.dot_dimension_numbers<[1], [0], [0], [1], [0, 0, 1, 1], [], []>} : vector<2x32xf32>, vector<32x128xf32>, vector<2x128xf32> -> vector<2x128xf32>
    %47 = arith.addf %42, %46 : vector<2x128xf32>
    %c10 = arith.constant 10 : index
    %c0_46 = arith.constant 0 : index
    %48 = vector.load %arg10[%c10, %c0_46] : memref<50x128xf32, #tpu.memory_space<vmem>>, vector<2x32xf32>
    %c5 = arith.constant 5 : index
    %c0_47 = arith.constant 0 : index
    %c0_48 = arith.constant 0 : index
    %49 = vector.load %arg3[%c5, %c0_47, %c0_48] : memref<25x32x128xf32, #tpu.memory_space<vmem>>, vector<1x32x128xf32>
    %50 = vector.shape_cast %49 : vector<1x32x128xf32> to vector<32x128xf32>
    %cst_49 = arith.constant dense<0.000000e+00> : vector<2x128xf32>
    %51 = tpu.matmul %48, %50, %cst_49 {dimension_numbers = #tpu.dot_dimension_numbers<[1], [0], [0], [1], [0, 0, 1, 1], [], []>} : vector<2x32xf32>, vector<32x128xf32>, vector<2x128xf32> -> vector<2x128xf32>
    %52 = arith.addf %47, %51 : vector<2x128xf32>
    %c12 = arith.constant 12 : index
    %c0_50 = arith.constant 0 : index
    %53 = vector.load %arg10[%c12, %c0_50] : memref<50x128xf32, #tpu.memory_space<vmem>>, vector<2x32xf32>
    %c6_51 = arith.constant 6 : index
    %c0_52 = arith.constant 0 : index
    %c0_53 = arith.constant 0 : index
    %54 = vector.load %arg3[%c6_51, %c0_52, %c0_53] : memref<25x32x128xf32, #tpu.memory_space<vmem>>, vector<1x32x128xf32>
    %55 = vector.shape_cast %54 : vector<1x32x128xf32> to vector<32x128xf32>
    %cst_54 = arith.constant dense<0.000000e+00> : vector<2x128xf32>
    %56 = tpu.matmul %53, %55, %cst_54 {dimension_numbers = #tpu.dot_dimension_numbers<[1], [0], [0], [1], [0, 0, 1, 1], [], []>} : vector<2x32xf32>, vector<32x128xf32>, vector<2x128xf32> -> vector<2x128xf32>
    %57 = arith.addf %52, %56 : vector<2x128xf32>
    %c14 = arith.constant 14 : index
    %c0_55 = arith.constant 0 : index
    %58 = vector.load %arg10[%c14, %c0_55] : memref<50x128xf32, #tpu.memory_space<vmem>>, vector<2x32xf32>
    %c7 = arith.constant 7 : index
    %c0_56 = arith.constant 0 : index
    %c0_57 = arith.constant 0 : index
    %59 = vector.load %arg3[%c7, %c0_56, %c0_57] : memref<25x32x128xf32, #tpu.memory_space<vmem>>, vector<1x32x128xf32>
    %60 = vector.shape_cast %59 : vector<1x32x128xf32> to vector<32x128xf32>
    %cst_58 = arith.constant dense<0.000000e+00> : vector<2x128xf32>
    %61 = tpu.matmul %58, %60, %cst_58 {dimension_numbers = #tpu.dot_dimension_numbers<[1], [0], [0], [1], [0, 0, 1, 1], [], []>} : vector<2x32xf32>, vector<32x128xf32>, vector<2x128xf32> -> vector<2x128xf32>
    %62 = arith.addf %57, %61 : vector<2x128xf32>
    %c16 = arith.constant 16 : index
    %c0_59 = arith.constant 0 : index
    %63 = vector.load %arg10[%c16, %c0_59] : memref<50x128xf32, #tpu.memory_space<vmem>>, vector<2x32xf32>
    %c8_60 = arith.constant 8 : index
    %c0_61 = arith.constant 0 : index
    %c0_62 = arith.constant 0 : index
    %64 = vector.load %arg3[%c8_60, %c0_61, %c0_62] : memref<25x32x128xf32, #tpu.memory_space<vmem>>, vector<1x32x128xf32>
    %65 = vector.shape_cast %64 : vector<1x32x128xf32> to vector<32x128xf32>
    %cst_63 = arith.constant dense<0.000000e+00> : vector<2x128xf32>
    %66 = tpu.matmul %63, %65, %cst_63 {dimension_numbers = #tpu.dot_dimension_numbers<[1], [0], [0], [1], [0, 0, 1, 1], [], []>} : vector<2x32xf32>, vector<32x128xf32>, vector<2x128xf32> -> vector<2x128xf32>
    %67 = arith.addf %62, %66 : vector<2x128xf32>
    %c18 = arith.constant 18 : index
    %c0_64 = arith.constant 0 : index
    %68 = vector.load %arg10[%c18, %c0_64] : memref<50x128xf32, #tpu.memory_space<vmem>>, vector<2x32xf32>
    %c9 = arith.constant 9 : index
    %c0_65 = arith.constant 0 : index
    %c0_66 = arith.constant 0 : index
    %69 = vector.load %arg3[%c9, %c0_65, %c0_66] : memref<25x32x128xf32, #tpu.memory_space<vmem>>, vector<1x32x128xf32>
    %70 = vector.shape_cast %69 : vector<1x32x128xf32> to vector<32x128xf32>
    %cst_67 = arith.constant dense<0.000000e+00> : vector<2x128xf32>
    %71 = tpu.matmul %68, %70, %cst_67 {dimension_numbers = #tpu.dot_dimension_numbers<[1], [0], [0], [1], [0, 0, 1, 1], [], []>} : vector<2x32xf32>, vector<32x128xf32>, vector<2x128xf32> -> vector<2x128xf32>
    %72 = arith.addf %67, %71 : vector<2x128xf32>
    %c20 = arith.constant 20 : index
    %c0_68 = arith.constant 0 : index
    %73 = vector.load %arg10[%c20, %c0_68] : memref<50x128xf32, #tpu.memory_space<vmem>>, vector<2x32xf32>
    %c10_69 = arith.constant 10 : index
    %c0_70 = arith.constant 0 : index
    %c0_71 = arith.constant 0 : index
    %74 = vector.load %arg3[%c10_69, %c0_70, %c0_71] : memref<25x32x128xf32, #tpu.memory_space<vmem>>, vector<1x32x128xf32>
    %75 = vector.shape_cast %74 : vector<1x32x128xf32> to vector<32x128xf32>
    %cst_72 = arith.constant dense<0.000000e+00> : vector<2x128xf32>
    %76 = tpu.matmul %73, %75, %cst_72 {dimension_numbers = #tpu.dot_dimension_numbers<[1], [0], [0], [1], [0, 0, 1, 1], [], []>} : vector<2x32xf32>, vector<32x128xf32>, vector<2x128xf32> -> vector<2x128xf32>
    %77 = arith.addf %72, %76 : vector<2x128xf32>
    %c22 = arith.constant 22 : index
    %c0_73 = arith.constant 0 : index
    %78 = vector.load %arg10[%c22, %c0_73] : memref<50x128xf32, #tpu.memory_space<vmem>>, vector<2x32xf32>
    %c11 = arith.constant 11 : index
    %c0_74 = arith.constant 0 : index
    %c0_75 = arith.constant 0 : index
    %79 = vector.load %arg3[%c11, %c0_74, %c0_75] : memref<25x32x128xf32, #tpu.memory_space<vmem>>, vector<1x32x128xf32>
    %80 = vector.shape_cast %79 : vector<1x32x128xf32> to vector<32x128xf32>
    %cst_76 = arith.constant dense<0.000000e+00> : vector<2x128xf32>
    %81 = tpu.matmul %78, %80, %cst_76 {dimension_numbers = #tpu.dot_dimension_numbers<[1], [0], [0], [1], [0, 0, 1, 1], [], []>} : vector<2x32xf32>, vector<32x128xf32>, vector<2x128xf32> -> vector<2x128xf32>
    %82 = arith.addf %77, %81 : vector<2x128xf32>
    %c24 = arith.constant 24 : index
    %c0_77 = arith.constant 0 : index
    %83 = vector.load %arg10[%c24, %c0_77] : memref<50x128xf32, #tpu.memory_space<vmem>>, vector<2x32xf32>
    %c12_78 = arith.constant 12 : index
    %c0_79 = arith.constant 0 : index
    %c0_80 = arith.constant 0 : index
    %84 = vector.load %arg3[%c12_78, %c0_79, %c0_80] : memref<25x32x128xf32, #tpu.memory_space<vmem>>, vector<1x32x128xf32>
    %85 = vector.shape_cast %84 : vector<1x32x128xf32> to vector<32x128xf32>
    %cst_81 = arith.constant dense<0.000000e+00> : vector<2x128xf32>
    %86 = tpu.matmul %83, %85, %cst_81 {dimension_numbers = #tpu.dot_dimension_numbers<[1], [0], [0], [1], [0, 0, 1, 1], [], []>} : vector<2x32xf32>, vector<32x128xf32>, vector<2x128xf32> -> vector<2x128xf32>
    %87 = arith.addf %82, %86 : vector<2x128xf32>
    %c26 = arith.constant 26 : index
    %c0_82 = arith.constant 0 : index
    %88 = vector.load %arg10[%c26, %c0_82] : memref<50x128xf32, #tpu.memory_space<vmem>>, vector<2x32xf32>
    %c13 = arith.constant 13 : index
    %c0_83 = arith.constant 0 : index
    %c0_84 = arith.constant 0 : index
    %89 = vector.load %arg3[%c13, %c0_83, %c0_84] : memref<25x32x128xf32, #tpu.memory_space<vmem>>, vector<1x32x128xf32>
    %90 = vector.shape_cast %89 : vector<1x32x128xf32> to vector<32x128xf32>
    %cst_85 = arith.constant dense<0.000000e+00> : vector<2x128xf32>
    %91 = tpu.matmul %88, %90, %cst_85 {dimension_numbers = #tpu.dot_dimension_numbers<[1], [0], [0], [1], [0, 0, 1, 1], [], []>} : vector<2x32xf32>, vector<32x128xf32>, vector<2x128xf32> -> vector<2x128xf32>
    %92 = arith.addf %87, %91 : vector<2x128xf32>
    %c28 = arith.constant 28 : index
    %c0_86 = arith.constant 0 : index
    %93 = vector.load %arg10[%c28, %c0_86] : memref<50x128xf32, #tpu.memory_space<vmem>>, vector<2x32xf32>
    %c14_87 = arith.constant 14 : index
    %c0_88 = arith.constant 0 : index
    %c0_89 = arith.constant 0 : index
    %94 = vector.load %arg3[%c14_87, %c0_88, %c0_89] : memref<25x32x128xf32, #tpu.memory_space<vmem>>, vector<1x32x128xf32>
    %95 = vector.shape_cast %94 : vector<1x32x128xf32> to vector<32x128xf32>
    %cst_90 = arith.constant dense<0.000000e+00> : vector<2x128xf32>
    %96 = tpu.matmul %93, %95, %cst_90 {dimension_numbers = #tpu.dot_dimension_numbers<[1], [0], [0], [1], [0, 0, 1, 1], [], []>} : vector<2x32xf32>, vector<32x128xf32>, vector<2x128xf32> -> vector<2x128xf32>
    %97 = arith.addf %92, %96 : vector<2x128xf32>
    %c30 = arith.constant 30 : index
    %c0_91 = arith.constant 0 : index
    %98 = vector.load %arg10[%c30, %c0_91] : memref<50x128xf32, #tpu.memory_space<vmem>>, vector<2x32xf32>
    %c15 = arith.constant 15 : index
    %c0_92 = arith.constant 0 : index
    %c0_93 = arith.constant 0 : index
    %99 = vector.load %arg3[%c15, %c0_92, %c0_93] : memref<25x32x128xf32, #tpu.memory_space<vmem>>, vector<1x32x128xf32>
    %100 = vector.shape_cast %99 : vector<1x32x128xf32> to vector<32x128xf32>
    %cst_94 = arith.constant dense<0.000000e+00> : vector<2x128xf32>
    %101 = tpu.matmul %98, %100, %cst_94 {dimension_numbers = #tpu.dot_dimension_numbers<[1], [0], [0], [1], [0, 0, 1, 1], [], []>} : vector<2x32xf32>, vector<32x128xf32>, vector<2x128xf32> -> vector<2x128xf32>
    %102 = arith.addf %97, %101 : vector<2x128xf32>
    %c32 = arith.constant 32 : index
    %c0_95 = arith.constant 0 : index
    %103 = vector.load %arg10[%c32, %c0_95] : memref<50x128xf32, #tpu.memory_space<vmem>>, vector<2x32xf32>
    %c16_96 = arith.constant 16 : index
    %c0_97 = arith.constant 0 : index
    %c0_98 = arith.constant 0 : index
    %104 = vector.load %arg3[%c16_96, %c0_97, %c0_98] : memref<25x32x128xf32, #tpu.memory_space<vmem>>, vector<1x32x128xf32>
    %105 = vector.shape_cast %104 : vector<1x32x128xf32> to vector<32x128xf32>
    %cst_99 = arith.constant dense<0.000000e+00> : vector<2x128xf32>
    %106 = tpu.matmul %103, %105, %cst_99 {dimension_numbers = #tpu.dot_dimension_numbers<[1], [0], [0], [1], [0, 0, 1, 1], [], []>} : vector<2x32xf32>, vector<32x128xf32>, vector<2x128xf32> -> vector<2x128xf32>
    %107 = arith.addf %102, %106 : vector<2x128xf32>
    %c34 = arith.constant 34 : index
    %c0_100 = arith.constant 0 : index
    %108 = vector.load %arg10[%c34, %c0_100] : memref<50x128xf32, #tpu.memory_space<vmem>>, vector<2x32xf32>
    %c17 = arith.constant 17 : index
    %c0_101 = arith.constant 0 : index
    %c0_102 = arith.constant 0 : index
    %109 = vector.load %arg3[%c17, %c0_101, %c0_102] : memref<25x32x128xf32, #tpu.memory_space<vmem>>, vector<1x32x128xf32>
    %110 = vector.shape_cast %109 : vector<1x32x128xf32> to vector<32x128xf32>
    %cst_103 = arith.constant dense<0.000000e+00> : vector<2x128xf32>
    %111 = tpu.matmul %108, %110, %cst_103 {dimension_numbers = #tpu.dot_dimension_numbers<[1], [0], [0], [1], [0, 0, 1, 1], [], []>} : vector<2x32xf32>, vector<32x128xf32>, vector<2x128xf32> -> vector<2x128xf32>
    %112 = arith.addf %107, %111 : vector<2x128xf32>
    %c36 = arith.constant 36 : index
    %c0_104 = arith.constant 0 : index
    %113 = vector.load %arg10[%c36, %c0_104] : memref<50x128xf32, #tpu.memory_space<vmem>>, vector<2x32xf32>
    %c18_105 = arith.constant 18 : index
    %c0_106 = arith.constant 0 : index
    %c0_107 = arith.constant 0 : index
    %114 = vector.load %arg3[%c18_105, %c0_106, %c0_107] : memref<25x32x128xf32, #tpu.memory_space<vmem>>, vector<1x32x128xf32>
    %115 = vector.shape_cast %114 : vector<1x32x128xf32> to vector<32x128xf32>
    %cst_108 = arith.constant dense<0.000000e+00> : vector<2x128xf32>
    %116 = tpu.matmul %113, %115, %cst_108 {dimension_numbers = #tpu.dot_dimension_numbers<[1], [0], [0], [1], [0, 0, 1, 1], [], []>} : vector<2x32xf32>, vector<32x128xf32>, vector<2x128xf32> -> vector<2x128xf32>
    %117 = arith.addf %112, %116 : vector<2x128xf32>
    %c38 = arith.constant 38 : index
    %c0_109 = arith.constant 0 : index
    %118 = vector.load %arg10[%c38, %c0_109] : memref<50x128xf32, #tpu.memory_space<vmem>>, vector<2x32xf32>
    %c19 = arith.constant 19 : index
    %c0_110 = arith.constant 0 : index
    %c0_111 = arith.constant 0 : index
    %119 = vector.load %arg3[%c19, %c0_110, %c0_111] : memref<25x32x128xf32, #tpu.memory_space<vmem>>, vector<1x32x128xf32>
    %120 = vector.shape_cast %119 : vector<1x32x128xf32> to vector<32x128xf32>
    %cst_112 = arith.constant dense<0.000000e+00> : vector<2x128xf32>
    %121 = tpu.matmul %118, %120, %cst_112 {dimension_numbers = #tpu.dot_dimension_numbers<[1], [0], [0], [1], [0, 0, 1, 1], [], []>} : vector<2x32xf32>, vector<32x128xf32>, vector<2x128xf32> -> vector<2x128xf32>
    %122 = arith.addf %117, %121 : vector<2x128xf32>
    %c40 = arith.constant 40 : index
    %c0_113 = arith.constant 0 : index
    %123 = vector.load %arg10[%c40, %c0_113] : memref<50x128xf32, #tpu.memory_space<vmem>>, vector<2x32xf32>
    %c20_114 = arith.constant 20 : index
    %c0_115 = arith.constant 0 : index
    %c0_116 = arith.constant 0 : index
    %124 = vector.load %arg3[%c20_114, %c0_115, %c0_116] : memref<25x32x128xf32, #tpu.memory_space<vmem>>, vector<1x32x128xf32>
    %125 = vector.shape_cast %124 : vector<1x32x128xf32> to vector<32x128xf32>
    %cst_117 = arith.constant dense<0.000000e+00> : vector<2x128xf32>
    %126 = tpu.matmul %123, %125, %cst_117 {dimension_numbers = #tpu.dot_dimension_numbers<[1], [0], [0], [1], [0, 0, 1, 1], [], []>} : vector<2x32xf32>, vector<32x128xf32>, vector<2x128xf32> -> vector<2x128xf32>
    %127 = arith.addf %122, %126 : vector<2x128xf32>
    %c42 = arith.constant 42 : index
    %c0_118 = arith.constant 0 : index
    %128 = vector.load %arg10[%c42, %c0_118] : memref<50x128xf32, #tpu.memory_space<vmem>>, vector<2x32xf32>
    %c21 = arith.constant 21 : index
    %c0_119 = arith.constant 0 : index
    %c0_120 = arith.constant 0 : index
    %129 = vector.load %arg3[%c21, %c0_119, %c0_120] : memref<25x32x128xf32, #tpu.memory_space<vmem>>, vector<1x32x128xf32>
    %130 = vector.shape_cast %129 : vector<1x32x128xf32> to vector<32x128xf32>
    %cst_121 = arith.constant dense<0.000000e+00> : vector<2x128xf32>
    %131 = tpu.matmul %128, %130, %cst_121 {dimension_numbers = #tpu.dot_dimension_numbers<[1], [0], [0], [1], [0, 0, 1, 1], [], []>} : vector<2x32xf32>, vector<32x128xf32>, vector<2x128xf32> -> vector<2x128xf32>
    %132 = arith.addf %127, %131 : vector<2x128xf32>
    %c44 = arith.constant 44 : index
    %c0_122 = arith.constant 0 : index
    %133 = vector.load %arg10[%c44, %c0_122] : memref<50x128xf32, #tpu.memory_space<vmem>>, vector<2x32xf32>
    %c22_123 = arith.constant 22 : index
    %c0_124 = arith.constant 0 : index
    %c0_125 = arith.constant 0 : index
    %134 = vector.load %arg3[%c22_123, %c0_124, %c0_125] : memref<25x32x128xf32, #tpu.memory_space<vmem>>, vector<1x32x128xf32>
    %135 = vector.shape_cast %134 : vector<1x32x128xf32> to vector<32x128xf32>
    %cst_126 = arith.constant dense<0.000000e+00> : vector<2x128xf32>
    %136 = tpu.matmul %133, %135, %cst_126 {dimension_numbers = #tpu.dot_dimension_numbers<[1], [0], [0], [1], [0, 0, 1, 1], [], []>} : vector<2x32xf32>, vector<32x128xf32>, vector<2x128xf32> -> vector<2x128xf32>
    %137 = arith.addf %132, %136 : vector<2x128xf32>
    %c46 = arith.constant 46 : index
    %c0_127 = arith.constant 0 : index
    %138 = vector.load %arg10[%c46, %c0_127] : memref<50x128xf32, #tpu.memory_space<vmem>>, vector<2x32xf32>
    %c23 = arith.constant 23 : index
    %c0_128 = arith.constant 0 : index
    %c0_129 = arith.constant 0 : index
    %139 = vector.load %arg3[%c23, %c0_128, %c0_129] : memref<25x32x128xf32, #tpu.memory_space<vmem>>, vector<1x32x128xf32>
    %140 = vector.shape_cast %139 : vector<1x32x128xf32> to vector<32x128xf32>
    %cst_130 = arith.constant dense<0.000000e+00> : vector<2x128xf32>
    %141 = tpu.matmul %138, %140, %cst_130 {dimension_numbers = #tpu.dot_dimension_numbers<[1], [0], [0], [1], [0, 0, 1, 1], [], []>} : vector<2x32xf32>, vector<32x128xf32>, vector<2x128xf32> -> vector<2x128xf32>
    %142 = arith.addf %137, %141 : vector<2x128xf32>
    %c48 = arith.constant 48 : index
    %c0_131 = arith.constant 0 : index
    %143 = vector.load %arg10[%c48, %c0_131] : memref<50x128xf32, #tpu.memory_space<vmem>>, vector<2x32xf32>
    %c24_132 = arith.constant 24 : index
    %c0_133 = arith.constant 0 : index
    %c0_134 = arith.constant 0 : index
    %144 = vector.load %arg3[%c24_132, %c0_133, %c0_134] : memref<25x32x128xf32, #tpu.memory_space<vmem>>, vector<1x32x128xf32>
    %145 = vector.shape_cast %144 : vector<1x32x128xf32> to vector<32x128xf32>
    %cst_135 = arith.constant dense<0.000000e+00> : vector<2x128xf32>
    %146 = tpu.matmul %143, %145, %cst_135 {dimension_numbers = #tpu.dot_dimension_numbers<[1], [0], [0], [1], [0, 0, 1, 1], [], []>} : vector<2x32xf32>, vector<32x128xf32>, vector<2x128xf32> -> vector<2x128xf32>
    %147 = arith.addf %142, %146 : vector<2x128xf32>
    %c0_136 = arith.constant 0 : index
    %c0_137 = arith.constant 0 : index
    %148 = vector.load %arg4[%c0_136, %c0_137] : memref<1x128xf32, #tpu.memory_space<vmem>>, vector<1x128xf32>
    %149 = vector.broadcast %148 : vector<1x128xf32> to vector<2x128xf32>
    %150 = arith.addf %147, %149 : vector<2x128xf32>
    %cst_138 = arith.constant 0.000000e+00 : f32
    %151 = vector.broadcast %cst_138 : f32 to vector<2x128xf32>
    %152 = arith.maximumf %150, %151 : vector<2x128xf32>
    %c0_139 = arith.constant 0 : index
    %c0_140 = arith.constant 0 : index
    %153 = vector.load %arg5[%c0_139, %c0_140] : memref<128x128xf32, #tpu.memory_space<vmem>>, vector<128x128xf32>
    %cst_141 = arith.constant dense<0.000000e+00> : vector<2x128xf32>
    %154 = tpu.matmul %152, %153, %cst_141 {dimension_numbers = #tpu.dot_dimension_numbers<[1], [0], [0], [1], [0, 0, 1, 1], [], []>} : vector<2x128xf32>, vector<128x128xf32>, vector<2x128xf32> -> vector<2x128xf32>
    %c0_142 = arith.constant 0 : index
    %c0_143 = arith.constant 0 : index
    %155 = vector.load %arg6[%c0_142, %c0_143] : memref<1x128xf32, #tpu.memory_space<vmem>>, vector<1x128xf32>
    %156 = vector.broadcast %155 : vector<1x128xf32> to vector<2x128xf32>
    %157 = arith.addf %154, %156 : vector<2x128xf32>
    %cst_144 = arith.constant 0.000000e+00 : f32
    %158 = vector.broadcast %cst_144 : f32 to vector<2x128xf32>
    %159 = arith.maximumf %157, %158 : vector<2x128xf32>
    %c0_145 = arith.constant 0 : index
    %c0_146 = arith.constant 0 : index
    %160 = vector.load %arg7[%c0_145, %c0_146] : memref<128x128xf32, #tpu.memory_space<vmem>>, vector<128x128xf32>
    %cst_147 = arith.constant dense<0.000000e+00> : vector<2x128xf32>
    %161 = tpu.matmul %159, %160, %cst_147 {dimension_numbers = #tpu.dot_dimension_numbers<[1], [0], [0], [1], [0, 0, 1, 1], [], []>} : vector<2x128xf32>, vector<128x128xf32>, vector<2x128xf32> -> vector<2x128xf32>
    %c0_148 = arith.constant 0 : index
    %c0_149 = arith.constant 0 : index
    %162 = vector.load %arg8[%c0_148, %c0_149] : memref<1x128xf32, #tpu.memory_space<vmem>>, vector<1x128xf32>
    %163 = vector.broadcast %162 : vector<1x128xf32> to vector<2x128xf32>
    %164 = arith.addf %161, %163 : vector<2x128xf32>
    %c0_150 = arith.constant 0 : index
    %c0_151 = arith.constant 0 : index
    %165 = vector.load %arg9[%c0_150, %c0_151] : memref<2x128xf32, #tpu.memory_space<vmem>>, vector<2x128xf32>
    tpu.vector_store %arg9[%c0_150, %c0_151], %164 {strides = array<i32>} : memref<2x128xf32, #tpu.memory_space<vmem>>, vector<2x128xf32>,
    return
  }
}

</mosaic_0001>

<bundles_post_ra>
// kernel: lenet_forward.2
= control target key start
LH: loop header
LB: loop body
LE: loop exit
PB: predicated region body
PF: predicated region fallthrough
CT: control target
= control target key end

     0   :  { %vm221_vm0 = vcmask 1042432   ;;  %vm73_vm1 = vcmask 613376   ;;  %s3163_s1 = inlined_call_operand.vmem [shape: f32[75,128], index: 1, kind: input, shape index: {}]   ;;  %s3164_s0 = inlined_call_operand.vmem [shape: f32[4,392,75], index: 0, kind: input, shape index: {}]   ;;  %s3165_s2 = inlined_call_operand.vmem [shape: f32[1,128], index: 2, kind: input, shape index: {}]   ;;  %s3166_s3 = inlined_call_operand.vmem [shape: f32[392,128], index: 3, kind: output, shape index: {}]  }
   0x1   :  { %v23_v0 = vld [vmem:[%s3163_s1 + $0x48] sm:$0x7]  ;;  %v22_v1 = vld [vmem:[%s3163_s1 + $0x40] sm:$0xff]  ;;  %v21_v2 = vld [vmem:[%s3163_s1 + $0x38] sm:$0xff] }
   0x2   :  { %1972 = vmatpush.msk.msra.mxu2 %vm221_vm0, %v23_v0  ;;  %2071 = vmatpush.msk.msra.mxu3 %vm221_vm0, %v23_v0  ;;  %v20_v3 = vld [vmem:[%s3163_s1 + $0x30] sm:$0xff]  ;;  %v19_v4 = vld [vmem:[%s3163_s1 + $0x28] sm:$0xff]  ;;  %v18_v5 = vld [vmem:[%s3163_s1 + $0x20] sm:$0xff] }
   0x3   :  { %1774 = vmatpush.msk.msra.mxu0 %vm221_vm0, %v23_v0  ;;  %1873 = vmatpush.msk.msra.mxu1 %vm221_vm0, %v23_v0  ;;  %v17_v6 = vld [vmem:[%s3163_s1 + $0x18] sm:$0xff]  ;;  %v16_v7 = vld [vmem:[%s3163_s1 + $0x10] sm:$0xff]  ;;  %v15_v8 = vld [vmem:[%s3163_s1 + $0x8] sm:$0xff] }
   0x4   :  { %1003 = vmatpush.msra.mxu2 %v22_v1  ;;  %1413 = vmatpush.msra.mxu3 %v22_v1  ;;  %v14_v9 = vld [vmem:[%s3163_s1] sm:$0xff]  ;;  %v1923_v10 = vld [vmem:[%s3164_s0 + $0x310] sm:$0xff]  ;;  %v2022_v11 = vld [vmem:[%s3164_s0 + $0x498] sm:$0xff] }
   0x5   :  { %232 = vmatpush.msra.mxu0 %v22_v1  ;;  %593 = vmatpush.msra.mxu1 %v22_v1  ;;  %v24_v12 = vld [vmem:[%s3164_s0] sm:$0xff]  ;;  %v1824_v13 = vld [vmem:[%s3164_s0 + $0x188] sm:$0xff]  ;;  %v1924_v14 = vld [vmem:[%s3164_s0 + $0x318] sm:$0xff] }
   0x6   :  { %1004 = vmatpush.msra.mxu2 %v21_v2  ;;  %1414 = vmatpush.msra.mxu3 %v21_v2  ;;  %v2023_v15 = vld [vmem:[%s3164_s0 + $0x4a0] sm:$0xff]  ;;  %v25_v16 = vld [vmem:[%s3164_s0 + $0x8] sm:$0xff]  ;;  %v1825_v17 = vld [vmem:[%s3164_s0 + $0x190] sm:$0xff] }
   0x7   :  { %233 = vmatpush.msra.mxu0 %v21_v2  ;;  %594 = vmatpush.msra.mxu1 %v21_v2  ;;  %v1925_v18 = vld [vmem:[%s3164_s0 + $0x320] sm:$0xff]  ;;  %v2024_v19 = vld [vmem:[%s3164_s0 + $0x4a8] sm:$0xff]  ;;  %v26_v20 = vld [vmem:[%s3164_s0 + $0x10] sm:$0xff] }
   0x8   :  { %1005 = vmatpush.msra.mxu2 %v20_v3  ;;  %1415 = vmatpush.msra.mxu3 %v20_v3  ;;  %v1826_v21 = vld [vmem:[%s3164_s0 + $0x198] sm:$0xff]  ;;  %v1926_v22 = vld [vmem:[%s3164_s0 + $0x328] sm:$0xff]  ;;  %v2025_v23 = vld [vmem:[%s3164_s0 + $0x4b0] sm:$0xff] }
   0x9   :  { %234 = vmatpush.msra.mxu0 %v20_v3  ;;  %595 = vmatpush.msra.mxu1 %v20_v3  ;;  %v27_v24 = vld [vmem:[%s3164_s0 + $0x18] sm:$0xff]  ;;  %v1827_v25 = vld [vmem:[%s3164_s0 + $0x1a0] sm:$0xff]  ;;  %v1927_v26 = vld [vmem:[%s3164_s0 + $0x330] sm:$0xff] }
   0xa   :  { %1006 = vmatpush.msra.mxu2 %v19_v4  ;;  %1416 = vmatpush.msra.mxu3 %v19_v4  ;;  %v2026_v27 = vld [vmem:[%s3164_s0 + $0x4b8] sm:$0xff]  ;;  %v28_v28 = vld [vmem:[%s3164_s0 + $0x20] sm:$0xff]  ;;  %v1828_v29 = vld [vmem:[%s3164_s0 + $0x1a8] sm:$0xff] }
   0xb   :  { %235 = vmatpush.msra.mxu0 %v19_v4  ;;  %596 = vmatpush.msra.mxu1 %v19_v4  ;;  %v1928_v30 = vld [vmem:[%s3164_s0 + $0x338] sm:$0xff]  ;;  %v2027_v31 = vld [vmem:[%s3164_s0 + $0x4c0] sm:$0xff]  ;;  %v29_v32 = vld [vmem:[%s3164_s0 + $0x28] sm:$0xff] }
   0xc   :  { %1007 = vmatpush.msra.mxu2 %v18_v5  ;;  %1417 = vmatpush.msra.mxu3 %v18_v5  ;;  %v1829_v33 = vld [vmem:[%s3164_s0 + $0x1b0] sm:$0xff]  ;;  %v1929_v34 = vld [vmem:[%s3164_s0 + $0x340] sm:$0xff]  ;;  %v2028_v35 = vld [vmem:[%s3164_s0 + $0x4c8] sm:$0xff] }
   0xd   :  { %236 = vmatpush.msra.mxu0 %v18_v5  ;;  %597 = vmatpush.msra.mxu1 %v18_v5  ;;  %v30_v36 = vld [vmem:[%s3164_s0 + $0x30] sm:$0xff]  ;;  %v1830_v37 = vld [vmem:[%s3164_s0 + $0x1b8] sm:$0xff]  ;;  %v1930_v38 = vld [vmem:[%s3164_s0 + $0x348] sm:$0xff] }
   0xe   :  { %1008 = vmatpush.msra.mxu2 %v17_v6  ;;  %1418 = vmatpush.msra.mxu3 %v17_v6  ;;  %v2029_v39 = vld [vmem:[%s3164_s0 + $0x4d0] sm:$0xff]  ;;  %v31_v40 = vld [vmem:[%s3164_s0 + $0x38] sm:$0xff]  ;;  %v1831_v41 = vld [vmem:[%s3164_s0 + $0x1c0] sm:$0xff] }
   0xf   :  { %237 = vmatpush.msra.mxu0 %v17_v6  ;;  %598 = vmatpush.msra.mxu1 %v17_v6  ;;  %v1931_v42 = vld [vmem:[%s3164_s0 + $0x350] sm:$0xff]  ;;  %v2030_v43 = vld [vmem:[%s3164_s0 + $0x4d8] sm:$0xff]  ;;  %v32_v44 = vld [vmem:[%s3164_s0 + $0x40] sm:$0xff] }
  0x10   :  { %1009 = vmatpush.msra.mxu2 %v16_v7  ;;  %1419 = vmatpush.msra.mxu3 %v16_v7  ;;  %v1832_v45 = vld [vmem:[%s3164_s0 + $0x1c8] sm:$0xff]  ;;  %v1932_v46 = vld [vmem:[%s3164_s0 + $0x358] sm:$0xff]  ;;  %v2031_v47 = vld [vmem:[%s3164_s0 + $0x4e0] sm:$0xff] }
  0x11   :  { %238 = vmatpush.msra.mxu0 %v16_v7  ;;  %599 = vmatpush.msra.mxu1 %v16_v7  ;;  %v33_v48 = vld [vmem:[%s3164_s0 + $0x48] sm:$0xff]  ;;  %v1833_v49 = vld [vmem:[%s3164_s0 + $0x1d0] sm:$0xff]  ;;  %v1933_v50 = vld [vmem:[%s3164_s0 + $0x360] sm:$0xff] }
  0x12   :  { %1010 = vmatpush.msra.mxu2 %v15_v8  ;;  %1420 = vmatpush.msra.mxu3 %v15_v8  ;;  %v2032_v51 = vld [vmem:[%s3164_s0 + $0x4e8] sm:$0xff]  ;;  %v34_v52 = vld [vmem:[%s3164_s0 + $0x50] sm:$0xff]  ;;  %v1834_v53 = vld [vmem:[%s3164_s0 + $0x1d8] sm:$0xff] }
  0x13   :  { %239 = vmatpush.msra.mxu0 %v15_v8  ;;  %600 = vmatpush.msra.mxu1 %v15_v8  ;;  %v1934_v54 = vld [vmem:[%s3164_s0 + $0x368] sm:$0xff]  ;;  %v2033_v55 = vld [vmem:[%s3164_s0 + $0x4f0] sm:$0xff]  ;;  %v35_v56 = vld [vmem:[%s3164_s0 + $0x58] sm:$0xff] }
  0x14   :  { %1011 = vmatpush.msra.mxu2 %v14_v9  ;;  %1421 = vmatpush.msra.mxu3 %v14_v9  ;;  %v1835_v57 = vld [vmem:[%s3164_s0 + $0x1e0] sm:$0xff]  ;;  %v1935_v58 = vld [vmem:[%s3164_s0 + $0x370] sm:$0xff]  ;;  %v2034_v59 = vld [vmem:[%s3164_s0 + $0x4f8] sm:$0xff] }
  0x15   :  { %1973 = vmatmul.msk.f32.vlgmr.msra.gmra.mxu2 %vm73_vm1, %v1923_v10  ;;  %2072 = vmatmul.msk.f32.vlgmr.msra.gmra.mxu3 %vm73_vm1, %v2022_v11  ;;  %v36_v60 = vld [vmem:[%s3164_s0 + $0x60] sm:$0xff]  ;;  %v1836_v61 = vld [vmem:[%s3164_s0 + $0x1e8] sm:$0xff]  ;;  %v1936_v62 = vld [vmem:[%s3164_s0 + $0x378] sm:$0xff] }
  0x16   :  { %240 = vmatpush.msra.mxu0 %v14_v9  ;;  %601 = vmatpush.msra.mxu1 %v14_v9  ;;  %v2035_v63 = vld [vmem:[%s3164_s0 + $0x500] sm:$0xff]  ;;  %v37_v0 = vld [vmem:[%s3164_s0 + $0x68] sm:$0xff]  ;;  %v1837_v1 = vld [vmem:[%s3164_s0 + $0x1f0] sm:$0xff] }
  0x17   :  { %1775 = vmatmul.msk.f32.vlgmr.msra.gmra.mxu0 %vm73_vm1, %v24_v12  ;;  %1874 = vmatmul.msk.f32.vlgmr.msra.gmra.mxu1 %vm73_vm1, %v1824_v13  ;;  %v1937_v2 = vld [vmem:[%s3164_s0 + $0x380] sm:$0xff]  ;;  %v2036_v3 = vld [vmem:[%s3164_s0 + $0x508] sm:$0xff]  ;;  %v38_v4 = vld [vmem:[%s3164_s0 + $0x70] sm:$0xff] }
  0x18   :  { %v1838_v5 = vld [vmem:[%s3164_s0 + $0x1f8] sm:$0xff]  ;;  %v1938_v6 = vld [vmem:[%s3164_s0 + $0x388] sm:$0xff]  ;;  %v2037_v7 = vld [vmem:[%s3164_s0 + $0x510] sm:$0xff] }
  0x19   :  { %v39_v8 = vld [vmem:[%s3164_s0 + $0x78] sm:$0xff]  ;;  %v1839_v9 = vld [vmem:[%s3164_s0 + $0x200] sm:$0xff]  ;;  %v1939_v10 = vld [vmem:[%s3164_s0 + $0x390] sm:$0xff] }
  0x1a   :  { %v2038_v11 = vld [vmem:[%s3164_s0 + $0x518] sm:$0xff] }
  0x1d   :  { %1974 = vmatmul.msk.f32.gmra.mxu2 %vm73_vm1, %v1924_v14  ;;  %2073 = vmatmul.msk.f32.gmra.mxu3 %vm73_vm1, %v2023_v15  ;;  %v40_v14 = vld [vmem:[%s3164_s0 + $0x80] sm:$0xff]  ;;  %v1840_v15 = vld [vmem:[%s3164_s0 + $0x208] sm:$0xff] }
  0x1f   :  { %1776 = vmatmul.msk.f32.gmra.mxu0 %vm73_vm1, %v25_v16  ;;  %1875 = vmatmul.msk.f32.gmra.mxu1 %vm73_vm1, %v1825_v17 }
  0x25   :  { %1975 = vmatmul.msk.f32.gmra.mxu2 %vm73_vm1, %v1925_v18  ;;  %2074 = vmatmul.msk.f32.gmra.mxu3 %vm73_vm1, %v2024_v19 }
  0x27   :  { %1777 = vmatmul.msk.f32.gmra.mxu0 %vm73_vm1, %v26_v20  ;;  %1876 = vmatmul.msk.f32.gmra.mxu1 %vm73_vm1, %v1826_v21  ;;  %v2448_v20 = vld [vmem:[%s3165_s2] ss:$0 sm:$0xff]  ;;  %v1940_v21 = vld [vmem:[%s3164_s0 + $0x398] sm:$0xff] }
  0x2d   :  { %1976 = vmatmul.msk.f32.gmra.mxu2 %vm73_vm1, %v1926_v22  ;;  %2075 = vmatmul.msk.f32.gmra.mxu3 %vm73_vm1, %v2025_v23  ;;  %v2039_v22 = vld [vmem:[%s3164_s0 + $0x520] sm:$0xff] }
  0x2f   :  { %1778 = vmatmul.msk.f32.gmra.mxu0 %vm73_vm1, %v27_v24  ;;  %1877 = vmatmul.msk.f32.gmra.mxu1 %vm73_vm1, %v1827_v25 }
  0x35   :  { %1977 = vmatmul.msk.f32.gmra.mxu2 %vm73_vm1, %v1927_v26  ;;  %2076 = vmatmul.msk.f32.gmra.mxu3 %vm73_vm1, %v2026_v27  ;;  %v41_v26 = vld [vmem:[%s3164_s0 + $0x88] sm:$0xff]  ;;  %v1841_v27 = vld [vmem:[%s3164_s0 + $0x210] sm:$0xff] }
  0x37   :  { %1779 = vmatmul.msk.f32.gmra.mxu0 %vm73_vm1, %v28_v28  ;;  %1878 = vmatmul.msk.f32.gmra.mxu1 %vm73_vm1, %v1828_v29 }
  0x3d   :  { %1978 = vmatmul.msk.f32.gmra.mxu2 %vm73_vm1, %v1928_v30  ;;  %2077 = vmatmul.msk.f32.gmra.mxu3 %vm73_vm1, %v2027_v31 }
  0x3f   :  { %1780 = vmatmul.msk.f32.gmra.mxu0 %vm73_vm1, %v29_v32  ;;  %1879 = vmatmul.msk.f32.gmra.mxu1 %vm73_vm1, %v1829_v33 }
  0x45   :  { %1979 = vmatmul.msk.f32.gmra.mxu2 %vm73_vm1, %v1929_v34  ;;  %2078 = vmatmul.msk.f32.gmra.mxu3 %vm73_vm1, %v2028_v35  ;;  %v1941_v34 = vld [vmem:[%s3164_s0 + $0x3a0] sm:$0xff]  ;;  %v2040_v35 = vld [vmem:[%s3164_s0 + $0x528] sm:$0xff] }
  0x47   :  { %1781 = vmatmul.msk.f32.gmra.mxu0 %vm73_vm1, %v30_v36  ;;  %1880 = vmatmul.msk.f32.gmra.mxu1 %vm73_vm1, %v1830_v37 }
  0x4d   :  { %1980 = vmatmul.msk.f32.gmra.mxu2 %vm73_vm1, %v1930_v38  ;;  %2079 = vmatmul.msk.f32.gmra.mxu3 %vm73_vm1, %v2029_v39  ;;  %v42_v39 = vld [vmem:[%s3164_s0 + $0x90] sm:$0xff] }
  0x4f   :  { %1782 = vmatmul.msk.f32.gmra.mxu0 %vm73_vm1, %v31_v40  ;;  %1881 = vmatmul.msk.f32.gmra.mxu1 %vm73_vm1, %v1831_v41  ;;  %v1842_v40 = vld [vmem:[%s3164_s0 + $0x218] sm:$0xff] }
  0x55   :  { %1981 = vmatmul.msk.f32.gmra.mxu2 %vm73_vm1, %v1931_v42  ;;  %2080 = vmatmul.msk.f32.gmra.mxu3 %vm73_vm1, %v2030_v43 }
  0x57   :  { %1783 = vmatmul.msk.f32.gmra.mxu0 %vm73_vm1, %v32_v44  ;;  %1882 = vmatmul.msk.f32.gmra.mxu1 %vm73_vm1, %v1832_v45 }
  0x5d   :  { %1982 = vmatmul.msk.f32.gmra.mxu2 %vm73_vm1, %v1932_v46  ;;  %2081 = vmatmul.msk.f32.gmra.mxu3 %vm73_vm1, %v2031_v47  ;;  %v1942_v47 = vld [vmem:[%s3164_s0 + $0x3a8] sm:$0xff] }
  0x5f   :  { %1784 = vmatmul.msk.f32.gmra.mxu0 %vm73_vm1, %v33_v48  ;;  %1883 = vmatmul.msk.f32.gmra.mxu1 %vm73_vm1, %v1833_v49  ;;  %v2041_v48 = vld [vmem:[%s3164_s0 + $0x530] sm:$0xff] }
  0x65   :  { %1983 = vmatmul.msk.f32.gmra.mxu2 %vm73_vm1, %v1933_v50  ;;  %2082 = vmatmul.msk.f32.gmra.mxu3 %vm73_vm1, %v2032_v51 }
  0x67   :  { %1785 = vmatmul.msk.f32.gmra.mxu0 %vm73_vm1, %v34_v52  ;;  %1884 = vmatmul.msk.f32.gmra.mxu1 %vm73_vm1, %v1834_v53  ;;  %v43_v52 = vld [vmem:[%s3164_s0 + $0x98] sm:$0xff]  ;;  %v1843_v53 = vld [vmem:[%s3164_s0 + $0x220] sm:$0xff] }
  0x6d   :  { %1984 = vmatmul.msk.f32.gmra.mxu2 %vm73_vm1, %v1934_v54  ;;  %2083 = vmatmul.msk.f32.gmra.mxu3 %vm73_vm1, %v2033_v55 }
  0x6f   :  { %1786 = vmatmul.msk.f32.gmra.mxu0 %vm73_vm1, %v35_v56  ;;  %1885 = vmatmul.msk.f32.gmra.mxu1 %vm73_vm1, %v1835_v57 }
  0x75   :  { %1985 = vmatmul.msk.f32.gmra.mxu2 %vm73_vm1, %v1935_v58  ;;  %2084 = vmatmul.msk.f32.gmra.mxu3 %vm73_vm1, %v2034_v59 }
  0x77   :  { %1787 = vmatmul.msk.f32.gmra.mxu0 %vm73_vm1, %v36_v60  ;;  %1886 = vmatmul.msk.f32.gmra.mxu1 %vm73_vm1, %v1836_v61  ;;  %v1943_v60 = vld [vmem:[%s3164_s0 + $0x3b0] sm:$0xff]  ;;  %v2042_v61 = vld [vmem:[%s3164_s0 + $0x538] sm:$0xff] }
  0x7d   :  { %1986 = vmatmul.msk.f32.gmra.mxu2 %vm73_vm1, %v1936_v62  ;;  %2085 = vmatmul.msk.f32.gmra.mxu3 %vm73_vm1, %v2035_v63 }
  0x7f   :  { %1788 = vmatmul.msk.f32.gmra.mxu0 %vm73_vm1, %v37_v0  ;;  %1887 = vmatmul.msk.f32.gmra.mxu1 %vm73_vm1, %v1837_v1  ;;  %v44_v1 = vld [vmem:[%s3164_s0 + $0xa0] sm:$0xff] }
  0x85   :  { %1987 = vmatmul.msk.f32.gmra.mxu2 %vm73_vm1, %v1937_v2  ;;  %2086 = vmatmul.msk.f32.gmra.mxu3 %vm73_vm1, %v2036_v3  ;;  %v1844_v2 = vld [vmem:[%s3164_s0 + $0x228] sm:$0xff] }
  0x87   :  { %1789 = vmatmul.msk.f32.gmra.mxu0 %vm73_vm1, %v38_v4  ;;  %1888 = vmatmul.msk.f32.gmra.mxu1 %vm73_vm1, %v1838_v5 }
  0x8d   :  { %1988 = vmatmul.msk.f32.gmra.mxu2 %vm73_vm1, %v1938_v6  ;;  %2087 = vmatmul.msk.f32.gmra.mxu3 %vm73_vm1, %v2037_v7 }
  0x8f   :  { %1790 = vmatmul.msk.f32.gmra.mxu0 %vm73_vm1, %v39_v8  ;;  %1889 = vmatmul.msk.f32.gmra.mxu1 %vm73_vm1, %v1839_v9  ;;  %v1944_v9 = vld [vmem:[%s3164_s0 + $0x3b8] sm:$0xff] }
  0x94   :  { %v242_v12 = vpop.f32.mrf.mxu0  ;;  %v603_v13 = vpop.f32.mrf.mxu1 }
  0x95   :  { %1989 = vmatmul.msk.f32.gmra.mxu2 %vm73_vm1, %v1939_v10  ;;  %v750_v16 = vmax.f32 %v242_v12, %v603_v13  ;;  %2088 = vmatmul.msk.f32.gmra.mxu3 %vm73_vm1, %v2038_v11  ;;  %v2043_v10 = vld [vmem:[%s3164_s0 + $0x540] sm:$0xff] }
  0x97   :  { %1791 = vmatmul.msk.f32.gmra.mxu0 %vm73_vm1, %v40_v14  ;;  %1890 = vmatmul.msk.f32.gmra.mxu1 %vm73_vm1, %v1840_v15  ;;  %v45_v14 = vld [vmem:[%s3164_s0 + $0xa8] sm:$0xff]  ;;  %v1845_v15 = vld [vmem:[%s3164_s0 + $0x230] sm:$0xff] }
  0x98   :  { %v1013_v17 = vpop.f32.mrf.mxu2  ;;  %v1423_v18 = vpop.f32.mrf.mxu3 }
  0x99   :  { %v1160_v19 = vmax.f32 %v750_v16, %v1013_v17 }
  0x9b   :  { %v1570_v23 = vmax.f32 %v1160_v19, %v1423_v18 }
  0x9c   :  { %v245_v24 = vpop.f32.mrf.mxu0  ;;  %v606_v25 = vpop.f32.mrf.mxu1 }
  0x9d   :  { %v1623_v28 = vadd.f32 %v2448_v20, %v1570_v23  ;;  %1990 = vmatmul.msk.f32.gmra.mxu2 %vm73_vm1, %v1940_v21  ;;  %v751_v29 = vmax.f32 %v245_v24, %v606_v25  ;;  %2089 = vmatmul.msk.f32.gmra.mxu3 %vm73_vm1, %v2039_v22  ;;  %v1945_v23 = vld [vmem:[%s3164_s0 + $0x3c0] sm:$0xff]  ;;  %v2044_v24 = vld [vmem:[%s3164_s0 + $0x548] sm:$0xff] }
  0x9f   :  { %v1672_v30 = vmax.f32 %v1623_v28, 0.0  ;;  %1792 = vmatmul.msk.f32.gmra.mxu0 %vm73_vm1, %v41_v26  ;;  %1891 = vmatmul.msk.f32.gmra.mxu1 %vm73_vm1, %v1841_v27  ;;  %v46_v28 = vld [vmem:[%s3164_s0 + $0xb0] sm:$0xff] }
  0xa0   :  { %v1016_v31 = vpop.f32.mrf.mxu2  ;;  %v1426_v32 = vpop.f32.mrf.mxu3 }
  0xa1   :  { %1721 = vst [vmem:[%s3166_s3] sm:$0xff] %v1672_v30  ;;  %v1161_v33 = vmax.f32 %v751_v29, %v1016_v31  ;;  %v1846_v29 = vld [vmem:[%s3164_s0 + $0x238] sm:$0xff] }
  0xa3   :  { %v1571_v36 = vmax.f32 %v1161_v33, %v1426_v32 }
  0xa4   :  { %v248_v37 = vpop.f32.mrf.mxu0  ;;  %v609_v38 = vpop.f32.mrf.mxu1 }
  0xa5   :  { %v1624_v41 = vadd.f32 %v2448_v20, %v1571_v36  ;;  %1991 = vmatmul.msk.f32.gmra.mxu2 %vm73_vm1, %v1941_v34  ;;  %v752_v42 = vmax.f32 %v248_v37, %v609_v38  ;;  %2090 = vmatmul.msk.f32.gmra.mxu3 %vm73_vm1, %v2040_v35  ;;  %v1946_v36 = vld [vmem:[%s3164_s0 + $0x3c8] sm:$0xff]  ;;  %v2045_v37 = vld [vmem:[%s3164_s0 + $0x550] sm:$0xff] }
  0xa7   :  { %v1673_v43 = vmax.f32 %v1624_v41, 0.0  ;;  %1793 = vmatmul.msk.f32.gmra.mxu0 %vm73_vm1, %v42_v39  ;;  %1892 = vmatmul.msk.f32.gmra.mxu1 %vm73_vm1, %v1842_v40  ;;  %v47_v41 = vld [vmem:[%s3164_s0 + $0xb8] sm:$0xff] }
  0xa8   :  { %v1019_v44 = vpop.f32.mrf.mxu2  ;;  %v1429_v45 = vpop.f32.mrf.mxu3 }
  0xa9   :  { %1722 = vst [vmem:[%s3166_s3 + $0x8] sm:$0xff] %v1673_v43  ;;  %v1162_v46 = vmax.f32 %v752_v42, %v1019_v44  ;;  %v1847_v42 = vld [vmem:[%s3164_s0 + $0x240] sm:$0xff] }
  0xab   :  { %v1572_v49 = vmax.f32 %v1162_v46, %v1429_v45 }
  0xac   :  { %v251_v50 = vpop.f32.mrf.mxu0  ;;  %v612_v51 = vpop.f32.mrf.mxu1 }
  0xad   :  { %v1625_v54 = vadd.f32 %v2448_v20, %v1572_v49  ;;  %1992 = vmatmul.msk.f32.gmra.mxu2 %vm73_vm1, %v1942_v47  ;;  %v753_v55 = vmax.f32 %v251_v50, %v612_v51  ;;  %2091 = vmatmul.msk.f32.gmra.mxu3 %vm73_vm1, %v2041_v48  ;;  %v1947_v49 = vld [vmem:[%s3164_s0 + $0x3d0] sm:$0xff]  ;;  %v2046_v50 = vld [vmem:[%s3164_s0 + $0x558] sm:$0xff] }
  0xaf   :  { %v1674_v56 = vmax.f32 %v1625_v54, 0.0  ;;  %1794 = vmatmul.msk.f32.gmra.mxu0 %vm73_vm1, %v43_v52  ;;  %1893 = vmatmul.msk.f32.gmra.mxu1 %vm73_vm1, %v1843_v53  ;;  %v48_v54 = vld [vmem:[%s3164_s0 + $0xc0] sm:$0xff] }
  0xb0   :  { %v1022_v57 = vpop.f32.mrf.mxu2  ;;  %v1432_v58 = vpop.f32.mrf.mxu3 }
  0xb1   :  { %1723 = vst [vmem:[%s3166_s3 + $0x10] sm:$0xff] %v1674_v56  ;;  %v1163_v59 = vmax.f32 %v753_v55, %v1022_v57  ;;  %v1848_v55 = vld [vmem:[%s3164_s0 + $0x248] sm:$0xff] }
  0xb3   :  { %v1573_v62 = vmax.f32 %v1163_v59, %v1432_v58 }
  0xb4   :  { %v254_v63 = vpop.f32.mrf.mxu0  ;;  %v615_v0 = vpop.f32.mrf.mxu1 }
  0xb5   :  { %v1626_v3 = vadd.f32 %v2448_v20, %v1573_v62  ;;  %1993 = vmatmul.msk.f32.gmra.mxu2 %vm73_vm1, %v1943_v60  ;;  %v754_v4 = vmax.f32 %v254_v63, %v615_v0  ;;  %2092 = vmatmul.msk.f32.gmra.mxu3 %vm73_vm1, %v2042_v61  ;;  %v1948_v62 = vld [vmem:[%s3164_s0 + $0x3d8] sm:$0xff]  ;;  %v2047_v63 = vld [vmem:[%s3164_s0 + $0x560] sm:$0xff] }
  0xb7   :  { %v1675_v5 = vmax.f32 %v1626_v3, 0.0  ;;  %1795 = vmatmul.msk.f32.gmra.mxu0 %vm73_vm1, %v44_v1  ;;  %1894 = vmatmul.msk.f32.gmra.mxu1 %vm73_vm1, %v1844_v2  ;;  %v49_v3 = vld [vmem:[%s3164_s0 + $0xc8] sm:$0xff] }
  0xb8   :  { %v1025_v6 = vpop.f32.mrf.mxu2  ;;  %v1435_v7 = vpop.f32.mrf.mxu3 }
  0xb9   :  { %1724 = vst [vmem:[%s3166_s3 + $0x18] sm:$0xff] %v1675_v5  ;;  %v1164_v8 = vmax.f32 %v754_v4, %v1025_v6  ;;  %v1849_v4 = vld [vmem:[%s3164_s0 + $0x250] sm:$0xff] }
  0xbb   :  { %v1574_v11 = vmax.f32 %v1164_v8, %v1435_v7 }
  0xbc   :  { %v257_v12 = vpop.f32.mrf.mxu0  ;;  %v618_v13 = vpop.f32.mrf.mxu1 }
  0xbd   :  { %v1627_v16 = vadd.f32 %v2448_v20, %v1574_v11  ;;  %1994 = vmatmul.msk.f32.gmra.mxu2 %vm73_vm1, %v1944_v9  ;;  %v755_v17 = vmax.f32 %v257_v12, %v618_v13  ;;  %2093 = vmatmul.msk.f32.gmra.mxu3 %vm73_vm1, %v2043_v10  ;;  %v1949_v11 = vld [vmem:[%s3164_s0 + $0x3e0] sm:$0xff]  ;;  %v2048_v12 = vld [vmem:[%s3164_s0 + $0x568] sm:$0xff] }
  0xbf   :  { %v1676_v18 = vmax.f32 %v1627_v16, 0.0  ;;  %1796 = vmatmul.msk.f32.gmra.mxu0 %vm73_vm1, %v45_v14  ;;  %1895 = vmatmul.msk.f32.gmra.mxu1 %vm73_vm1, %v1845_v15  ;;  %v50_v16 = vld [vmem:[%s3164_s0 + $0xd0] sm:$0xff] }
  0xc0   :  { %v1028_v19 = vpop.f32.mrf.mxu2  ;;  %v1438_v21 = vpop.f32.mrf.mxu3 }
  0xc1   :  { %1725 = vst [vmem:[%s3166_s3 + $0x20] sm:$0xff] %v1676_v18  ;;  %v1165_v22 = vmax.f32 %v755_v17, %v1028_v19  ;;  %v1850_v17 = vld [vmem:[%s3164_s0 + $0x258] sm:$0xff] }
  0xc3   :  { %v1575_v25 = vmax.f32 %v1165_v22, %v1438_v21 }
  0xc4   :  { %v260_v26 = vpop.f32.mrf.mxu0  ;;  %v621_v27 = vpop.f32.mrf.mxu1 }
  0xc5   :  { %v1628_v30 = vadd.f32 %v2448_v20, %v1575_v25  ;;  %1995 = vmatmul.msk.f32.gmra.mxu2 %vm73_vm1, %v1945_v23  ;;  %v756_v31 = vmax.f32 %v260_v26, %v621_v27  ;;  %2094 = vmatmul.msk.f32.gmra.mxu3 %vm73_vm1, %v2044_v24  ;;  %v1950_v25 = vld [vmem:[%s3164_s0 + $0x3e8] sm:$0xff]  ;;  %v2049_v26 = vld [vmem:[%s3164_s0 + $0x570] sm:$0xff] }
  0xc7   :  { %v1677_v32 = vmax.f32 %v1628_v30, 0.0  ;;  %1797 = vmatmul.msk.f32.gmra.mxu0 %vm73_vm1, %v46_v28  ;;  %1896 = vmatmul.msk.f32.gmra.mxu1 %vm73_vm1, %v1846_v29  ;;  %v51_v30 = vld [vmem:[%s3164_s0 + $0xd8] sm:$0xff] }
  0xc8   :  { %v1031_v33 = vpop.f32.mrf.mxu2  ;;  %v1441_v34 = vpop.f32.mrf.mxu3 }
  0xc9   :  { %1726 = vst [vmem:[%s3166_s3 + $0x28] sm:$0xff] %v1677_v32  ;;  %v1166_v35 = vmax.f32 %v756_v31, %v1031_v33  ;;  %v1851_v31 = vld [vmem:[%s3164_s0 + $0x260] sm:$0xff] }
  0xcb   :  { %v1576_v38 = vmax.f32 %v1166_v35, %v1441_v34 }
  0xcc   :  { %v263_v39 = vpop.f32.mrf.mxu0  ;;  %v624_v40 = vpop.f32.mrf.mxu1 }
  0xcd   :  { %v1629_v43 = vadd.f32 %v2448_v20, %v1576_v38  ;;  %1996 = vmatmul.msk.f32.gmra.mxu2 %vm73_vm1, %v1946_v36  ;;  %v757_v44 = vmax.f32 %v263_v39, %v624_v40  ;;  %2095 = vmatmul.msk.f32.gmra.mxu3 %vm73_vm1, %v2045_v37  ;;  %v1951_v38 = vld [vmem:[%s3164_s0 + $0x3f0] sm:$0xff]  ;;  %v2050_v39 = vld [vmem:[%s3164_s0 + $0x578] sm:$0xff] }
  0xcf   :  { %v1678_v45 = vmax.f32 %v1629_v43, 0.0  ;;  %1798 = vmatmul.msk.f32.gmra.mxu0 %vm73_vm1, %v47_v41  ;;  %1897 = vmatmul.msk.f32.gmra.mxu1 %vm73_vm1, %v1847_v42  ;;  %v52_v43 = vld [vmem:[%s3164_s0 + $0xe0] sm:$0xff] }
  0xd0   :  { %v1034_v46 = vpop.f32.mrf.mxu2  ;;  %v1444_v47 = vpop.f32.mrf.mxu3 }
  0xd1   :  { %1727 = vst [vmem:[%s3166_s3 + $0x30] sm:$0xff] %v1678_v45  ;;  %v1167_v48 = vmax.f32 %v757_v44, %v1034_v46  ;;  %v1852_v44 = vld [vmem:[%s3164_s0 + $0x268] sm:$0xff] }
  0xd3   :  { %v1577_v51 = vmax.f32 %v1167_v48, %v1444_v47 }
  0xd4   :  { %v266_v52 = vpop.f32.mrf.mxu0  ;;  %v627_v53 = vpop.f32.mrf.mxu1 }
  0xd5   :  { %v1630_v56 = vadd.f32 %v2448_v20, %v1577_v51  ;;  %1997 = vmatmul.msk.f32.gmra.mxu2 %vm73_vm1, %v1947_v49  ;;  %v758_v57 = vmax.f32 %v266_v52, %v627_v53  ;;  %2096 = vmatmul.msk.f32.gmra.mxu3 %vm73_vm1, %v2046_v50  ;;  %v1952_v51 = vld [vmem:[%s3164_s0 + $0x3f8] sm:$0xff]  ;;  %v2051_v52 = vld [vmem:[%s3164_s0 + $0x580] sm:$0xff] }
  0xd7   :  { %v1679_v58 = vmax.f32 %v1630_v56, 0.0  ;;  %1799 = vmatmul.msk.f32.gmra.mxu0 %vm73_vm1, %v48_v54  ;;  %1898 = vmatmul.msk.f32.gmra.mxu1 %vm73_vm1, %v1848_v55  ;;  %v53_v56 = vld [vmem:[%s3164_s0 + $0xe8] sm:$0xff] }
  0xd8   :  { %v1037_v59 = vpop.f32.mrf.mxu2  ;;  %v1447_v60 = vpop.f32.mrf.mxu3 }
  0xd9   :  { %1728 = vst [vmem:[%s3166_s3 + $0x38] sm:$0xff] %v1679_v58  ;;  %v1168_v61 = vmax.f32 %v758_v57, %v1037_v59  ;;  %v1853_v57 = vld [vmem:[%s3164_s0 + $0x270] sm:$0xff] }
  0xdb   :  { %v1578_v0 = vmax.f32 %v1168_v61, %v1447_v60 }
  0xdc   :  { %v269_v1 = vpop.f32.mrf.mxu0  ;;  %v630_v2 = vpop.f32.mrf.mxu1 }
  0xdd   :  { %v1631_v5 = vadd.f32 %v2448_v20, %v1578_v0  ;;  %1998 = vmatmul.msk.f32.gmra.mxu2 %vm73_vm1, %v1948_v62  ;;  %v759_v6 = vmax.f32 %v269_v1, %v630_v2  ;;  %2097 = vmatmul.msk.f32.gmra.mxu3 %vm73_vm1, %v2047_v63  ;;  %v1953_v0 = vld [vmem:[%s3164_s0 + $0x400] sm:$0xff]  ;;  %v2052_v1 = vld [vmem:[%s3164_s0 + $0x588] sm:$0xff] }
  0xdf   :  { %v1680_v7 = vmax.f32 %v1631_v5, 0.0  ;;  %1800 = vmatmul.msk.f32.gmra.mxu0 %vm73_vm1, %v49_v3  ;;  %1899 = vmatmul.msk.f32.gmra.mxu1 %vm73_vm1, %v1849_v4  ;;  %v54_v5 = vld [vmem:[%s3164_s0 + $0xf0] sm:$0xff] }
  0xe0   :  { %v1040_v8 = vpop.f32.mrf.mxu2  ;;  %v1450_v9 = vpop.f32.mrf.mxu3 }
  0xe1   :  { %1729 = vst [vmem:[%s3166_s3 + $0x40] sm:$0xff] %v1680_v7  ;;  %v1169_v10 = vmax.f32 %v759_v6, %v1040_v8  ;;  %v1854_v6 = vld [vmem:[%s3164_s0 + $0x278] sm:$0xff] }
  0xe3   :  { %v1579_v13 = vmax.f32 %v1169_v10, %v1450_v9 }
  0xe4   :  { %v272_v14 = vpop.f32.mrf.mxu0  ;;  %v633_v15 = vpop.f32.mrf.mxu1 }
  0xe5   :  { %v1632_v18 = vadd.f32 %v2448_v20, %v1579_v13  ;;  %1999 = vmatmul.msk.f32.gmra.mxu2 %vm73_vm1, %v1949_v11  ;;  %v760_v19 = vmax.f32 %v272_v14, %v633_v15  ;;  %2098 = vmatmul.msk.f32.gmra.mxu3 %vm73_vm1, %v2048_v12  ;;  %v1954_v13 = vld [vmem:[%s3164_s0 + $0x408] sm:$0xff]  ;;  %v2053_v14 = vld [vmem:[%s3164_s0 + $0x590] sm:$0xff] }
  0xe7   :  { %v1681_v21 = vmax.f32 %v1632_v18, 0.0  ;;  %1801 = vmatmul.msk.f32.gmra.mxu0 %vm73_vm1, %v50_v16  ;;  %1900 = vmatmul.msk.f32.gmra.mxu1 %vm73_vm1, %v1850_v17  ;;  %v55_v18 = vld [vmem:[%s3164_s0 + $0xf8] sm:$0xff] }
  0xe8   :  { %v1043_v22 = vpop.f32.mrf.mxu2  ;;  %v1453_v23 = vpop.f32.mrf.mxu3 }
  0xe9   :  { %1730 = vst [vmem:[%s3166_s3 + $0x48] sm:$0xff] %v1681_v21  ;;  %v1170_v24 = vmax.f32 %v760_v19, %v1043_v22  ;;  %v1855_v19 = vld [vmem:[%s3164_s0 + $0x280] sm:$0xff] }
  0xeb   :  { %v1580_v27 = vmax.f32 %v1170_v24, %v1453_v23 }
  0xec   :  { %v275_v28 = vpop.f32.mrf.mxu0  ;;  %v636_v29 = vpop.f32.mrf.mxu1 }
  0xed   :  { %v1633_v32 = vadd.f32 %v2448_v20, %v1580_v27  ;;  %2000 = vmatmul.msk.f32.gmra.mxu2 %vm73_vm1, %v1950_v25  ;;  %v761_v33 = vmax.f32 %v275_v28, %v636_v29  ;;  %2099 = vmatmul.msk.f32.gmra.mxu3 %vm73_vm1, %v2049_v26  ;;  %v1955_v27 = vld [vmem:[%s3164_s0 + $0x410] sm:$0xff]  ;;  %v2054_v28 = vld [vmem:[%s3164_s0 + $0x598] sm:$0xff] }
  0xef   :  { %v1682_v34 = vmax.f32 %v1633_v32, 0.0  ;;  %1802 = vmatmul.msk.f32.gmra.mxu0 %vm73_vm1, %v51_v30  ;;  %1901 = vmatmul.msk.f32.gmra.mxu1 %vm73_vm1, %v1851_v31  ;;  %v56_v32 = vld [vmem:[%s3164_s0 + $0x100] sm:$0xff] }
  0xf0   :  { %v1046_v35 = vpop.f32.mrf.mxu2  ;;  %v1456_v36 = vpop.f32.mrf.mxu3 }
  0xf1   :  { %1731 = vst [vmem:[%s3166_s3 + $0x50] sm:$0xff] %v1682_v34  ;;  %v1171_v37 = vmax.f32 %v761_v33, %v1046_v35  ;;  %v1856_v33 = vld [vmem:[%s3164_s0 + $0x288] sm:$0xff] }
  0xf3   :  { %v1581_v40 = vmax.f32 %v1171_v37, %v1456_v36 }
  0xf4   :  { %v278_v41 = vpop.f32.mrf.mxu0  ;;  %v639_v42 = vpop.f32.mrf.mxu1 }
  0xf5   :  { %v1634_v45 = vadd.f32 %v2448_v20, %v1581_v40  ;;  %2001 = vmatmul.msk.f32.gmra.mxu2 %vm73_vm1, %v1951_v38  ;;  %v762_v46 = vmax.f32 %v278_v41, %v639_v42  ;;  %2100 = vmatmul.msk.f32.gmra.mxu3 %vm73_vm1, %v2050_v39  ;;  %v1956_v40 = vld [vmem:[%s3164_s0 + $0x418] sm:$0xff]  ;;  %v2055_v41 = vld [vmem:[%s3164_s0 + $0x5a0] sm:$0xff] }
  0xf7   :  { %v1683_v47 = vmax.f32 %v1634_v45, 0.0  ;;  %1803 = vmatmul.msk.f32.gmra.mxu0 %vm73_vm1, %v52_v43  ;;  %1902 = vmatmul.msk.f32.gmra.mxu1 %vm73_vm1, %v1852_v44  ;;  %v57_v45 = vld [vmem:[%s3164_s0 + $0x108] sm:$0xff] }
  0xf8   :  { %v1049_v48 = vpop.f32.mrf.mxu2  ;;  %v1459_v49 = vpop.f32.mrf.mxu3 }
  0xf9   :  { %1732 = vst [vmem:[%s3166_s3 + $0x58] sm:$0xff] %v1683_v47  ;;  %v1172_v50 = vmax.f32 %v762_v46, %v1049_v48  ;;  %v1857_v46 = vld [vmem:[%s3164_s0 + $0x290] sm:$0xff] }
  0xfb   :  { %v1582_v53 = vmax.f32 %v1172_v50, %v1459_v49 }
  0xfc   :  { %v281_v54 = vpop.f32.mrf.mxu0  ;;  %v642_v55 = vpop.f32.mrf.mxu1 }
  0xfd   :  { %v1635_v58 = vadd.f32 %v2448_v20, %v1582_v53  ;;  %2002 = vmatmul.msk.f32.gmra.mxu2 %vm73_vm1, %v1952_v51  ;;  %v763_v59 = vmax.f32 %v281_v54, %v642_v55  ;;  %2101 = vmatmul.msk.f32.gmra.mxu3 %vm73_vm1, %v2051_v52  ;;  %v1957_v53 = vld [vmem:[%s3164_s0 + $0x420] sm:$0xff]  ;;  %v2056_v54 = vld [vmem:[%s3164_s0 + $0x5a8] sm:$0xff] }
  0xff   :  { %v1684_v60 = vmax.f32 %v1635_v58, 0.0  ;;  %1804 = vmatmul.msk.f32.gmra.mxu0 %vm73_vm1, %v53_v56  ;;  %1903 = vmatmul.msk.f32.gmra.mxu1 %vm73_vm1, %v1853_v57  ;;  %v58_v58 = vld [vmem:[%s3164_s0 + $0x110] sm:$0xff] }
 0x100   :  { %v1052_v61 = vpop.f32.mrf.mxu2  ;;  %v1462_v62 = vpop.f32.mrf.mxu3 }
 0x101   :  { %1733 = vst [vmem:[%s3166_s3 + $0x60] sm:$0xff] %v1684_v60  ;;  %v1173_v63 = vmax.f32 %v763_v59, %v1052_v61  ;;  %v1858_v59 = vld [vmem:[%s3164_s0 + $0x298] sm:$0xff] }
 0x103   :  { %v1583_v2 = vmax.f32 %v1173_v63, %v1462_v62 }
 0x104   :  { %v284_v3 = vpop.f32.mrf.mxu0  ;;  %v645_v4 = vpop.f32.mrf.mxu1 }
 0x105   :  { %v1636_v7 = vadd.f32 %v2448_v20, %v1583_v2  ;;  %2003 = vmatmul.msk.f32.gmra.mxu2 %vm73_vm1, %v1953_v0  ;;  %v764_v8 = vmax.f32 %v284_v3, %v645_v4  ;;  %2102 = vmatmul.msk.f32.gmra.mxu3 %vm73_vm1, %v2052_v1  ;;  %v1958_v2 = vld [vmem:[%s3164_s0 + $0x428] sm:$0xff]  ;;  %v2057_v3 = vld [vmem:[%s3164_s0 + $0x5b0] sm:$0xff] }
 0x107   :  { %v1685_v9 = vmax.f32 %v1636_v7, 0.0  ;;  %1805 = vmatmul.msk.f32.gmra.mxu0 %vm73_vm1, %v54_v5  ;;  %1904 = vmatmul.msk.f32.gmra.mxu1 %vm73_vm1, %v1854_v6  ;;  %v59_v7 = vld [vmem:[%s3164_s0 + $0x118] sm:$0xff] }
 0x108   :  { %v1055_v10 = vpop.f32.mrf.mxu2  ;;  %v1465_v11 = vpop.f32.mrf.mxu3 }
 0x109   :  { %1734 = vst [vmem:[%s3166_s3 + $0x68] sm:$0xff] %v1685_v9  ;;  %v1174_v12 = vmax.f32 %v764_v8, %v1055_v10  ;;  %v1859_v8 = vld [vmem:[%s3164_s0 + $0x2a0] sm:$0xff] }
 0x10b   :  { %v1584_v15 = vmax.f32 %v1174_v12, %v1465_v11 }
 0x10c   :  { %v287_v16 = vpop.f32.mrf.mxu0  ;;  %v648_v17 = vpop.f32.mrf.mxu1 }
 0x10d   :  { %v1637_v21 = vadd.f32 %v2448_v20, %v1584_v15  ;;  %2004 = vmatmul.msk.f32.gmra.mxu2 %vm73_vm1, %v1954_v13  ;;  %v765_v22 = vmax.f32 %v287_v16, %v648_v17  ;;  %2103 = vmatmul.msk.f32.gmra.mxu3 %vm73_vm1, %v2053_v14  ;;  %v1959_v15 = vld [vmem:[%s3164_s0 + $0x430] sm:$0xff]  ;;  %v2058_v16 = vld [vmem:[%s3164_s0 + $0x5b8] sm:$0xff] }
 0x10f   :  { %v1686_v23 = vmax.f32 %v1637_v21, 0.0  ;;  %1806 = vmatmul.msk.f32.gmra.mxu0 %vm73_vm1, %v55_v18  ;;  %1905 = vmatmul.msk.f32.gmra.mxu1 %vm73_vm1, %v1855_v19  ;;  %v60_v21 = vld [vmem:[%s3164_s0 + $0x120] sm:$0xff] }
 0x110   :  { %v1058_v24 = vpop.f32.mrf.mxu2  ;;  %v1468_v25 = vpop.f32.mrf.mxu3 }
 0x111   :  { %1735 = vst [vmem:[%s3166_s3 + $0x70] sm:$0xff] %v1686_v23  ;;  %v1175_v26 = vmax.f32 %v765_v22, %v1058_v24  ;;  %v1860_v22 = vld [vmem:[%s3164_s0 + $0x2a8] sm:$0xff] }
 0x113   :  { %v1585_v29 = vmax.f32 %v1175_v26, %v1468_v25 }
 0x114   :  { %v290_v30 = vpop.f32.mrf.mxu0  ;;  %v651_v31 = vpop.f32.mrf.mxu1 }
 0x115   :  { %v1638_v34 = vadd.f32 %v2448_v20, %v1585_v29  ;;  %2005 = vmatmul.msk.f32.gmra.mxu2 %vm73_vm1, %v1955_v27  ;;  %v766_v35 = vmax.f32 %v290_v30, %v651_v31  ;;  %2104 = vmatmul.msk.f32.gmra.mxu3 %vm73_vm1, %v2054_v28  ;;  %v1960_v29 = vld [vmem:[%s3164_s0 + $0x438] sm:$0xff]  ;;  %v2059_v30 = vld [vmem:[%s3164_s0 + $0x5c0] sm:$0xff] }
 0x117   :  { %v1687_v36 = vmax.f32 %v1638_v34, 0.0  ;;  %1807 = vmatmul.msk.f32.gmra.mxu0 %vm73_vm1, %v56_v32  ;;  %1906 = vmatmul.msk.f32.gmra.mxu1 %vm73_vm1, %v1856_v33  ;;  %v61_v34 = vld [vmem:[%s3164_s0 + $0x128] sm:$0xff] }
 0x118   :  { %v1061_v37 = vpop.f32.mrf.mxu2  ;;  %v1471_v38 = vpop.f32.mrf.mxu3 }
 0x119   :  { %1736 = vst [vmem:[%s3166_s3 + $0x78] sm:$0xff] %v1687_v36  ;;  %v1176_v39 = vmax.f32 %v766_v35, %v1061_v37  ;;  %v1861_v35 = vld [vmem:[%s3164_s0 + $0x2b0] sm:$0xff] }
 0x11b   :  { %v1586_v42 = vmax.f32 %v1176_v39, %v1471_v38 }
 0x11c   :  { %v293_v43 = vpop.f32.mrf.mxu0  ;;  %v654_v44 = vpop.f32.mrf.mxu1 }
 0x11d   :  { %v1639_v47 = vadd.f32 %v2448_v20, %v1586_v42  ;;  %2006 = vmatmul.msk.f32.gmra.mxu2 %vm73_vm1, %v1956_v40  ;;  %v767_v48 = vmax.f32 %v293_v43, %v654_v44  ;;  %2105 = vmatmul.msk.f32.gmra.mxu3 %vm73_vm1, %v2055_v41  ;;  %v1961_v42 = vld [vmem:[%s3164_s0 + $0x440] sm:$0xff]  ;;  %v2060_v43 = vld [vmem:[%s3164_s0 + $0x5c8] sm:$0xff] }
 0x11f   :  { %v1688_v49 = vmax.f32 %v1639_v47, 0.0  ;;  %1808 = vmatmul.msk.f32.gmra.mxu0 %vm73_vm1, %v57_v45  ;;  %1907 = vmatmul.msk.f32.gmra.mxu1 %vm73_vm1, %v1857_v46  ;;  %v62_v47 = vld [vmem:[%s3164_s0 + $0x130] sm:$0xff] }
 0x120   :  { %v1064_v50 = vpop.f32.mrf.mxu2  ;;  %v1474_v51 = vpop.f32.mrf.mxu3 }
 0x121   :  { %1737 = vst [vmem:[%s3166_s3 + $0x80] sm:$0xff] %v1688_v49  ;;  %v1177_v52 = vmax.f32 %v767_v48, %v1064_v50  ;;  %v1862_v48 = vld [vmem:[%s3164_s0 + $0x2b8] sm:$0xff] }
 0x123   :  { %v1587_v55 = vmax.f32 %v1177_v52, %v1474_v51 }
 0x124   :  { %v296_v56 = vpop.f32.mrf.mxu0  ;;  %v657_v57 = vpop.f32.mrf.mxu1 }
 0x125   :  { %v1640_v60 = vadd.f32 %v2448_v20, %v1587_v55  ;;  %2007 = vmatmul.msk.f32.gmra.mxu2 %vm73_vm1, %v1957_v53  ;;  %v768_v61 = vmax.f32 %v296_v56, %v657_v57  ;;  %2106 = vmatmul.msk.f32.gmra.mxu3 %vm73_vm1, %v2056_v54  ;;  %v1962_v55 = vld [vmem:[%s3164_s0 + $0x448] sm:$0xff]  ;;  %v2061_v56 = vld [vmem:[%s3164_s0 + $0x5d0] sm:$0xff] }
 0x127   :  { %v1689_v62 = vmax.f32 %v1640_v60, 0.0  ;;  %1809 = vmatmul.msk.f32.gmra.mxu0 %vm73_vm1, %v58_v58  ;;  %1908 = vmatmul.msk.f32.gmra.mxu1 %vm73_vm1, %v1858_v59  ;;  %v63_v60 = vld [vmem:[%s3164_s0 + $0x138] sm:$0xff] }
 0x128   :  { %v1067_v63 = vpop.f32.mrf.mxu2  ;;  %v1477_v0 = vpop.f32.mrf.mxu3 }
 0x129   :  { %1738 = vst [vmem:[%s3166_s3 + $0x88] sm:$0xff] %v1689_v62  ;;  %v1178_v1 = vmax.f32 %v768_v61, %v1067_v63  ;;  %v1863_v61 = vld [vmem:[%s3164_s0 + $0x2c0] sm:$0xff] }
 0x12b   :  { %v1588_v4 = vmax.f32 %v1178_v1, %v1477_v0 }
 0x12c   :  { %v299_v5 = vpop.f32.mrf.mxu0  ;;  %v660_v6 = vpop.f32.mrf.mxu1 }
 0x12d   :  { %v1641_v9 = vadd.f32 %v2448_v20, %v1588_v4  ;;  %2008 = vmatmul.msk.f32.gmra.mxu2 %vm73_vm1, %v1958_v2  ;;  %v769_v10 = vmax.f32 %v299_v5, %v660_v6  ;;  %2107 = vmatmul.msk.f32.gmra.mxu3 %vm73_vm1, %v2057_v3  ;;  %v1963_v4 = vld [vmem:[%s3164_s0 + $0x450] sm:$0xff]  ;;  %v2062_v5 = vld [vmem:[%s3164_s0 + $0x5d8] sm:$0xff] }
 0x12f   :  { %v1690_v11 = vmax.f32 %v1641_v9, 0.0  ;;  %1810 = vmatmul.msk.f32.gmra.mxu0 %vm73_vm1, %v59_v7  ;;  %1909 = vmatmul.msk.f32.gmra.mxu1 %vm73_vm1, %v1859_v8  ;;  %v64_v9 = vld [vmem:[%s3164_s0 + $0x140] sm:$0xff] }
 0x130   :  { %v1070_v12 = vpop.f32.mrf.mxu2  ;;  %v1480_v13 = vpop.f32.mrf.mxu3 }
 0x131   :  { %1739 = vst [vmem:[%s3166_s3 + $0x90] sm:$0xff] %v1690_v11  ;;  %v1179_v14 = vmax.f32 %v769_v10, %v1070_v12  ;;  %v1864_v10 = vld [vmem:[%s3164_s0 + $0x2c8] sm:$0xff] }
 0x133   :  { %v1589_v17 = vmax.f32 %v1179_v14, %v1480_v13 }
 0x134   :  { %v302_v18 = vpop.f32.mrf.mxu0  ;;  %v663_v19 = vpop.f32.mrf.mxu1 }
 0x135   :  { %v1642_v23 = vadd.f32 %v2448_v20, %v1589_v17  ;;  %2009 = vmatmul.msk.f32.gmra.mxu2 %vm73_vm1, %v1959_v15  ;;  %v770_v24 = vmax.f32 %v302_v18, %v663_v19  ;;  %2108 = vmatmul.msk.f32.gmra.mxu3 %vm73_vm1, %v2058_v16  ;;  %v1964_v17 = vld [vmem:[%s3164_s0 + $0x458] sm:$0xff]  ;;  %v2063_v18 = vld [vmem:[%s3164_s0 + $0x5e0] sm:$0xff] }
 0x137   :  { %v1691_v25 = vmax.f32 %v1642_v23, 0.0  ;;  %1811 = vmatmul.msk.f32.gmra.mxu0 %vm73_vm1, %v60_v21  ;;  %1910 = vmatmul.msk.f32.gmra.mxu1 %vm73_vm1, %v1860_v22  ;;  %v65_v23 = vld [vmem:[%s3164_s0 + $0x148] sm:$0xff] }
 0x138   :  { %v1073_v26 = vpop.f32.mrf.mxu2  ;;  %v1483_v27 = vpop.f32.mrf.mxu3 }
 0x139   :  { %1740 = vst [vmem:[%s3166_s3 + $0x98] sm:$0xff] %v1691_v25  ;;  %v1180_v28 = vmax.f32 %v770_v24, %v1073_v26  ;;  %v1865_v24 = vld [vmem:[%s3164_s0 + $0x2d0] sm:$0xff] }
 0x13b   :  { %v1590_v31 = vmax.f32 %v1180_v28, %v1483_v27 }
 0x13c   :  { %v305_v32 = vpop.f32.mrf.mxu0  ;;  %v666_v33 = vpop.f32.mrf.mxu1 }
 0x13d   :  { %v1643_v36 = vadd.f32 %v2448_v20, %v1590_v31  ;;  %2010 = vmatmul.msk.f32.gmra.mxu2 %vm73_vm1, %v1960_v29  ;;  %v771_v37 = vmax.f32 %v305_v32, %v666_v33  ;;  %2109 = vmatmul.msk.f32.gmra.mxu3 %vm73_vm1, %v2059_v30  ;;  %v1965_v31 = vld [vmem:[%s3164_s0 + $0x460] sm:$0xff]  ;;  %v2064_v32 = vld [vmem:[%s3164_s0 + $0x5e8] sm:$0xff] }
 0x13f   :  { %v1692_v38 = vmax.f32 %v1643_v36, 0.0  ;;  %1812 = vmatmul.msk.f32.gmra.mxu0 %vm73_vm1, %v61_v34  ;;  %1911 = vmatmul.msk.f32.gmra.mxu1 %vm73_vm1, %v1861_v35  ;;  %v66_v36 = vld [vmem:[%s3164_s0 + $0x150] sm:$0xff] }
 0x140   :  { %v1076_v39 = vpop.f32.mrf.mxu2  ;;  %v1486_v40 = vpop.f32.mrf.mxu3 }
 0x141   :  { %1741 = vst [vmem:[%s3166_s3 + $0xa0] sm:$0xff] %v1692_v38  ;;  %v1181_v41 = vmax.f32 %v771_v37, %v1076_v39  ;;  %v1866_v37 = vld [vmem:[%s3164_s0 + $0x2d8] sm:$0xff] }
 0x143   :  { %v1591_v44 = vmax.f32 %v1181_v41, %v1486_v40 }
 0x144   :  { %v308_v45 = vpop.f32.mrf.mxu0  ;;  %v669_v46 = vpop.f32.mrf.mxu1 }
 0x145   :  { %v1644_v49 = vadd.f32 %v2448_v20, %v1591_v44  ;;  %2011 = vmatmul.msk.f32.gmra.mxu2 %vm73_vm1, %v1961_v42  ;;  %v772_v50 = vmax.f32 %v308_v45, %v669_v46  ;;  %2110 = vmatmul.msk.f32.gmra.mxu3 %vm73_vm1, %v2060_v43  ;;  %v1966_v44 = vld [vmem:[%s3164_s0 + $0x468] sm:$0xff]  ;;  %v2065_v45 = vld [vmem:[%s3164_s0 + $0x5f0] sm:$0xff] }
 0x147   :  { %v1693_v51 = vmax.f32 %v1644_v49, 0.0  ;;  %1813 = vmatmul.msk.f32.gmra.mxu0 %vm73_vm1, %v62_v47  ;;  %1912 = vmatmul.msk.f32.gmra.mxu1 %vm73_vm1, %v1862_v48  ;;  %v67_v49 = vld [vmem:[%s3164_s0 + $0x158] sm:$0xff] }
 0x148   :  { %v1079_v52 = vpop.f32.mrf.mxu2  ;;  %v1489_v53 = vpop.f32.mrf.mxu3 }
 0x149   :  { %1742 = vst [vmem:[%s3166_s3 + $0xa8] sm:$0xff] %v1693_v51  ;;  %v1182_v54 = vmax.f32 %v772_v50, %v1079_v52  ;;  %v1867_v50 = vld [vmem:[%s3164_s0 + $0x2e0] sm:$0xff] }
 0x14b   :  { %v1592_v57 = vmax.f32 %v1182_v54, %v1489_v53 }
 0x14c   :  { %v311_v58 = vpop.f32.mrf.mxu0  ;;  %v672_v59 = vpop.f32.mrf.mxu1 }
 0x14d   :  { %v1645_v62 = vadd.f32 %v2448_v20, %v1592_v57  ;;  %2012 = vmatmul.msk.f32.gmra.mxu2 %vm73_vm1, %v1962_v55  ;;  %v773_v63 = vmax.f32 %v311_v58, %v672_v59  ;;  %2111 = vmatmul.msk.f32.gmra.mxu3 %vm73_vm1, %v2061_v56  ;;  %v1967_v57 = vld [vmem:[%s3164_s0 + $0x470] sm:$0xff]  ;;  %v2066_v58 = vld [vmem:[%s3164_s0 + $0x5f8] sm:$0xff] }
 0x14f   :  { %v1694_v0 = vmax.f32 %v1645_v62, 0.0  ;;  %1814 = vmatmul.msk.f32.gmra.mxu0 %vm73_vm1, %v63_v60  ;;  %1913 = vmatmul.msk.f32.gmra.mxu1 %vm73_vm1, %v1863_v61  ;;  %v68_v62 = vld [vmem:[%s3164_s0 + $0x160] sm:$0xff] }
 0x150   :  { %v1082_v1 = vpop.f32.mrf.mxu2  ;;  %v1492_v2 = vpop.f32.mrf.mxu3 }
 0x151   :  { %1743 = vst [vmem:[%s3166_s3 + $0xb0] sm:$0xff] %v1694_v0  ;;  %v1183_v3 = vmax.f32 %v773_v63, %v1082_v1  ;;  %v1868_v63 = vld [vmem:[%s3164_s0 + $0x2e8] sm:$0xff] }
 0x153   :  { %v1593_v6 = vmax.f32 %v1183_v3, %v1492_v2 }
 0x154   :  { %v314_v7 = vpop.f32.mrf.mxu0  ;;  %v675_v8 = vpop.f32.mrf.mxu1 }
 0x155   :  { %v1646_v11 = vadd.f32 %v2448_v20, %v1593_v6  ;;  %2013 = vmatmul.msk.f32.gmra.mxu2 %vm73_vm1, %v1963_v4  ;;  %v774_v12 = vmax.f32 %v314_v7, %v675_v8  ;;  %2112 = vmatmul.msk.f32.gmra.mxu3 %vm73_vm1, %v2062_v5  ;;  %v2067_v6 = vld [vmem:[%s3164_s0 + $0x600] sm:$0xff] }
 0x157   :  { %v1695_v13 = vmax.f32 %v1646_v11, 0.0  ;;  %1815 = vmatmul.msk.f32.gmra.mxu0 %vm73_vm1, %v64_v9  ;;  %1914 = vmatmul.msk.f32.gmra.mxu1 %vm73_vm1, %v1864_v10  ;;  %v69_v10 = vld [vmem:[%s3164_s0 + $0x168] sm:$0xff]  ;;  %v1869_v11 = vld [vmem:[%s3164_s0 + $0x2f0] sm:$0xff] }
 0x158   :  { %v1085_v14 = vpop.f32.mrf.mxu2  ;;  %v1495_v15 = vpop.f32.mrf.mxu3 }
 0x159   :  { %1744 = vst [vmem:[%s3166_s3 + $0xb8] sm:$0xff] %v1695_v13  ;;  %v1184_v16 = vmax.f32 %v774_v12, %v1085_v14  ;;  %v3025_v12 = vld [vmem:[%s3165_s2] ss:$0 sm:$0xff] }
 0x15b   :  { %v1594_v19 = vmax.f32 %v1184_v16, %v1495_v15 }
 0x15c   :  { %v317_v21 = vpop.f32.mrf.mxu0  ;;  %v678_v22 = vpop.f32.mrf.mxu1 }
 0x15d   :  { %v1647_v25 = vadd.f32 %v2448_v20, %v1594_v19  ;;  %2014 = vmatmul.msk.f32.gmra.mxu2 %vm73_vm1, %v1964_v17  ;;  %v775_v26 = vmax.f32 %v317_v21, %v678_v22  ;;  %2113 = vmatmul.msk.f32.gmra.mxu3 %vm73_vm1, %v2063_v18  ;;  %v1969_v19 = vld [vmem:[%s3164_s0 + $0x480] sm:$0xff]  ;;  %v2068_v21 = vld [vmem:[%s3164_s0 + $0x608] sm:$0xff] }
 0x15f   :  { %v1696_v27 = vmax.f32 %v1647_v25, 0.0  ;;  %1816 = vmatmul.msk.f32.gmra.mxu0 %vm73_vm1, %v65_v23  ;;  %1915 = vmatmul.msk.f32.gmra.mxu1 %vm73_vm1, %v1865_v24  ;;  %v70_v25 = vld [vmem:[%s3164_s0 + $0x170] sm:$0xff] }
 0x160   :  { %v1088_v28 = vpop.f32.mrf.mxu2  ;;  %v1498_v29 = vpop.f32.mrf.mxu3 }
 0x161   :  { %1745 = vst [vmem:[%s3166_s3 + $0xc0] sm:$0xff] %v1696_v27  ;;  %v1185_v30 = vmax.f32 %v775_v26, %v1088_v28  ;;  %v1870_v26 = vld [vmem:[%s3164_s0 + $0x2f8] sm:$0xff] }
 0x163   :  { %v1595_v33 = vmax.f32 %v1185_v30, %v1498_v29 }
 0x164   :  { %v320_v34 = vpop.f32.mrf.mxu0  ;;  %v681_v35 = vpop.f32.mrf.mxu1 }
 0x165   :  { %v1648_v38 = vadd.f32 %v2448_v20, %v1595_v33  ;;  %2015 = vmatmul.msk.f32.gmra.mxu2 %vm73_vm1, %v1965_v31  ;;  %v776_v39 = vmax.f32 %v320_v34, %v681_v35  ;;  %2114 = vmatmul.msk.f32.gmra.mxu3 %vm73_vm1, %v2064_v32  ;;  %v1970_v33 = vld [vmem:[%s3164_s0 + $0x488] sm:$0xff]  ;;  %v2069_v34 = vld [vmem:[%s3164_s0 + $0x610] sm:$0xff] }
 0x167   :  { %v1697_v40 = vmax.f32 %v1648_v38, 0.0  ;;  %1817 = vmatmul.msk.f32.gmra.mxu0 %vm73_vm1, %v66_v36  ;;  %1916 = vmatmul.msk.f32.gmra.mxu1 %vm73_vm1, %v1866_v37  ;;  %v71_v38 = vld [vmem:[%s3164_s0 + $0x178] sm:$0xff] }
 0x168   :  { %v1091_v41 = vpop.f32.mrf.mxu2  ;;  %v1501_v42 = vpop.f32.mrf.mxu3 }
 0x169   :  { %1746 = vst [vmem:[%s3166_s3 + $0xc8] sm:$0xff] %v1697_v40  ;;  %v1186_v43 = vmax.f32 %v776_v39, %v1091_v41  ;;  %v1871_v39 = vld [vmem:[%s3164_s0 + $0x300] sm:$0xff] }
 0x16b   :  { %v1596_v46 = vmax.f32 %v1186_v43, %v1501_v42 }
 0x16c   :  { %v323_v47 = vpop.f32.mrf.mxu0  ;;  %v684_v48 = vpop.f32.mrf.mxu1 }
 0x16d   :  { %v1649_v51 = vadd.f32 %v2448_v20, %v1596_v46  ;;  %2016 = vmatmul.msk.f32.gmra.mxu2 %vm73_vm1, %v1966_v44  ;;  %v777_v52 = vmax.f32 %v323_v47, %v684_v48  ;;  %2115 = vmatmul.msk.f32.gmra.mxu3 %vm73_vm1, %v2065_v45  ;;  %v1971_v46 = vld [vmem:[%s3164_s0 + $0x490] sm:$0xff]  ;;  %v2070_v47 = vld [vmem:[%s3164_s0 + $0x618] sm:$0xff] }
 0x16f   :  { %v1698_v53 = vmax.f32 %v1649_v51, 0.0  ;;  %1818 = vmatmul.msk.f32.gmra.mxu0 %vm73_vm1, %v67_v49  ;;  %1917 = vmatmul.msk.f32.gmra.mxu1 %vm73_vm1, %v1867_v50  ;;  %v72_v51 = vld [vmem:[%s3164_s0 + $0x180] sm:$0xff] }
 0x170   :  { %v1094_v54 = vpop.f32.mrf.mxu2  ;;  %v1504_v55 = vpop.f32.mrf.mxu3 }
 0x171   :  { %1747 = vst [vmem:[%s3166_s3 + $0xd0] sm:$0xff] %v1698_v53  ;;  %v1187_v56 = vmax.f32 %v777_v52, %v1094_v54  ;;  %v1872_v52 = vld [vmem:[%s3164_s0 + $0x308] sm:$0xff] }
 0x173   :  { %v1597_v59 = vmax.f32 %v1187_v56, %v1504_v55 }
 0x174   :  { %v326_v60 = vpop.f32.mrf.mxu0  ;;  %v687_v61 = vpop.f32.mrf.mxu1 }
 0x175   :  { %v1650_v0 = vadd.f32 %v2448_v20, %v1597_v59  ;;  %2017 = vmatmul.msk.f32.gmra.mxu2 %vm73_vm1, %v1967_v57  ;;  %v778_v1 = vmax.f32 %v326_v60, %v687_v61  ;;  %2116 = vmatmul.msk.f32.gmra.mxu3 %vm73_vm1, %v2066_v58  ;;  %v1968_v20 = vld [vmem:[%s3164_s0 + $0x478] sm:$0xff] }
 0x177   :  { %v1699_v2 = vmax.f32 %v1650_v0, 0.0  ;;  %1819 = vmatmul.msk.f32.gmra.mxu0 %vm73_vm1, %v68_v62  ;;  %1918 = vmatmul.msk.f32.gmra.mxu1 %vm73_vm1, %v1868_v63 }
 0x178   :  { %v1097_v3 = vpop.f32.mrf.mxu2  ;;  %v1507_v4 = vpop.f32.mrf.mxu3 }
 0x179   :  { %1748 = vst [vmem:[%s3166_s3 + $0xd8] sm:$0xff] %v1699_v2  ;;  %v1188_v5 = vmax.f32 %v778_v1, %v1097_v3 }
 0x17b   :  { %v1598_v7 = vmax.f32 %v1188_v5, %v1507_v4 }
 0x17c   :  { %v329_v8 = vpop.f32.mrf.mxu0  ;;  %v690_v9 = vpop.f32.mrf.mxu1 }
 0x17d   :  { %v1651_v13 = vadd.f32 %v3025_v12, %v1598_v7  ;;  %2018 = vmatmul.msk.f32.gmra.mxu2 %vm73_vm1, %v1968_v20  ;;  %v779_v14 = vmax.f32 %v329_v8, %v690_v9  ;;  %2117 = vmatmul.msk.f32.gmra.mxu3 %vm73_vm1, %v2067_v6 }
 0x17f   :  { %v1700_v15 = vmax.f32 %v1651_v13, 0.0  ;;  %1820 = vmatmul.msk.f32.gmra.mxu0 %vm73_vm1, %v69_v10  ;;  %1919 = vmatmul.msk.f32.gmra.mxu1 %vm73_vm1, %v1869_v11 }
 0x180   :  { %v1100_v16 = vpop.f32.mrf.mxu2  ;;  %v1510_v17 = vpop.f32.mrf.mxu3 }
 0x181   :  { %1749 = vst [vmem:[%s3166_s3 + $0xe0] sm:$0xff] %v1700_v15  ;;  %v1189_v18 = vmax.f32 %v779_v14, %v1100_v16 }
 0x183   :  { %v1599_v22 = vmax.f32 %v1189_v18, %v1510_v17 }
 0x184   :  { %v332_v23 = vpop.f32.mrf.mxu0  ;;  %v693_v24 = vpop.f32.mrf.mxu1 }
 0x185   :  { %v1652_v27 = vadd.f32 %v3025_v12, %v1599_v22  ;;  %2019 = vmatmul.msk.f32.gmra.mxu2 %vm73_vm1, %v1969_v19  ;;  %v780_v28 = vmax.f32 %v332_v23, %v693_v24  ;;  %2118 = vmatmul.msk.f32.gmra.mxu3 %vm73_vm1, %v2068_v21 }
 0x187   :  { %v1701_v29 = vmax.f32 %v1652_v27, 0.0  ;;  %1821 = vmatmul.msk.f32.gmra.mxu0 %vm73_vm1, %v70_v25  ;;  %1920 = vmatmul.msk.f32.gmra.mxu1 %vm73_vm1, %v1870_v26 }
 0x188   :  { %v1103_v30 = vpop.f32.mrf.mxu2  ;;  %v1513_v31 = vpop.f32.mrf.mxu3 }
 0x189   :  { %1750 = vst [vmem:[%s3166_s3 + $0xe8] sm:$0xff] %v1701_v29  ;;  %v1190_v32 = vmax.f32 %v780_v28, %v1103_v30 }
 0x18b   :  { %v1600_v35 = vmax.f32 %v1190_v32, %v1513_v31 }
 0x18c   :  { %v335_v36 = vpop.f32.mrf.mxu0  ;;  %v696_v37 = vpop.f32.mrf.mxu1 }
 0x18d   :  { %v1653_v40 = vadd.f32 %v3025_v12, %v1600_v35  ;;  %2020 = vmatmul.msk.f32.gmra.mxu2 %vm73_vm1, %v1970_v33  ;;  %v781_v41 = vmax.f32 %v335_v36, %v696_v37  ;;  %2119 = vmatmul.msk.f32.gmra.mxu3 %vm73_vm1, %v2069_v34 }
 0x18f   :  { %v1702_v42 = vmax.f32 %v1653_v40, 0.0  ;;  %1822 = vmatmul.msk.f32.gmra.mxu0 %vm73_vm1, %v71_v38  ;;  %1921 = vmatmul.msk.f32.gmra.mxu1 %vm73_vm1, %v1871_v39 }
 0x190   :  { %v1106_v43 = vpop.f32.mrf.mxu2  ;;  %v1516_v44 = vpop.f32.mrf.mxu3 }
 0x191   :  { %1751 = vst [vmem:[%s3166_s3 + $0xf0] sm:$0xff] %v1702_v42  ;;  %v1191_v45 = vmax.f32 %v781_v41, %v1106_v43 }
 0x193   :  { %v1601_v48 = vmax.f32 %v1191_v45, %v1516_v44 }
 0x194   :  { %v338_v49 = vpop.f32.mrf.mxu0  ;;  %v699_v50 = vpop.f32.mrf.mxu1 }
 0x195   :  { %v1654_v53 = vadd.f32 %v3025_v12, %v1601_v48  ;;  %2021 = vmatmul.msk.f32.gmra.mxu2 %vm73_vm1, %v1971_v46  ;;  %v782_v54 = vmax.f32 %v338_v49, %v699_v50  ;;  %2120 = vmatmul.msk.f32.gmra.mxu3 %vm73_vm1, %v2070_v47 }
 0x197   :  { %v1703_v55 = vmax.f32 %v1654_v53, 0.0  ;;  %1823 = vmatmul.msk.f32.gmra.mxu0 %vm73_vm1, %v72_v51  ;;  %1922 = vmatmul.msk.f32.gmra.mxu1 %vm73_vm1, %v1872_v52 }
 0x198   :  { %v1109_v56 = vpop.f32.mrf.mxu2  ;;  %v1519_v57 = vpop.f32.mrf.mxu3 }
 0x199   :  { %1752 = vst [vmem:[%s3166_s3 + $0xf8] sm:$0xff] %v1703_v55  ;;  %v1192_v58 = vmax.f32 %v782_v54, %v1109_v56 }
 0x19b   :  { %v1602_v59 = vmax.f32 %v1192_v58, %v1519_v57 }
 0x19c   :  { %v341_v60 = vpop.f32.mrf.mxu0  ;;  %v702_v61 = vpop.f32.mrf.mxu1 }
 0x19d   :  { %v1655_v62 = vadd.f32 %v3025_v12, %v1602_v59  ;;  %v783_v63 = vmax.f32 %v341_v60, %v702_v61 }
 0x19f   :  { %v1704_v0 = vmax.f32 %v1655_v62, 0.0 }
 0x1a0   :  { %v1112_v1 = vpop.f32.mrf.mxu2  ;;  %v1522_v2 = vpop.f32.mrf.mxu3 }
 0x1a1   :  { %1753 = vst [vmem:[%s3166_s3 + $0x100] sm:$0xff] %v1704_v0  ;;  %v1193_v3 = vmax.f32 %v783_v63, %v1112_v1 }
 0x1a3   :  { %v1603_v4 = vmax.f32 %v1193_v3, %v1522_v2 }
 0x1a4   :  { %v344_v5 = vpop.f32.mrf.mxu0  ;;  %v705_v20 = vpop.f32.mrf.mxu1 }
 0x1a5   :  { %v1656_v6 = vadd.f32 %v3025_v12, %v1603_v4  ;;  %v784_v7 = vmax.f32 %v344_v5, %v705_v20 }
 0x1a7   :  { %v1705_v8 = vmax.f32 %v1656_v6, 0.0 }
 0x1a8   :  { %v1115_v9 = vpop.f32.mrf.mxu2  ;;  %v1525_v10 = vpop.f32.mrf.mxu3 }
 0x1a9   :  { %1754 = vst [vmem:[%s3166_s3 + $0x108] sm:$0xff] %v1705_v8  ;;  %v1194_v11 = vmax.f32 %v784_v7, %v1115_v9 }
 0x1ab   :  { %v1604_v13 = vmax.f32 %v1194_v11, %v1525_v10 }
 0x1ac   :  { %v347_v14 = vpop.f32.mrf.mxu0  ;;  %v708_v15 = vpop.f32.mrf.mxu1 }
 0x1ad   :  { %v1657_v16 = vadd.f32 %v3025_v12, %v1604_v13  ;;  %v785_v17 = vmax.f32 %v347_v14, %v708_v15 }
 0x1af   :  { %v1706_v18 = vmax.f32 %v1657_v16, 0.0 }
 0x1b0   :  { %v1118_v19 = vpop.f32.mrf.mxu2  ;;  %v1528_v21 = vpop.f32.mrf.mxu3 }
 0x1b1   :  { %1755 = vst [vmem:[%s3166_s3 + $0x110] sm:$0xff] %v1706_v18  ;;  %v1195_v22 = vmax.f32 %v785_v17, %v1118_v19 }
 0x1b3   :  { %v1605_v23 = vmax.f32 %v1195_v22, %v1528_v21 }
 0x1b4   :  { %v350_v24 = vpop.f32.mrf.mxu0  ;;  %v711_v25 = vpop.f32.mrf.mxu1 }
 0x1b5   :  { %v1658_v26 = vadd.f32 %v3025_v12, %v1605_v23  ;;  %v786_v27 = vmax.f32 %v350_v24, %v711_v25 }
 0x1b7   :  { %v1707_v28 = vmax.f32 %v1658_v26, 0.0 }
 0x1b8   :  { %v1121_v29 = vpop.f32.mrf.mxu2  ;;  %v1531_v30 = vpop.f32.mrf.mxu3 }
 0x1b9   :  { %1756 = vst [vmem:[%s3166_s3 + $0x118] sm:$0xff] %v1707_v28  ;;  %v1196_v31 = vmax.f32 %v786_v27, %v1121_v29 }
 0x1bb   :  { %v1606_v32 = vmax.f32 %v1196_v31, %v1531_v30 }
 0x1bc   :  { %v353_v33 = vpop.f32.mrf.mxu0  ;;  %v714_v34 = vpop.f32.mrf.mxu1 }
 0x1bd   :  { %v1659_v35 = vadd.f32 %v3025_v12, %v1606_v32  ;;  %v787_v36 = vmax.f32 %v353_v33, %v714_v34 }
 0x1bf   :  { %v1708_v37 = vmax.f32 %v1659_v35, 0.0 }
 0x1c0   :  { %v1124_v38 = vpop.f32.mrf.mxu2  ;;  %v1534_v39 = vpop.f32.mrf.mxu3 }
 0x1c1   :  { %1757 = vst [vmem:[%s3166_s3 + $0x120] sm:$0xff] %v1708_v37  ;;  %v1197_v40 = vmax.f32 %v787_v36, %v1124_v38 }
 0x1c3   :  { %v1607_v41 = vmax.f32 %v1197_v40, %v1534_v39 }
 0x1c4   :  { %v356_v42 = vpop.f32.mrf.mxu0  ;;  %v717_v43 = vpop.f32.mrf.mxu1 }
 0x1c5   :  { %v1660_v44 = vadd.f32 %v3025_v12, %v1607_v41  ;;  %v788_v45 = vmax.f32 %v356_v42, %v717_v43 }
 0x1c7   :  { %v1709_v46 = vmax.f32 %v1660_v44, 0.0 }
 0x1c8   :  { %v1127_v47 = vpop.f32.mrf.mxu2  ;;  %v1537_v48 = vpop.f32.mrf.mxu3 }
 0x1c9   :  { %1758 = vst [vmem:[%s3166_s3 + $0x128] sm:$0xff] %v1709_v46  ;;  %v1198_v49 = vmax.f32 %v788_v45, %v1127_v47 }
 0x1cb   :  { %v1608_v50 = vmax.f32 %v1198_v49, %v1537_v48 }
 0x1cc   :  { %v359_v51 = vpop.f32.mrf.mxu0  ;;  %v720_v52 = vpop.f32.mrf.mxu1 }
 0x1cd   :  { %v1661_v53 = vadd.f32 %v3025_v12, %v1608_v50  ;;  %v789_v54 = vmax.f32 %v359_v51, %v720_v52 }
 0x1cf   :  { %v1710_v55 = vmax.f32 %v1661_v53, 0.0 }
 0x1d0   :  { %v1130_v56 = vpop.f32.mrf.mxu2  ;;  %v1540_v57 = vpop.f32.mrf.mxu3 }
 0x1d1   :  { %1759 = vst [vmem:[%s3166_s3 + $0x130] sm:$0xff] %v1710_v55  ;;  %v1199_v58 = vmax.f32 %v789_v54, %v1130_v56 }
 0x1d3   :  { %v1609_v59 = vmax.f32 %v1199_v58, %v1540_v57 }
 0x1d4   :  { %v362_v60 = vpop.f32.mrf.mxu0  ;;  %v723_v61 = vpop.f32.mrf.mxu1 }
 0x1d5   :  { %v1662_v62 = vadd.f32 %v3025_v12, %v1609_v59  ;;  %v790_v63 = vmax.f32 %v362_v60, %v723_v61 }
 0x1d7   :  { %v1711_v0 = vmax.f32 %v1662_v62, 0.0 }
 0x1d8   :  { %v1133_v1 = vpop.f32.mrf.mxu2  ;;  %v1543_v2 = vpop.f32.mrf.mxu3 }
 0x1d9   :  { %1760 = vst [vmem:[%s3166_s3 + $0x138] sm:$0xff] %v1711_v0  ;;  %v1200_v3 = vmax.f32 %v790_v63, %v1133_v1 }
 0x1db   :  { %v1610_v4 = vmax.f32 %v1200_v3, %v1543_v2 }
 0x1dc   :  { %v365_v5 = vpop.f32.mrf.mxu0  ;;  %v726_v20 = vpop.f32.mrf.mxu1 }
 0x1dd   :  { %v1663_v6 = vadd.f32 %v3025_v12, %v1610_v4  ;;  %v791_v7 = vmax.f32 %v365_v5, %v726_v20 }
 0x1df   :  { %v1712_v8 = vmax.f32 %v1663_v6, 0.0 }
 0x1e0   :  { %v1136_v9 = vpop.f32.mrf.mxu2  ;;  %v1546_v10 = vpop.f32.mrf.mxu3 }
 0x1e1   :  { %1761 = vst [vmem:[%s3166_s3 + $0x140] sm:$0xff] %v1712_v8  ;;  %v1201_v11 = vmax.f32 %v791_v7, %v1136_v9 }
 0x1e3   :  { %v1611_v13 = vmax.f32 %v1201_v11, %v1546_v10 }
 0x1e4   :  { %v368_v14 = vpop.f32.mrf.mxu0  ;;  %v729_v15 = vpop.f32.mrf.mxu1 }
 0x1e5   :  { %v1664_v16 = vadd.f32 %v3025_v12, %v1611_v13  ;;  %v792_v17 = vmax.f32 %v368_v14, %v729_v15 }
 0x1e7   :  { %v1713_v18 = vmax.f32 %v1664_v16, 0.0 }
 0x1e8   :  { %v1139_v19 = vpop.f32.mrf.mxu2  ;;  %v1549_v21 = vpop.f32.mrf.mxu3 }
 0x1e9   :  { %1762 = vst [vmem:[%s3166_s3 + $0x148] sm:$0xff] %v1713_v18  ;;  %v1202_v22 = vmax.f32 %v792_v17, %v1139_v19 }
 0x1eb   :  { %v1612_v23 = vmax.f32 %v1202_v22, %v1549_v21 }
 0x1ec   :  { %v371_v24 = vpop.f32.mrf.mxu0  ;;  %v732_v25 = vpop.f32.mrf.mxu1 }
 0x1ed   :  { %v1665_v26 = vadd.f32 %v3025_v12, %v1612_v23  ;;  %v793_v27 = vmax.f32 %v371_v24, %v732_v25 }
 0x1ef   :  { %v1714_v28 = vmax.f32 %v1665_v26, 0.0 }
 0x1f0   :  { %v1142_v29 = vpop.f32.mrf.mxu2  ;;  %v1552_v30 = vpop.f32.mrf.mxu3 }
 0x1f1   :  { %1763 = vst [vmem:[%s3166_s3 + $0x150] sm:$0xff] %v1714_v28  ;;  %v1203_v31 = vmax.f32 %v793_v27, %v1142_v29 }
 0x1f3   :  { %v1613_v32 = vmax.f32 %v1203_v31, %v1552_v30 }
 0x1f4   :  { %v374_v33 = vpop.f32.mrf.mxu0  ;;  %v735_v34 = vpop.f32.mrf.mxu1 }
 0x1f5   :  { %v1666_v35 = vadd.f32 %v3025_v12, %v1613_v32  ;;  %v794_v36 = vmax.f32 %v374_v33, %v735_v34 }
 0x1f7   :  { %v1715_v37 = vmax.f32 %v1666_v35, 0.0 }
 0x1f8   :  { %v1145_v38 = vpop.f32.mrf.mxu2  ;;  %v1555_v39 = vpop.f32.mrf.mxu3 }
 0x1f9   :  { %1764 = vst [vmem:[%s3166_s3 + $0x158] sm:$0xff] %v1715_v37  ;;  %v1204_v40 = vmax.f32 %v794_v36, %v1145_v38 }
 0x1fb   :  { %v1614_v41 = vmax.f32 %v1204_v40, %v1555_v39 }
 0x1fc   :  { %v377_v42 = vpop.f32.mrf.mxu0  ;;  %v738_v43 = vpop.f32.mrf.mxu1 }
 0x1fd   :  { %v1667_v44 = vadd.f32 %v3025_v12, %v1614_v41  ;;  %v795_v45 = vmax.f32 %v377_v42, %v738_v43 }
 0x1ff   :  { %v1716_v46 = vmax.f32 %v1667_v44, 0.0 }
 0x200   :  { %v1148_v47 = vpop.f32.mrf.mxu2  ;;  %v1558_v48 = vpop.f32.mrf.mxu3 }
 0x201   :  { %1765 = vst [vmem:[%s3166_s3 + $0x160] sm:$0xff] %v1716_v46  ;;  %v1205_v49 = vmax.f32 %v795_v45, %v1148_v47 }
 0x203   :  { %v1615_v50 = vmax.f32 %v1205_v49, %v1558_v48 }
 0x204   :  { %v380_v51 = vpop.f32.mrf.mxu0  ;;  %v741_v52 = vpop.f32.mrf.mxu1 }
 0x205   :  { %v1668_v53 = vadd.f32 %v3025_v12, %v1615_v50  ;;  %v796_v54 = vmax.f32 %v380_v51, %v741_v52 }
 0x207   :  { %v1717_v55 = vmax.f32 %v1668_v53, 0.0 }
 0x208   :  { %v1151_v56 = vpop.f32.mrf.mxu2  ;;  %v1561_v57 = vpop.f32.mrf.mxu3 }
 0x209   :  { %1766 = vst [vmem:[%s3166_s3 + $0x168] sm:$0xff] %v1717_v55  ;;  %v1206_v58 = vmax.f32 %v796_v54, %v1151_v56 }
 0x20b   :  { %v1616_v59 = vmax.f32 %v1206_v58, %v1561_v57 }
 0x20c   :  { %v383_v60 = vpop.f32.mrf.mxu0  ;;  %v744_v61 = vpop.f32.mrf.mxu1 }
 0x20d   :  { %v1669_v62 = vadd.f32 %v3025_v12, %v1616_v59  ;;  %v797_v63 = vmax.f32 %v383_v60, %v744_v61 }
 0x20f   :  { %v1718_v0 = vmax.f32 %v1669_v62, 0.0 }
 0x210   :  { %v1154_v1 = vpop.f32.mrf.mxu2  ;;  %v1564_v2 = vpop.f32.mrf.mxu3 }
 0x211   :  { %1767 = vst [vmem:[%s3166_s3 + $0x170] sm:$0xff] %v1718_v0  ;;  %v1207_v3 = vmax.f32 %v797_v63, %v1154_v1 }
 0x213   :  { %v1617_v4 = vmax.f32 %v1207_v3, %v1564_v2 }
 0x214   :  { %v386_v5 = vpop.f32.mrf.mxu0  ;;  %v747_v20 = vpop.f32.mrf.mxu1 }
 0x215   :  { %v1670_v6 = vadd.f32 %v3025_v12, %v1617_v4  ;;  %v798_v7 = vmax.f32 %v386_v5, %v747_v20 }
 0x217   :  { %v1719_v8 = vmax.f32 %v1670_v6, 0.0 }
 0x218   :  { %v1157_v9 = vpop.f32.mrf.mxu2  ;;  %v1567_v10 = vpop.f32.mrf.mxu3 }
 0x219   :  { %1768 = vst [vmem:[%s3166_s3 + $0x178] sm:$0xff] %v1719_v8  ;;  %v1208_v11 = vmax.f32 %v798_v7, %v1157_v9 }
 0x21b   :  { %v1618_v13 = vmax.f32 %v1208_v11, %v1567_v10 }
 0x21d   :  { %v1671_v14 = vadd.f32 %v3025_v12, %v1618_v13 }
 0x21f   :  { %v1720_v15 = vmax.f32 %v1671_v14, 0.0 }
 0x221   :  { %1769 = vst [vmem:[%s3166_s3 + $0x180] sm:$0xff] %v1720_v15 }

// kernel: lenet_forward.3
= control target key start
LH: loop header
LB: loop body
LE: loop exit
PB: predicated region body
PF: predicated region fallthrough
CT: control target
= control target key end

     0   :  { %vm111_vm0 = vcmask 130048   ;;  %s3591_s0 = inlined_call_operand.vmem [shape: f32[4,50,400], index: 0, kind: input, shape index: {}]   ;;  %s3592_s1 = inlined_call_operand.vmem [shape: f32[400,128], index: 1, kind: input, shape index: {}]   ;;  %s3593_s2 = inlined_call_operand.vmem [shape: f32[1,128], index: 2, kind: input, shape index: {}]   ;;  %s3594_s3 = inlined_call_operand.vmem [shape: f32[25,32,128], index: 3, kind: input, shape index: {}]   ;;  %s3595_s4 = inlined_call_operand.vmem [shape: f32[1,128], index: 4, kind: input, shape index: {}]   ;;  %s3596_s5 = inlined_call_operand.vmem [shape: f32[128,128], index: 5, kind: input, shape index: {}]   ;;  %s3597_s6 = inlined_call_operand.vmem [shape: f32[1,128], index: 6, kind: input, shape index: {}]   ;;  %s3598_s7 = inlined_call_operand.vmem [shape: f32[128,128], index: 7, kind: input, shape index: {}]   ;;  %s3599_s8 = inlined_call_operand.vmem [shape: f32[1,128], index: 8, kind: input, shape index: {}]   ;;  %s3600_s9 = inlined_call_operand.hbm [shape: f32[2,128], index: 9, kind: output, shape index: {}]  }
   0x1   :  { %v2125_v0 = vld [vmem:[%s3592_s1 + $0x78] sm:$0xff]  ;;  %v2142_v3 = vld [vmem:[%s3592_s1 + $0x70] sm:$0xff]  ;;  %v2158_v6 = vld [vmem:[%s3592_s1 + $0x68] sm:$0xff] }
   0x2   :  { %v2130_v1 = vld [vmem:[%s3592_s1 + $0xf8] sm:$0xff]  ;;  %133 = vmatpush.msra.mxu0 %v2125_v0  ;;  %v2147_v4 = vld [vmem:[%s3592_s1 + $0xf0] sm:$0xff]  ;;  %v2163_v7 = vld [vmem:[%s3592_s1 + $0xe8] sm:$0xff] }
   0x3   :  { %v2135_v2 = vld [vmem:[%s3592_s1 + $0x178] sm:$0xff]  ;;  %171 = vmatpush.msra.mxu1 %v2130_v1  ;;  %v2152_v5 = vld [vmem:[%s3592_s1 + $0x170] sm:$0xff]  ;;  %v2170_v8 = vld [vmem:[%s3592_s1 + $0x168] sm:$0xff] }
   0x4   :  { %209 = vmatpush.msra.mxu2 %v2135_v2  ;;  %134 = vmatpush.msra.mxu0 %v2142_v3  ;;  %v2176_v9 = vld [vmem:[%s3592_s1 + $0x60] sm:$0xff]  ;;  %v2194_v12 = vld [vmem:[%s3592_s1 + $0x58] sm:$0xff]  ;;  %v2212_v15 = vld [vmem:[%s3592_s1 + $0x50] sm:$0xff] }
   0x5   :  { %172 = vmatpush.msra.mxu1 %v2147_v4  ;;  %v2181_v10 = vld [vmem:[%s3592_s1 + $0xe0] sm:$0xff]  ;;  %v2199_v13 = vld [vmem:[%s3592_s1 + $0xd8] sm:$0xff]  ;;  %v2217_v16 = vld [vmem:[%s3592_s1 + $0xd0] sm:$0xff] }
   0x6   :  { %210 = vmatpush.msra.mxu2 %v2152_v5  ;;  %135 = vmatpush.msra.mxu0 %v2158_v6  ;;  %v2188_v11 = vld [vmem:[%s3592_s1 + $0x160] sm:$0xff]  ;;  %v2206_v14 = vld [vmem:[%s3592_s1 + $0x158] sm:$0xff]  ;;  %v2224_v17 = vld [vmem:[%s3592_s1 + $0x150] sm:$0xff] }
   0x7   :  { %173 = vmatpush.msra.mxu1 %v2163_v7  ;;  %v2229_v18 = vld [vmem:[%s3592_s1 + $0x188] sm:$0xff]  ;;  %v2246_v21 = vld [vmem:[%s3592_s1 + $0x180] sm:$0xff]  ;;  %v86_v23 = vld [vmem:[%s3591_s0 + $0x18] sm:$0xff] }
   0x8   :  { %211 = vmatpush.msra.mxu2 %v2170_v8  ;;  %136 = vmatpush.msra.mxu0 %v2176_v9  ;;  %v2235_v19 = vld [vmem:[%s3592_s1 + $0x48] sm:$0xff]  ;;  %v2262_v24 = vld [vmem:[%s3592_s1 + $0x40] sm:$0xff]  ;;  %v2281_v27 = vld [vmem:[%s3592_s1 + $0x38] sm:$0xff] }
   0x9   :  { %174 = vmatpush.msra.mxu1 %v2181_v10  ;;  %v2240_v20 = vld [vmem:[%s3592_s1 + $0xc8] sm:$0xff]  ;;  %261 = vmatpush.msra.mxu3 %v2229_v18  ;;  %v2267_v25 = vld [vmem:[%s3592_s1 + $0xc0] sm:$0xff]  ;;  %v2286_v28 = vld [vmem:[%s3592_s1 + $0xb8] sm:$0xff] }
   0xa   :  { %212 = vmatpush.msra.mxu2 %v2188_v11  ;;  %137 = vmatpush.msra.mxu0 %v2194_v12  ;;  %v2253_v22 = vld [vmem:[%s3592_s1 + $0x148] sm:$0xff]  ;;  %v2275_v26 = vld [vmem:[%s3592_s1 + $0x140] sm:$0xff]  ;;  %v2294_v29 = vld [vmem:[%s3592_s1 + $0x138] sm:$0xff] }
   0xb   :  { %175 = vmatpush.msra.mxu1 %v2199_v13  ;;  %262 = vmatpush.msra.mxu3 %v2246_v21  ;;  %v2300_v30 = vld [vmem:[%s3592_s1 + $0x30] sm:$0xff]  ;;  %v2319_v33 = vld [vmem:[%s3592_s1 + $0x28] sm:$0xff]  ;;  %v90_v36 = vld [vmem:[%s3591_s0 + $0x38] sm:$0xff] }
   0xc   :  { %213 = vmatpush.msra.mxu2 %v2206_v14  ;;  %138 = vmatpush.msra.mxu0 %v2212_v15  ;;  %v2305_v31 = vld [vmem:[%s3592_s1 + $0xb0] sm:$0xff]  ;;  %v2324_v34 = vld [vmem:[%s3592_s1 + $0xa8] sm:$0xff]  ;;  %v2341_v37 = vld [vmem:[%s3592_s1 + $0x20] sm:$0xff] }
   0xd   :  { %176 = vmatpush.msra.mxu1 %v2217_v16  ;;  %1789 = vmatmul.msk.f32.vlgmr.msra.gmra.mxu3 %vm111_vm0, %v86_v23  ;;  %v2313_v32 = vld [vmem:[%s3592_s1 + $0x130] sm:$0xff]  ;;  %v2332_v35 = vld [vmem:[%s3592_s1 + $0x128] sm:$0xff]  ;;  %v2346_v38 = vld [vmem:[%s3592_s1 + $0xa0] sm:$0xff] }
   0xe   :  { %214 = vmatpush.msra.mxu2 %v2224_v17  ;;  %139 = vmatpush.msra.mxu0 %v2235_v19  ;;  %v2351_v39 = vld [vmem:[%s3592_s1 + $0x120] sm:$0xff]  ;;  %v2359_v40 = vld [vmem:[%s3592_s1 + $0x18] sm:$0xff] }
   0xf   :  { %177 = vmatpush.msra.mxu1 %v2240_v20  ;;  %335 = vmatpush.msrb.mxu3 %v2125_v0  ;;  %v2364_v41 = vld [vmem:[%s3592_s1 + $0x98] sm:$0xff] }
  0x10   :  { %215 = vmatpush.msra.mxu2 %v2253_v22  ;;  %140 = vmatpush.msra.mxu0 %v2262_v24  ;;  %v2373_v42 = vld [vmem:[%s3592_s1 + $0x118] sm:$0xff] }
  0x11   :  { %178 = vmatpush.msra.mxu1 %v2267_v25  ;;  %336 = vmatpush.msrb.mxu3 %v2142_v3 }
  0x12   :  { %216 = vmatpush.msra.mxu2 %v2275_v26  ;;  %141 = vmatpush.msra.mxu0 %v2281_v27 }
  0x13   :  { %179 = vmatpush.msra.mxu1 %v2286_v28  ;;  %337 = vmatpush.msrb.mxu3 %v2158_v6 }
  0x14   :  { %217 = vmatpush.msra.mxu2 %v2294_v29  ;;  %142 = vmatpush.msra.mxu0 %v2300_v30 }
  0x15   :  { %180 = vmatpush.msra.mxu1 %v2305_v31  ;;  %1790 = vmatmul.msk.f32.gmra.mxu3 %vm111_vm0, %v90_v36 }
  0x16   :  { %218 = vmatpush.msra.mxu2 %v2313_v32  ;;  %143 = vmatpush.msra.mxu0 %v2319_v33 }
  0x17   :  { %181 = vmatpush.msra.mxu1 %v2324_v34 }
  0x18   :  { %219 = vmatpush.msra.mxu2 %v2332_v35  ;;  %144 = vmatpush.msra.mxu0 %v2341_v37 }
  0x19   :  { %182 = vmatpush.msra.mxu1 %v2346_v38 }
  0x1a   :  { %14 = vsyncpa [#allocation4], 0  ;;  %220 = vmatpush.msra.mxu2 %v2351_v39  ;;  %v2379_v43 = vld [vmem:[%s3592_s1 + $0x10] sm:$0xff]  ;;  %338 = vmatpush.msrb.mxu3 %v2176_v9  ;;  %v2398_v46 = vld [vmem:[%s3592_s1 + $0x8] sm:$0xff]  ;;  %vm948_vm1 = vcmask 261120  }
  0x1b   :  { %v2384_v44 = vld [vmem:[%s3592_s1 + $0x90] sm:$0xff]  ;;  %145 = vmatpush.msra.mxu0 %v2359_v40  ;;  %183 = vmatpush.msra.mxu1 %v2364_v41  ;;  %v2403_v47 = vld [vmem:[%s3592_s1 + $0x88] sm:$0xff]  ;;  %v94_v49 = vld [vmem:[%s3591_s0 + $0x58] sm:$0xff] }
  0x1c   :  { %v2392_v45 = vld [vmem:[%s3592_s1 + $0x110] sm:$0xff]  ;;  %221 = vmatpush.msra.mxu2 %v2373_v42  ;;  %339 = vmatpush.msrb.mxu3 %v2194_v12  ;;  %v2411_v48 = vld [vmem:[%s3592_s1 + $0x108] sm:$0xff]  ;;  %v2420_v50 = vld [vmem:[%s3592_s1] sm:$0xff] }
  0x1d   :  { %146 = vmatpush.msra.mxu0 %v2379_v43  ;;  %184 = vmatpush.msra.mxu1 %v2384_v44  ;;  %v2425_v51 = vld [vmem:[%s3592_s1 + $0x80] sm:$0xff]  ;;  %v84_v54 = vld [vmem:[%s3591_s0 + $0x8] sm:$0xff]  ;;  %v85_v55 = vld [vmem:[%s3591_s0 + $0x10] sm:$0xff] }
  0x1e   :  { %222 = vmatpush.msra.mxu2 %v2392_v45  ;;  %340 = vmatpush.msrb.mxu3 %v2212_v15  ;;  %v2433_v52 = vld [vmem:[%s3592_s1 + $0x100] sm:$0xff]  ;;  %v98_v56 = vld [vmem:[%s3591_s0 + $0x78] sm:$0xff]  ;;  %v88_v58 = vld [vmem:[%s3591_s0 + $0x28] sm:$0xff] }
  0x1f   :  { %147 = vmatpush.msra.mxu0 %v2398_v46  ;;  %185 = vmatpush.msra.mxu1 %v2403_v47  ;;  %v83_v53 = vld [vmem:[%s3591_s0] sm:$0xff]  ;;  %v89_v59 = vld [vmem:[%s3591_s0 + $0x30] sm:$0xff]  ;;  %v102_v60 = vld [vmem:[%s3591_s0 + $0x98] sm:$0xff] }
  0x20   :  { %223 = vmatpush.msra.mxu2 %v2411_v48  ;;  %1791 = vmatmul.msk.f32.gmra.mxu3 %vm111_vm0, %v94_v49  ;;  %v87_v57 = vld [vmem:[%s3591_s0 + $0x20] sm:$0xff]  ;;  %v92_v62 = vld [vmem:[%s3591_s0 + $0x48] sm:$0xff]  ;;  %v93_v63 = vld [vmem:[%s3591_s0 + $0x50] sm:$0xff] }
  0x21   :  { %148 = vmatpush.msra.mxu0 %v2420_v50  ;;  %186 = vmatpush.msra.mxu1 %v2425_v51  ;;  %v91_v61 = vld [vmem:[%s3591_s0 + $0x40] sm:$0xff]  ;;  %v106_v23 = vld [vmem:[%s3591_s0 + $0xb8] sm:$0xff]  ;;  %v96_v49 = vld [vmem:[%s3591_s0 + $0x68] sm:$0xff] }
  0x22   :  { %224 = vmatpush.msra.mxu2 %v2433_v52  ;;  %149 = vmatmul.f32.vlgmr.msra.gmra.mxu0 %v83_v53  ;;  %v95_v36 = vld [vmem:[%s3591_s0 + $0x60] sm:$0xff]  ;;  %v97_v53 = vld [vmem:[%s3591_s0 + $0x70] sm:$0xff] }
  0x23   :  { %187 = vmatmul.f32.vlgmr.msra.gmra.mxu1 %v84_v54  ;;  %225 = vmatmul.f32.vlgmr.msra.gmra.mxu2 %v85_v55  ;;  %v110_v54 = vld [vmem:[%s3591_s0 + $0xd8] sm:$0x3]  ;;  %v99_v55 = vld [vmem:[%s3591_s0 + $0x80] sm:$0xff] }
  0x24   :  { %373 = vmatpush.msrb.mxu0 %v2130_v1  ;;  %341 = vmatpush.msrb.mxu3 %v2235_v19 }
  0x25   :  { %411 = vmatpush.msrb.mxu1 %v2135_v2  ;;  %463 = vmatpush.msrb.mxu2 %v2229_v18 }
  0x26   :  { %374 = vmatpush.msrb.mxu0 %v2147_v4  ;;  %342 = vmatpush.msrb.mxu3 %v2262_v24 }
  0x27   :  { %412 = vmatpush.msrb.mxu1 %v2152_v5  ;;  %464 = vmatpush.msrb.mxu2 %v2246_v21 }
  0x28   :  { %375 = vmatpush.msrb.mxu0 %v2163_v7  ;;  %1792 = vmatmul.msk.f32.gmra.mxu3 %vm111_vm0, %v98_v56  ;;  %v100_v56 = vld [vmem:[%s3591_s0 + $0x88] sm:$0xff] }
  0x29   :  { %343 = vmatpush.msrb.mxu3 %v2281_v27  ;;  %413 = vmatpush.msrb.mxu1 %v2170_v8 }
  0x2a   :  { %152 = vmatmul.f32.gmra.mxu0 %v87_v57  ;;  %672 = vmatpush.msra.mxu2 %v2229_v18  ;;  %v101_v57 = vld [vmem:[%s3591_s0 + $0x90] sm:$0xff] }
  0x2b   :  { %190 = vmatmul.f32.gmra.mxu1 %v88_v58  ;;  %228 = vmatmul.f32.gmra.mxu2 %v89_v59  ;;  %v1796_v58 = vld [vmem:[%s3591_s0 + $0xe0] sm:$0xff] }
  0x2c   :  { %376 = vmatpush.msrb.mxu0 %v2181_v10  ;;  %344 = vmatpush.msrb.mxu3 %v2300_v30  ;;  %v103_v59 = vld [vmem:[%s3591_s0 + $0xa0] sm:$0xff] }
  0x2d   :  { %414 = vmatpush.msrb.mxu1 %v2188_v11  ;;  %673 = vmatpush.msra.mxu2 %v2246_v21 }
  0x2e   :  { %377 = vmatpush.msrb.mxu0 %v2199_v13  ;;  %345 = vmatpush.msrb.mxu3 %v2319_v33 }
  0x2f   :  { %415 = vmatpush.msrb.mxu1 %v2206_v14 }
  0x30   :  { %378 = vmatpush.msrb.mxu0 %v2217_v16  ;;  %1793 = vmatmul.msk.f32.gmra.mxu3 %vm111_vm0, %v102_v60  ;;  %v104_v60 = vld [vmem:[%s3591_s0 + $0xa8] sm:$0xff] }
  0x31   :  { %346 = vmatpush.msrb.mxu3 %v2341_v37  ;;  %416 = vmatpush.msrb.mxu1 %v2224_v17 }
  0x32   :  { %155 = vmatmul.f32.gmra.mxu0 %v91_v61  ;;  %v105_v61 = vld [vmem:[%s3591_s0 + $0xb0] sm:$0xff] }
  0x33   :  { %193 = vmatmul.f32.gmra.mxu1 %v92_v62  ;;  %231 = vmatmul.f32.gmra.mxu2 %v93_v63  ;;  %v1800_v62 = vld [vmem:[%s3591_s0 + $0x100] sm:$0xff] }
  0x34   :  { %379 = vmatpush.msrb.mxu0 %v2240_v20  ;;  %347 = vmatpush.msrb.mxu3 %v2359_v40  ;;  %v107_v63 = vld [vmem:[%s3591_s0 + $0xc0] sm:$0x3] }
  0x35   :  { %417 = vmatpush.msrb.mxu1 %v2253_v22 }
  0x36   :  { %380 = vmatpush.msrb.mxu0 %v2267_v25  ;;  %348 = vmatpush.msrb.mxu3 %v2379_v43 }
  0x37   :  { %418 = vmatpush.msrb.mxu1 %v2275_v26 }
  0x38   :  { %1794 = vmatmul.msk.f32.gmra.mxu3 %vm111_vm0, %v106_v23  ;;  %381 = vmatpush.msrb.mxu0 %v2286_v28  ;;  %v108_v23 = vld [vmem:[%s3591_s0 + $0xc8] sm:$0x3] }
  0x39   :  { %349 = vmatpush.msrb.mxu3 %v2398_v46  ;;  %419 = vmatpush.msrb.mxu1 %v2294_v29 }
  0x3a   :  { %158 = vmatmul.f32.gmra.mxu0 %v95_v36  ;;  %v109_v36 = vld [vmem:[%s3591_s0 + $0xd0] sm:$0x3] }
  0x3b   :  { %196 = vmatmul.f32.gmra.mxu1 %v96_v49  ;;  %234 = vmatmul.f32.gmra.mxu2 %v97_v53  ;;  %v1804_v49 = vld [vmem:[%s3591_s0 + $0x120] sm:$0xff]  ;;  %v1797_v53 = vld [vmem:[%s3591_s0 + $0xe8] sm:$0xff] }
  0x3c   :  { %382 = vmatpush.msrb.mxu0 %v2305_v31  ;;  %350 = vmatpush.msrb.mxu3 %v2420_v50 }
  0x3d   :  { %420 = vmatpush.msrb.mxu1 %v2313_v32 }
  0x3e   :  { %544 = vmatpush.msra.mxu3 %v2125_v0  ;;  %383 = vmatpush.msrb.mxu0 %v2324_v34 }
  0x3f   :  { %421 = vmatpush.msrb.mxu1 %v2332_v35 }
  0x40   :  { %545 = vmatpush.msra.mxu3 %v2142_v3  ;;  %384 = vmatpush.msrb.mxu0 %v2346_v38 }
  0x41   :  { %1795 = vmatmul.msk.f32.gmra.mxu3 %vm111_vm0, %v110_v54  ;;  %422 = vmatpush.msrb.mxu1 %v2351_v39  ;;  %v1799_v54 = vld [vmem:[%s3591_s0 + $0xf8] sm:$0xff] }
  0x42   :  { %546 = vmatpush.msra.mxu3 %v2158_v6  ;;  %161 = vmatmul.f32.gmra.mxu0 %v99_v55  ;;  %v1798_v55 = vld [vmem:[%s3591_s0 + $0xf0] sm:$0xff] }
  0x43   :  { %199 = vmatmul.f32.gmra.mxu1 %v100_v56  ;;  %237 = vmatmul.f32.gmra.mxu2 %v101_v57  ;;  %v1808_v56 = vld [vmem:[%s3591_s0 + $0x140] sm:$0xff]  ;;  %v1801_v57 = vld [vmem:[%s3591_s0 + $0x108] sm:$0xff] }
  0x44   :  { %385 = vmatpush.msrb.mxu0 %v2364_v41  ;;  %423 = vmatpush.msrb.mxu1 %v2373_v42 }
  0x45   :  { %547 = vmatpush.msra.mxu3 %v2176_v9 }
  0x46   :  { %386 = vmatpush.msrb.mxu0 %v2384_v44  ;;  %424 = vmatpush.msrb.mxu1 %v2392_v45 }
  0x47   :  { %548 = vmatpush.msra.mxu3 %v2194_v12 }
  0x48   :  { %387 = vmatpush.msrb.mxu0 %v2403_v47  ;;  %425 = vmatpush.msrb.mxu1 %v2411_v48 }
  0x49   :  { %351 = vmatmul.f32.vlgmr.msrb.gmra.mxu3 %v1796_v58  ;;  %v1803_v58 = vld [vmem:[%s3591_s0 + $0x118] sm:$0xff] }
  0x4a   :  { %549 = vmatpush.msra.mxu3 %v2212_v15  ;;  %164 = vmatmul.f32.gmra.mxu0 %v103_v59  ;;  %v1802_v59 = vld [vmem:[%s3591_s0 + $0x110] sm:$0xff] }
  0x4b   :  { %202 = vmatmul.f32.gmra.mxu1 %v104_v60  ;;  %240 = vmatmul.f32.gmra.mxu2 %v105_v61  ;;  %v1812_v60 = vld [vmem:[%s3591_s0 + $0x160] sm:$0xff]  ;;  %v1805_v61 = vld [vmem:[%s3591_s0 + $0x128] sm:$0xff] }
  0x4c   :  { %388 = vmatpush.msrb.mxu0 %v2425_v51  ;;  %426 = vmatpush.msrb.mxu1 %v2433_v52 }
  0x4d   :  { %550 = vmatpush.msra.mxu3 %v2235_v19 }
  0x4e   :  { %582 = vmatpush.msra.mxu0 %v2130_v1  ;;  %620 = vmatpush.msra.mxu1 %v2135_v2 }
  0x4f   :  { %551 = vmatpush.msra.mxu3 %v2262_v24 }
  0x50   :  { %583 = vmatpush.msra.mxu0 %v2147_v4  ;;  %621 = vmatpush.msra.mxu1 %v2152_v5 }
  0x51   :  { %354 = vmatmul.f32.gmra.mxu3 %v1800_v62  ;;  %v1807_v62 = vld [vmem:[%s3591_s0 + $0x138] sm:$0xff] }
  0x52   :  { %584 = vmatpush.msra.mxu0 %v2163_v7  ;;  %552 = vmatpush.msra.mxu3 %v2281_v27 }
  0x53   :  { %167 = vmatmul.f32.gmra.mxu0 %v107_v63  ;;  %622 = vmatpush.msra.mxu1 %v2170_v8  ;;  %v1806_v63 = vld [vmem:[%s3591_s0 + $0x130] sm:$0xff] }
  0x54   :  { %205 = vmatmul.f32.gmra.mxu1 %v108_v23  ;;  %243 = vmatmul.f32.gmra.mxu2 %v109_v36  ;;  %v1810_v23 = vld [vmem:[%s3591_s0 + $0x150] sm:$0xff] }
  0x55   :  { %585 = vmatpush.msra.mxu0 %v2181_v10  ;;  %553 = vmatpush.msra.mxu3 %v2300_v30 }
  0x56   :  { %623 = vmatpush.msra.mxu1 %v2188_v11 }
  0x57   :  { %586 = vmatpush.msra.mxu0 %v2199_v13  ;;  %554 = vmatpush.msra.mxu3 %v2319_v33 }
  0x58   :  { %624 = vmatpush.msra.mxu1 %v2206_v14 }
  0x59   :  { %357 = vmatmul.f32.gmra.mxu3 %v1804_v49  ;;  %587 = vmatpush.msra.mxu0 %v2217_v16 }
  0x5a   :  { %555 = vmatpush.msra.mxu3 %v2341_v37  ;;  %625 = vmatpush.msra.mxu1 %v2224_v17 }
  0x5b   :  { %389 = vmatmul.f32.vlgmr.msrb.gmra.mxu0 %v1797_v53 }
  0x5c   :  { %1824 = vmatmul.msk.f32.vlgmr.msrb.gmra.mxu2 %vm111_vm0, %v1799_v54  ;;  %427 = vmatmul.f32.vlgmr.msrb.gmra.mxu1 %v1798_v55  ;;  %v1850_v55 = vld [vmem:[%s3591_s0 + $0x258] sm:$0xff] }
  0x5d   :  { %588 = vmatpush.msra.mxu0 %v2240_v20  ;;  %556 = vmatpush.msra.mxu3 %v2359_v40 }
  0x5e   :  { %626 = vmatpush.msra.mxu1 %v2253_v22  ;;  %2038 = vmatpush.msrb.mxu2 %v2229_v18 }
  0x5f   :  { %589 = vmatpush.msra.mxu0 %v2267_v25  ;;  %557 = vmatpush.msra.mxu3 %v2379_v43 }
  0x60   :  { %627 = vmatpush.msra.mxu1 %v2275_v26  ;;  %2039 = vmatpush.msrb.mxu2 %v2246_v21 }
  0x61   :  { %360 = vmatmul.f32.gmra.mxu3 %v1808_v56  ;;  %590 = vmatpush.msra.mxu0 %v2286_v28 }
  0x62   :  { %558 = vmatpush.msra.mxu3 %v2398_v46  ;;  %628 = vmatpush.msra.mxu1 %v2294_v29 }
  0x63   :  { %392 = vmatmul.f32.gmra.mxu0 %v1801_v57 }
  0x64   :  { %1825 = vmatmul.msk.f32.gmra.mxu2 %vm111_vm0, %v1803_v58  ;;  %430 = vmatmul.f32.gmra.mxu1 %v1802_v59  ;;  %v1866_v58 = vld [vmem:[%s3591_s0 + $0x2a0] sm:$0xff] }
  0x65   :  { %591 = vmatpush.msra.mxu0 %v2305_v31  ;;  %559 = vmatpush.msra.mxu3 %v2420_v50 }
  0x66   :  { %629 = vmatpush.msra.mxu1 %v2313_v32 }
  0x67   :  { %753 = vmatpush.msrb.mxu3 %v2125_v0  ;;  %592 = vmatpush.msra.mxu0 %v2324_v34  ;;  %v1816_v0 = vld [vmem:[%s3591_s0 + $0x180] sm:$0xff] }
  0x68   :  { %630 = vmatpush.msra.mxu1 %v2332_v35 }
  0x69   :  { %754 = vmatpush.msrb.mxu3 %v2142_v3  ;;  %593 = vmatpush.msra.mxu0 %v2346_v38  ;;  %v1809_v3 = vld [vmem:[%s3591_s0 + $0x148] sm:$0xff] }
  0x6a   :  { %363 = vmatmul.f32.gmra.mxu3 %v1812_v60  ;;  %631 = vmatpush.msra.mxu1 %v2351_v39 }
  0x6b   :  { %755 = vmatpush.msrb.mxu3 %v2158_v6  ;;  %395 = vmatmul.f32.gmra.mxu0 %v1805_v61  ;;  %v1811_v6 = vld [vmem:[%s3591_s0 + $0x158] sm:$0xff] }
  0x6c   :  { %1826 = vmatmul.msk.f32.gmra.mxu2 %vm111_vm0, %v1807_v62  ;;  %433 = vmatmul.f32.gmra.mxu1 %v1806_v63  ;;  %v1854_v63 = vld [vmem:[%s3591_s0 + $0x278] sm:$0xff] }
  0x6d   :  { %594 = vmatpush.msra.mxu0 %v2364_v41  ;;  %632 = vmatpush.msra.mxu1 %v2373_v42 }
  0x6e   :  { %756 = vmatpush.msrb.mxu3 %v2176_v9  ;;  %v1820_v9 = vld [vmem:[%s3591_s0 + $0x1a0] sm:$0x3] }
  0x6f   :  { %595 = vmatpush.msra.mxu0 %v2384_v44  ;;  %633 = vmatpush.msra.mxu1 %v2392_v45 }
  0x70   :  { %757 = vmatpush.msrb.mxu3 %v2194_v12  ;;  %v1813_v12 = vld [vmem:[%s3591_s0 + $0x168] sm:$0xff] }
  0x71   :  { %596 = vmatpush.msra.mxu0 %v2403_v47  ;;  %634 = vmatpush.msra.mxu1 %v2411_v48 }
  0x72   :  { %366 = vmatmul.f32.gmra.mxu3 %v1816_v0 }
  0x73   :  { %758 = vmatpush.msrb.mxu3 %v2212_v15  ;;  %398 = vmatmul.f32.gmra.mxu0 %v1809_v3  ;;  %v1815_v15 = vld [vmem:[%s3591_s0 + $0x178] sm:$0xff] }
  0x74   :  { %1827 = vmatmul.msk.f32.gmra.mxu2 %vm111_vm0, %v1811_v6  ;;  %436 = vmatmul.f32.gmra.mxu1 %v1810_v23  ;;  %v1870_v6 = vld [vmem:[%s3591_s0 + $0x2c0] sm:$0xff] }
  0x75   :  { %597 = vmatpush.msra.mxu0 %v2425_v51  ;;  %635 = vmatpush.msra.mxu1 %v2433_v52 }
  0x76   :  { %759 = vmatpush.msrb.mxu3 %v2235_v19  ;;  %v1818_v19 = vld [vmem:[%s3591_s0 + $0x190] sm:$0xff] }
  0x77   :  { %791 = vmatpush.msrb.mxu0 %v2130_v1  ;;  %829 = vmatpush.msrb.mxu1 %v2135_v2  ;;  %v1814_v1 = vld [vmem:[%s3591_s0 + $0x170] sm:$0xff] }
  0x78   :  { %760 = vmatpush.msrb.mxu3 %v2262_v24  ;;  %v1822_v24 = vld [vmem:[%s3591_s0 + $0x1b0] sm:$0x3] }
  0x79   :  { %792 = vmatpush.msrb.mxu0 %v2147_v4  ;;  %830 = vmatpush.msrb.mxu1 %v2152_v5  ;;  %v1831_v4 = vld [vmem:[%s3591_s0 + $0x1c0] sm:$0xff] }
  0x7a   :  { %369 = vmatmul.f32.gmra.mxu3 %v1820_v9 }
  0x7b   :  { %793 = vmatpush.msrb.mxu0 %v2163_v7  ;;  %761 = vmatpush.msrb.mxu3 %v2281_v27  ;;  %v1817_v7 = vld [vmem:[%s3591_s0 + $0x188] sm:$0xff] }
  0x7c   :  { %401 = vmatmul.f32.gmra.mxu0 %v1813_v12  ;;  %831 = vmatpush.msrb.mxu1 %v2170_v8  ;;  %v1832_v27 = vld [vmem:[%s3591_s0 + $0x1c8] sm:$0xff] }
  0x7d   :  { %1828 = vmatmul.msk.f32.gmra.mxu2 %vm111_vm0, %v1815_v15  ;;  %439 = vmatmul.f32.gmra.mxu1 %v1814_v1  ;;  %v1856_v12 = vld [vmem:[%s3591_s0 + $0x288] sm:$0x3]  ;;  %v1858_v1 = vld [vmem:[%s3591_s0 + $0x298] sm:$0x3] }
  0x7e   :  { %794 = vmatpush.msrb.mxu0 %v2181_v10  ;;  %762 = vmatpush.msrb.mxu3 %v2300_v30  ;;  %v1819_v10 = vld [vmem:[%s3591_s0 + $0x198] sm:$0xff]  ;;  %v1833_v30 = vld [vmem:[%s3591_s0 + $0x1d0] sm:$0xff] }
  0x7f   :  { %832 = vmatpush.msrb.mxu1 %v2188_v11 }
  0x80   :  { %795 = vmatpush.msrb.mxu0 %v2199_v13  ;;  %763 = vmatpush.msrb.mxu3 %v2319_v33  ;;  %v1835_v13 = vld [vmem:[%s3591_s0 + $0x1e0] sm:$0xff]  ;;  %v1837_v33 = vld [vmem:[%s3591_s0 + $0x1f0] sm:$0xff] }
  0x81   :  { %833 = vmatpush.msrb.mxu1 %v2206_v14 }
  0x82   :  { %560 = vmatmul.f32.vlgmr.msra.gmra.mxu3 %v1831_v4  ;;  %796 = vmatpush.msrb.mxu0 %v2217_v16  ;;  %v1821_v16 = vld [vmem:[%s3591_s0 + $0x1a8] sm:$0x3]  ;;  %v1857_v4 = vld [vmem:[%s3591_s0 + $0x290] sm:$0x3] }
  0x83   :  { %764 = vmatpush.msrb.mxu3 %v2341_v37  ;;  %834 = vmatpush.msrb.mxu1 %v2224_v17 }
  0x84   :  { %404 = vmatmul.f32.gmra.mxu0 %v1817_v7 }
  0x85   :  { %1829 = vmatmul.msk.f32.gmra.mxu2 %vm111_vm0, %v1819_v10  ;;  %442 = vmatmul.f32.gmra.mxu1 %v1818_v19  ;;  %v1874_v10 = vld [vmem:[%s3591_s0 + $0x2e0] sm:$0xff] }
  0x86   :  { %797 = vmatpush.msrb.mxu0 %v2240_v20  ;;  %765 = vmatpush.msrb.mxu3 %v2359_v40  ;;  %v1823_v20 = vld [vmem:[%s3591_s0 + $0x1b8] sm:$0x3] }
  0x87   :  { %835 = vmatpush.msrb.mxu1 %v2253_v22 }
  0x88   :  { %798 = vmatpush.msrb.mxu0 %v2267_v25  ;;  %766 = vmatpush.msrb.mxu3 %v2379_v43  ;;  %v1839_v25 = vld [vmem:[%s3591_s0 + $0x200] sm:$0xff] }
  0x89   :  { %836 = vmatpush.msrb.mxu1 %v2275_v26 }
  0x8a   :  { %563 = vmatmul.f32.gmra.mxu3 %v1835_v13  ;;  %799 = vmatpush.msrb.mxu0 %v2286_v28  ;;  %v1834_v28 = vld [vmem:[%s3591_s0 + $0x1d8] sm:$0xff] }
  0x8b   :  { %767 = vmatpush.msrb.mxu3 %v2398_v46  ;;  %837 = vmatpush.msrb.mxu1 %v2294_v29  ;;  %v1846_v46 = vld [vmem:[%s3591_s0 + $0x238] sm:$0xff] }
  0x8c   :  { %407 = vmatmul.f32.gmra.mxu0 %v1821_v16  ;;  %v1867_v16 = vld [vmem:[%s3591_s0 + $0x2a8] sm:$0xff] }
  0x8d   :  { %1830 = vmatmul.msk.f32.gmra.mxu2 %vm111_vm0, %v1823_v20  ;;  %445 = vmatmul.f32.gmra.mxu1 %v1822_v24  ;;  %v1868_v24 = vld [vmem:[%s3591_s0 + $0x2b0] sm:$0xff] }
  0x8e   :  { %800 = vmatpush.msrb.mxu0 %v2305_v31  ;;  %768 = vmatpush.msrb.mxu3 %v2420_v50  ;;  %v1838_v31 = vld [vmem:[%s3591_s0 + $0x1f8] sm:$0xff] }
  0x8f   :  { %838 = vmatpush.msrb.mxu1 %v2313_v32 }
  0x90   :  { %2022 = vmatpush.msra.mxu3 %v2135_v2  ;;  %801 = vmatpush.msrb.mxu0 %v2324_v34  ;;  %v264_v2 = vpop.f32.mrf.mxu3 }
  0x91   :  { %839 = vmatpush.msrb.mxu1 %v2332_v35 }
  0x92   :  { %2023 = vmatpush.msra.mxu3 %v2152_v5  ;;  %802 = vmatpush.msrb.mxu0 %v2346_v38  ;;  %v1843_v5 = vld [vmem:[%s3591_s0 + $0x220] sm:$0xff]  ;;  %v1842_v38 = vld [vmem:[%s3591_s0 + $0x218] sm:$0xff] }
  0x93   :  { %566 = vmatmul.f32.gmra.mxu3 %v1839_v25  ;;  %840 = vmatpush.msrb.mxu1 %v2351_v39  ;;  %v1873_v25 = vld [vmem:[%s3591_s0 + $0x2d8] sm:$0xff] }
  0x94   :  { %2024 = vmatpush.msra.mxu3 %v2170_v8  ;;  %598 = vmatmul.f32.vlgmr.msra.gmra.mxu0 %v1832_v27  ;;  %v1836_v8 = vld [vmem:[%s3591_s0 + $0x1e8] sm:$0xff] }
  0x95   :  { %1859 = vmatmul.msk.f32.vlgmr.msra.gmra.mxu2 %vm111_vm0, %v1834_v28  ;;  %636 = vmatmul.f32.vlgmr.msra.gmra.mxu1 %v1833_v30  ;;  %v1878_v28 = vld [vmem:[%s3591_s0 + $0x300] sm:$0xff] }
  0x96   :  { %803 = vmatpush.msrb.mxu0 %v2364_v41  ;;  %841 = vmatpush.msrb.mxu1 %v2373_v42 }
  0x97   :  { %2025 = vmatpush.msra.mxu3 %v2188_v11 }
  0x98   :  { %804 = vmatpush.msrb.mxu0 %v2384_v44  ;;  %842 = vmatpush.msrb.mxu1 %v2392_v45  ;;  %v267_v11 = vpop.f32.mrf.mxu3 }
  0x99   :  { %2026 = vmatpush.msra.mxu3 %v2206_v14  ;;  %v1847_v14 = vld [vmem:[%s3591_s0 + $0x240] sm:$0xff] }
  0x9a   :  { %805 = vmatpush.msrb.mxu0 %v2403_v47  ;;  %843 = vmatpush.msrb.mxu1 %v2411_v48 }
  0x9b   :  { %569 = vmatmul.f32.gmra.mxu3 %v1843_v5  ;;  %v1871_v5 = vld [vmem:[%s3591_s0 + $0x2c8] sm:$0xff] }
  0x9c   :  { %2027 = vmatpush.msra.mxu3 %v2224_v17  ;;  %601 = vmatmul.f32.gmra.mxu0 %v1836_v8  ;;  %v1840_v17 = vld [vmem:[%s3591_s0 + $0x208] sm:$0xff] }
  0x9d   :  { %1860 = vmatmul.msk.f32.gmra.mxu2 %vm111_vm0, %v1838_v31  ;;  %639 = vmatmul.f32.gmra.mxu1 %v1837_v33  ;;  %v1872_v31 = vld [vmem:[%s3591_s0 + $0x2d0] sm:$0xff]  ;;  %v1877_v33 = vld [vmem:[%s3591_s0 + $0x2f8] sm:$0xff] }
  0x9e   :  { %806 = vmatpush.msrb.mxu0 %v2425_v51  ;;  %844 = vmatpush.msrb.mxu1 %v2433_v52  ;;  %v1855_v51 = vld [vmem:[%s3591_s0 + $0x280] sm:$0x3] }
  0x9f   :  { %2028 = vmatpush.msra.mxu3 %v2253_v22  ;;  %v150_v34 = vpop.f32.mrf.mxu0 }
  0xa0   :  { %881 = vmatpush.msra.mxu0 %v2229_v18  ;;  %v188_v37 = vpop.f32.mrf.mxu1  ;;  %v1841_v18 = vld [vmem:[%s3591_s0 + $0x210] sm:$0xff] }
  0xa1   :  { %2029 = vmatpush.msra.mxu3 %v2275_v26  ;;  %v1851_v26 = vld [vmem:[%s3591_s0 + $0x260] sm:$0xff] }
  0xa2   :  { %882 = vmatpush.msra.mxu0 %v2246_v21  ;;  %v189_v21 = vadd.f32 %v188_v37, %v150_v34  ;;  %v1875_v37 = vld [vmem:[%s3591_s0 + $0x2e8] sm:$0xff] }
  0xa3   :  { %572 = vmatmul.f32.gmra.mxu3 %v1847_v14  ;;  %v270_v22 = vpop.f32.mrf.mxu3  ;;  %v1882_v14 = vld [vmem:[%s3591_s0 + $0x320] sm:$0xff] }
  0xa4   :  { %2030 = vmatpush.msra.mxu3 %v2294_v29  ;;  %604 = vmatmul.f32.gmra.mxu0 %v1840_v17  ;;  %v1844_v29 = vld [vmem:[%s3591_s0 + $0x228] sm:$0xff] }
  0xa5   :  { %1861 = vmatmul.msk.f32.gmra.mxu2 %vm111_vm0, %v1842_v38  ;;  %642 = vmatmul.f32.gmra.mxu1 %v1841_v18  ;;  %v1876_v18 = vld [vmem:[%s3591_s0 + $0x2f0] sm:$0xff] }
  0xa6   :  { %2031 = vmatpush.msra.mxu3 %v2313_v32  ;;  %v226_v40 = vpop.f32.mrf.mxu2  ;;  %v1845_v32 = vld [vmem:[%s3591_s0 + $0x230] sm:$0xff] }
  0xa7   :  { %v227_v41 = vadd.f32 %v226_v40, %v189_v21  ;;  %v153_v43 = vpop.f32.mrf.mxu0 }
  0xa8   :  { %2032 = vmatpush.msra.mxu3 %v2332_v35  ;;  %v191_v44 = vpop.f32.mrf.mxu1 }
  0xa9   :  { %v2824_v47 = vadd.f32 %v264_v2, %v227_v41  ;;  %v192_v50 = vadd.f32 %v191_v44, %v153_v43  ;;  %v1879_v43 = vld [vmem:[%s3591_s0 + $0x308] sm:$0xff]  ;;  %v1880_v44 = vld [vmem:[%s3591_s0 + $0x310] sm:$0xff] }
  0xaa   :  { %2033 = vmatpush.msra.mxu3 %v2351_v39  ;;  %v1848_v39 = vld [vmem:[%s3591_s0 + $0x248] sm:$0xff] }
  0xab   :  { %575 = vmatmul.f32.gmra.mxu3 %v1851_v26  ;;  %v2828_v35 = vpop.f32.mrf.mxu3  ;;  %v1886_v26 = vld [vmem:[%s3591_s0 + $0x340] sm:$0xff] }
  0xac   :  { %607 = vmatmul.f32.gmra.mxu0 %v1844_v29  ;;  %2034 = vmatpush.msra.mxu3 %v2373_v42  ;;  %v1849_v42 = vld [vmem:[%s3591_s0 + $0x250] sm:$0xff] }
  0xad   :  { %1862 = vmatmul.msk.f32.gmra.mxu2 %vm111_vm0, %v1846_v46  ;;  %645 = vmatmul.f32.gmra.mxu1 %v1845_v32  ;;  %v1885_v46 = vld [vmem:[%s3591_s0 + $0x338] sm:$0xff] }
  0xae   :  { %v229_v36 = vpop.f32.mrf.mxu2  ;;  %2035 = vmatpush.msra.mxu3 %v2392_v45 }
  0xaf   :  { %v230_v49 = vadd.f32 %v229_v36, %v192_v50  ;;  %v156_v53 = vpop.f32.mrf.mxu0  ;;  %v1890_v36 = vld [vmem:[%s3591_s0 + $0x360] sm:$0x3] }
  0xb0   :  { %v194_v54 = vpop.f32.mrf.mxu1  ;;  %2036 = vmatpush.msra.mxu3 %v2411_v48  ;;  %v1852_v48 = vld [vmem:[%s3591_s0 + $0x268] sm:$0xff] }
  0xb1   :  { %v2844_v56 = vadd.f32 %v267_v11, %v230_v49  ;;  %v195_v57 = vadd.f32 %v194_v54, %v156_v53  ;;  %v1883_v54 = vld [vmem:[%s3591_s0 + $0x328] sm:$0xff] }
  0xb2   :  { %2037 = vmatpush.msra.mxu3 %v2433_v52  ;;  %v1853_v52 = vld [vmem:[%s3591_s0 + $0x270] sm:$0xff] }
  0xb3   :  { %578 = vmatmul.f32.gmra.mxu3 %v1855_v51  ;;  %v2848_v45 = vpop.f32.mrf.mxu3 }
  0xb4   :  { %610 = vmatmul.f32.gmra.mxu0 %v1848_v39 }
  0xb5   :  { %1863 = vmatmul.msk.f32.gmra.mxu2 %vm111_vm0, %v1850_v55  ;;  %648 = vmatmul.f32.gmra.mxu1 %v1849_v42  ;;  %v1884_v42 = vld [vmem:[%s3591_s0 + $0x330] sm:$0xff] }
  0xb6   :  { %v232_v59 = vpop.f32.mrf.mxu2 }
  0xb7   :  { %v233_v60 = vadd.f32 %v232_v59, %v195_v57  ;;  %v2854_v61 = vpop.f32.mrf.mxu0  ;;  %v1889_v57 = vld [vmem:[%s3591_s0 + $0x358] sm:$0xff] }
  0xb8   :  { %v2859_v62 = vpop.f32.mrf.mxu1 }
  0xb9   :  { %v2867_v0 = vadd.f32 %v270_v22, %v233_v60  ;;  %v1881_v22 = vld [vmem:[%s3591_s0 + $0x318] sm:$0xff] }
  0xbb   :  { %769 = vmatmul.f32.vlgmr.msrb.gmra.mxu3 %v1866_v58  ;;  %v2870_v3 = vpop.f32.mrf.mxu3 }
  0xbc   :  { %613 = vmatmul.f32.gmra.mxu0 %v1852_v48 }
  0xbd   :  { %1864 = vmatmul.msk.f32.gmra.mxu2 %vm111_vm0, %v1854_v63  ;;  %651 = vmatmul.f32.gmra.mxu1 %v1853_v52  ;;  %v1892_v63 = vld [vmem:[%s3591_s0 + $0x370] sm:$0x3] }
  0xbe   :  { %v2875_v23 = vpop.f32.mrf.mxu2 }
  0xbf   :  { %v2877_v9 = vpop.f32.mrf.mxu0 }
  0xc0   :  { %v2882_v15 = vpop.f32.mrf.mxu1 }
  0xc3   :  { %772 = vmatmul.f32.gmra.mxu3 %v1870_v6 }
  0xc4   :  { %616 = vmatmul.f32.gmra.mxu0 %v1856_v12  ;;  %v2891_v7 = vpop.f32.mrf.mxu3 }
  0xc5   :  { %1865 = vmatmul.msk.f32.gmra.mxu2 %vm111_vm0, %v1858_v1  ;;  %654 = vmatmul.f32.gmra.mxu1 %v1857_v4  ;;  %v1887_v1 = vld [vmem:[%s3591_s0 + $0x348] sm:$0xff] }
  0xc6   :  { %v2896_v19 = vpop.f32.mrf.mxu2 }
  0xc7   :  { %v2898_v13 = vpop.f32.mrf.mxu0 }
  0xc8   :  { %v2903_v20 = vpop.f32.mrf.mxu1 }
  0xcb   :  { %775 = vmatmul.f32.gmra.mxu3 %v1874_v10  ;;  %v1888_v10 = vld [vmem:[%s3591_s0 + $0x350] sm:$0xff] }
  0xcc   :  { %807 = vmatmul.f32.vlgmr.msrb.gmra.mxu0 %v1867_v16  ;;  %v2912_v27 = vpop.f32.mrf.mxu3  ;;  %v1893_v16 = vld [vmem:[%s3591_s0 + $0x378] sm:$0x3] }
  0xcd   :  { %845 = vmatmul.f32.vlgmr.msrb.gmra.mxu1 %v1868_v24  ;;  %1895 = vmatmul.msk.f32.vlgmr.msrb.gmra.mxu2 %vm111_vm0, %v1873_v25  ;;  %v198_v24 = vadd.f32 %v2859_v62, %v2854_v61  ;;  %v1891_v61 = vld [vmem:[%s3591_s0 + $0x368] sm:$0x3] }
  0xce   :  { %v2917_v30 = vpop.f32.mrf.mxu2 }
  0xd0   :  { %v2919_v2 = vpop.f32.mrf.mxu0 }
  0xd1   :  { %v2924_v8 = vpop.f32.mrf.mxu1 }
  0xd3   :  { %778 = vmatmul.f32.gmra.mxu3 %v1878_v28 }
  0xd4   :  { %810 = vmatmul.f32.gmra.mxu0 %v1871_v5  ;;  %v355_v11 = vpop.f32.mrf.mxu3  ;;  %v236_v5 = vadd.f32 %v2875_v23, %v198_v24  ;;  %v201_v23 = vadd.f32 %v2882_v15, %v2877_v9 }
  0xd5   :  { %848 = vmatmul.f32.gmra.mxu1 %v1872_v31  ;;  %1896 = vmatmul.msk.f32.gmra.mxu2 %vm111_vm0, %v1877_v33 }
  0xd7   :  { %v2936_v34 = vpop.f32.mrf.mxu2 }
  0xd8   :  { %v2938_v17 = vpop.f32.mrf.mxu0 }
  0xd9   :  { %v2943_v38 = vpop.f32.mrf.mxu1 }
  0xdb   :  { %781 = vmatmul.f32.gmra.mxu3 %v1882_v14  ;;  %v3005_v14 = vadd.f32 %v2828_v35, %v236_v5  ;;  %v239_v35 = vadd.f32 %v2896_v19, %v201_v23 }
  0xdc   :  { %813 = vmatmul.f32.gmra.mxu0 %v1875_v37  ;;  %v358_v21 = vpop.f32.mrf.mxu3 }
  0xdd   :  { %851 = vmatmul.f32.gmra.mxu1 %v1876_v18  ;;  %1897 = vmatmul.msk.f32.gmra.mxu2 %vm111_vm0, %v1881_v22 }
  0xdf   :  { %v2955_v40 = vpop.f32.mrf.mxu2 }
  0xe0   :  { %v393_v41 = vpop.f32.mrf.mxu0 }
  0xe1   :  { %v431_v29 = vpop.f32.mrf.mxu1  ;;  %v394_v32 = vadd.f32 %v393_v41, %v355_v11 }
  0xe3   :  { %784 = vmatmul.f32.gmra.mxu3 %v1886_v26  ;;  %v432_v51 = vadd.f32 %v431_v29, %v394_v32  ;;  %v3018_v29 = vadd.f32 %v2848_v45, %v239_v35  ;;  %v1869_v32 = vld [vmem:[%s3591_s0 + $0x2b8] sm:$0xff] }
  0xe4   :  { %816 = vmatmul.f32.gmra.mxu0 %v1879_v43  ;;  %v361_v50 = vpop.f32.mrf.mxu3 }
  0xe5   :  { %854 = vmatmul.f32.gmra.mxu1 %v1880_v44  ;;  %1898 = vmatmul.msk.f32.gmra.mxu2 %vm111_vm0, %v1885_v46 }
  0xe7   :  { %v469_v49 = vpop.f32.mrf.mxu2 }
  0xe8   :  { %v2970_v53 = vadd.f32 %v469_v49, %v432_v51  ;;  %v396_v39 = vpop.f32.mrf.mxu0 }
  0xe9   :  { %v434_v55 = vpop.f32.mrf.mxu1  ;;  %v397_v59 = vadd.f32 %v396_v39, %v358_v21 }
  0xea   :  { %v488_v58 = vmax.f32 %v2844_v56, %v2970_v53 }
  0xeb   :  { %787 = vmatmul.f32.gmra.mxu3 %v1890_v36  ;;  %v435_v48 = vadd.f32 %v434_v55, %v397_v59 }
  0xec   :  { %819 = vmatmul.f32.gmra.mxu0 %v1883_v54 }
  0xed   :  { %857 = vmatmul.f32.gmra.mxu1 %v1884_v42  ;;  %1899 = vmatmul.msk.f32.gmra.mxu2 %vm111_vm0, %v1889_v57  ;;  %v364_v60 = vpop.f32.mrf.mxu3  ;;  %v391_v57 = vadd.f32 %v2938_v17, %v2912_v27 }
  0xef   :  { %v472_v52 = vpop.f32.mrf.mxu2 }
  0xf0   :  { %v2987_v6 = vadd.f32 %v472_v52, %v435_v48  ;;  %v399_v12 = vpop.f32.mrf.mxu0 }
  0xf1   :  { %v437_v4 = vpop.f32.mrf.mxu1  ;;  %v400_v28 = vadd.f32 %v399_v12, %v361_v50  ;;  %v429_v12 = vadd.f32 %v2943_v38, %v391_v57 }
  0xf2   :  { %v489_v25 = vmax.f32 %v2867_v0, %v2987_v6  ;;  %v1960_v6 = vld [vmem:[%s3594_s3 + $0x198] sm:$0xff] }
  0xf3   :  { %863 = vmatmul.f32.vlgmr.msra.gmra.mxu3 %v1892_v63  ;;  %v438_v33 = vadd.f32 %v437_v4, %v400_v28  ;;  %v467_v4 = vadd.f32 %v2955_v40, %v429_v12  ;;  %v1950_v12 = vld [vmem:[%s3594_s3 + $0x158] sm:$0xff] }
  0xf4   :  { %822 = vmatmul.f32.gmra.mxu0 %v1887_v1 }
  0xf5   :  { %860 = vmatmul.f32.gmra.mxu1 %v1888_v10  ;;  %1900 = vmatmul.msk.f32.gmra.mxu2 %vm111_vm0, %v1893_v16  ;;  %v367_v31 = vpop.f32.mrf.mxu3  ;;  %v487_v24 = vmax.f32 %v2824_v47, %v467_v4 }
  0xf7   :  { %v475_v11 = vpop.f32.mrf.mxu2 }
  0xf8   :  { %v3007_v37 = vadd.f32 %v475_v11, %v438_v33 }
  0xf9   :  { %v402_v18 = vpop.f32.mrf.mxu0 }
  0xfa   :  { %v403_v62 = vadd.f32 %v402_v18, %v364_v60  ;;  %v440_v22 = vpop.f32.mrf.mxu1  ;;  %v490_v21 = vmax.f32 %v3005_v14, %v3007_v37 }
  0xfc   :  { %v441_v26 = vadd.f32 %v440_v22, %v403_v62  ;;  %825 = vmatmul.f32.gmra.mxu0 %v1891_v61 }
  0xfd   :  { %v370_v41 = vpop.f32.mrf.mxu3 }
 0x100   :  { %v478_v43 = vpop.f32.mrf.mxu2 }
 0x101   :  { %v3020_v44 = vadd.f32 %v478_v43, %v441_v26  ;;  %v405_v46 = vpop.f32.mrf.mxu0 }
 0x102   :  { %v406_v9 = vadd.f32 %v405_v46, %v367_v31  ;;  %v443_v15 = vpop.f32.mrf.mxu1 }
 0x103   :  { %v491_v50 = vmax.f32 %v3018_v29, %v3020_v44  ;;  %v1984_v29 = vld [vmem:[%s3594_s3 + $0x230] sm:$0xff] }
 0x104   :  { %v444_v51 = vadd.f32 %v443_v15, %v406_v9  ;;  %1894 = vmatmul.msk.f32.vlgmr.msra.gmra.mxu0 %vm111_vm0, %v1869_v32  ;;  %v1920_v9 = vld [vmem:[%s3594_s3 + $0x98] sm:$0xff]  ;;  %v1989_v44 = vld [vmem:[%s3594_s3 + $0x250] sm:$0xff] }
 0x105   :  { %v561_v19 = vpop.f32.mrf.mxu3  ;;  %v1930_v15 = vld [vmem:[%s3594_s3 + $0xd8] sm:$0xff]  ;;  %1076 = vmatpush.msrb.mxu0 %v1920_v9 }
 0x106   :  { %1136 = vmatpush.msra.mxu2 %v1930_v15  ;;  %v1938_v15 = vld [vmem:[%s3594_s3 + $0x108] sm:$0xff] }
 0x108   :  { %v481_v36 = vpop.f32.mrf.mxu2 }
 0x109   :  { %v3028_v49 = vadd.f32 %v481_v36, %v444_v51  ;;  %v408_v45 = vpop.f32.mrf.mxu0  ;;  %v1919_v36 = vld [vmem:[%s3594_s3 + $0x90] sm:$0xff] }
 0x10a   :  { %v409_v39 = vadd.f32 %v408_v45, %v370_v41  ;;  %v446_v54 = vpop.f32.mrf.mxu1  ;;  %v1929_v45 = vld [vmem:[%s3594_s3 + $0xd0] sm:$0xff]  ;;  %1077 = vmatpush.msrb.mxu0 %v1919_v36  ;;  %v1943_v36 = vld [vmem:[%s3594_s3 + $0x128] sm:$0xff] }
 0x10b   :  { %1137 = vmatpush.msra.mxu2 %v1929_v45  ;;  %v1948_v45 = vld [vmem:[%s3594_s3 + $0x148] sm:$0xff] }
 0x10c   :  { %v447_v55 = vadd.f32 %v446_v54, %v409_v39  ;;  %v1918_v54 = vld [vmem:[%s3594_s3 + $0x88] sm:$0xff] }
 0x10d   :  { %v3030_v42 = vpop.f32.mrf.mxu3  ;;  %1078 = vmatpush.msrb.mxu0 %v1918_v54 }
 0x110   :  { %v484_v59 = vpop.f32.mrf.mxu2 }
 0x111   :  { %v3034_v60 = vadd.f32 %v484_v59, %v447_v55  ;;  %v599_v48 = vpop.f32.mrf.mxu0  ;;  %v1928_v55 = vld [vmem:[%s3594_s3 + $0xc8] sm:$0xff]  ;;  %v1917_v59 = vld [vmem:[%s3594_s3 + $0x80] sm:$0xff] }
 0x112   :  { %v600_v63 = vadd.f32 %v599_v48, %v561_v19  ;;  %v637_v52 = vpop.f32.mrf.mxu1  ;;  %1138 = vmatpush.msra.mxu2 %v1928_v55  ;;  %v1927_v48 = vld [vmem:[%s3594_s3 + $0xc0] sm:$0xff]  ;;  %1079 = vmatpush.msrb.mxu0 %v1917_v59 }
 0x113   :  { %v1937_v59 = vld [vmem:[%s3594_s3 + $0x100] sm:$0xff] }
 0x114   :  { %v638_v1 = vadd.f32 %v637_v52, %v600_v63  ;;  %1139 = vmatpush.msra.mxu2 %v1927_v48  ;;  %v1940_v63 = vld [vmem:[%s3594_s3 + $0x118] sm:$0xff]  ;;  %v1942_v48 = vld [vmem:[%s3594_s3 + $0x120] sm:$0xff] }
 0x115   :  { %v1945_v52 = vld [vmem:[%s3594_s3 + $0x138] sm:$0xff]  ;;  %1196 = vmatpush.msra.mxu0 %v1940_v63  ;;  %v1947_v63 = vld [vmem:[%s3594_s3 + $0x140] sm:$0xff] }
 0x116   :  { %v3038_v10 = vpop.f32.mrf.mxu3  ;;  %1226 = vmatpush.msra.mxu1 %v1945_v52  ;;  %1256 = vmatpush.msrb.mxu2 %v1950_v12 }
 0x118   :  { %v675_v16 = vpop.f32.mrf.mxu2 }
 0x119   :  { %v676_v28 = vadd.f32 %v675_v16, %v638_v1  ;;  %v602_v5 = vpop.f32.mrf.mxu0  ;;  %v1939_v16 = vld [vmem:[%s3594_s3 + $0x110] sm:$0xff] }
 0x11a   :  { %v3041_v31 = vpop.f32.mrf.mxu1  ;;  %1197 = vmatpush.msra.mxu0 %v1939_v16  ;;  %v603_v54 = vadd.f32 %v602_v5, %v3030_v42  ;;  %v1965_v42 = vld [vmem:[%s3594_s3 + $0x1b8] sm:$0xff]  ;;  %v1964_v16 = vld [vmem:[%s3594_s3 + $0x1b0] sm:$0xff] }
 0x11b   :  { %v3043_v27 = vmax.f32 %v487_v24, %v676_v28  ;;  %v1944_v24 = vld [vmem:[%s3594_s3 + $0x130] sm:$0xff] }
 0x11c   :  { %v1949_v28 = vld [vmem:[%s3594_s3 + $0x150] sm:$0xff]  ;;  %1227 = vmatpush.msra.mxu1 %v1944_v24  ;;  %1198 = vmatpush.msra.mxu0 %v1938_v15  ;;  %v641_v5 = vadd.f32 %v3041_v31, %v603_v54 }
 0x11d   :  { %1257 = vmatpush.msrb.mxu2 %v1949_v28 }
 0x11e   :  { %v3045_v17 = vpop.f32.mrf.mxu3  ;;  %1228 = vmatpush.msra.mxu1 %v1943_v36  ;;  %1199 = vmatpush.msra.mxu0 %v1937_v59  ;;  %v1963_v36 = vld [vmem:[%s3594_s3 + $0x1a8] sm:$0xff]  ;;  %v1962_v59 = vld [vmem:[%s3594_s3 + $0x1a0] sm:$0xff] }
 0x11f   :  { %1258 = vmatpush.msrb.mxu2 %v1948_v45 }
 0x120   :  { %v3047_v33 = vpop.f32.mrf.mxu2  ;;  %1229 = vmatpush.msra.mxu1 %v1942_v48  ;;  %v3174_v48 = vld [vmem:[%s3593_s2] ss:$0 sm:$0xff]  ;;  %s2071_s2 = smov [#allocation3]  }
 0x121   :  { %v3049_v11 = vpop.f32.mrf.mxu0  ;;  %1259 = vmatpush.msrb.mxu2 %v1947_v63  ;;  %v679_v24 = vadd.f32 %v3047_v33, %v641_v5  ;;  %s1778_s11 = sshll.u32 %s2071_s2, 4  ;;  %s1779_s11 = int_to_ptr.vmem [resolvable:$true] %s1778_s11 }
 0x122   :  { %v3051_v38 = vpop.f32.mrf.mxu1  ;;  %1346 = vmatpush.msrb.mxu1 %v1965_v42  ;;  %v606_v45 = vadd.f32 %v3049_v11, %v3038_v10 }
 0x123   :  { %v697_v33 = vmax.f32 %v488_v58, %v679_v24 }
 0x124   :  { %1347 = vmatpush.msrb.mxu1 %v1964_v16  ;;  %v644_v10 = vadd.f32 %v3051_v38, %v606_v45 }
 0x126   :  { %v3053_v40 = vpop.f32.mrf.mxu3  ;;  %1348 = vmatpush.msrb.mxu1 %v1963_v36 }
 0x128   :  { %v3055_v18 = vpop.f32.mrf.mxu2  ;;  %1349 = vmatpush.msrb.mxu1 %v1962_v59 }
 0x129   :  { %v3057_v61 = vpop.f32.mrf.mxu0  ;;  %v682_v5 = vadd.f32 %v3055_v18, %v644_v10  ;;  %v1969_v10 = vld [vmem:[%s3594_s3 + $0x1d0] sm:$0xff] }
 0x12a   :  { %v3059_v47 = vpop.f32.mrf.mxu1  ;;  %v609_v56 = vadd.f32 %v3057_v61, %v3045_v17 }
 0x12b   :  { %v698_v24 = vmax.f32 %v489_v25, %v682_v5  ;;  %v1970_v25 = vld [vmem:[%s3594_s3 + $0x1d8] sm:$0xff] }
 0x12e   :  { %v3061_v62 = vpop.f32.mrf.mxu3 }
 0x130   :  { %v3063_v22 = vpop.f32.mrf.mxu2 }
 0x131   :  { %v3065_v23 = vpop.f32.mrf.mxu0 }
 0x132   :  { %v3067_v26 = vpop.f32.mrf.mxu1  ;;  %v612_v61 = vadd.f32 %v3065_v23, %v3053_v40  ;;  %v1959_v23 = vld [vmem:[%s3594_s3 + $0x190] sm:$0xff] }
 0x136   :  { %v3069_v35 = vpop.f32.mrf.mxu3 }
 0x138   :  { %v3071_v41 = vpop.f32.mrf.mxu2 }
 0x139   :  { %v3073_v43 = vpop.f32.mrf.mxu0 }
 0x13a   :  { %v3075_v46 = vpop.f32.mrf.mxu1 }
 0x13e   :  { %v3077_v32 = vpop.f32.mrf.mxu3 }
 0x140   :  { %v3085_v51 = vpop.f32.mrf.mxu2 }
 0x141   :  { %v3087_v19 = vpop.f32.mrf.mxu0 }
 0x142   :  { %v3095_v39 = vpop.f32.mrf.mxu1 }
 0x146   :  { %v773_v57 = vpop.f32.mrf.mxu3 }
 0x148   :  { %v3118_v1 = vpop.f32.mrf.mxu2 }
 0x149   :  { %v3120_v4 = vpop.f32.mrf.mxu0 }
 0x14a   :  { %v3131_v9 = vpop.f32.mrf.mxu1 }
 0x14e   :  { %v776_v55 = vpop.f32.mrf.mxu3 }
 0x150   :  { %v887_v52 = vpop.f32.mrf.mxu2 }
 0x151   :  { %v811_v12 = vpop.f32.mrf.mxu0 }
 0x152   :  { %v812_v28 = vadd.f32 %v811_v12, %v773_v57  ;;  %v849_v15 = vpop.f32.mrf.mxu1 }
 0x154   :  { %v850_v31 = vadd.f32 %v849_v15, %v812_v28  ;;  %v647_v15 = vadd.f32 %v3059_v47, %v609_v56  ;;  %v1967_v56 = vld [vmem:[%s3594_s3 + $0x1c0] sm:$0xff] }
 0x156   :  { %v779_v54 = vpop.f32.mrf.mxu3  ;;  %v888_v57 = vadd.f32 %v887_v52, %v850_v31 }
 0x158   :  { %v906_v11 = vmax.f32 %v697_v33, %v888_v57  ;;  %v890_v63 = vpop.f32.mrf.mxu2 }
 0x159   :  { %v814_v42 = vpop.f32.mrf.mxu0 }
 0x15a   :  { %v917_v12 = vadd.f32 %v3174_v48, %v906_v11  ;;  %v815_v16 = vadd.f32 %v814_v42, %v776_v55  ;;  %v852_v28 = vpop.f32.mrf.mxu1  ;;  %v685_v55 = vadd.f32 %v3063_v22, %v647_v15  ;;  %v650_v11 = vadd.f32 %v3067_v26, %v612_v61  ;;  %v1957_v26 = vld [vmem:[%s3594_s3 + $0x180] sm:$0xff]  ;;  %v1985_v15 = vld [vmem:[%s3594_s3 + $0x238] sm:$0xff]  ;;  %v1902_v61 = vld [vmem:[%s3594_s3 + $0x28] sm:$0xff] }
 0x15c   :  { %v924_v53 = vmax.f32 %v917_v12, 0.0  ;;  %v853_v58 = vadd.f32 %v852_v28, %v815_v16  ;;  %v688_v5 = vadd.f32 %v3071_v41, %v650_v11  ;;  %v615_v41 = vadd.f32 %v3073_v43, %v3061_v62 }
 0x15e   :  { %v782_v52 = vpop.f32.mrf.mxu3  ;;  %931 = vst [vmem:[#allocation2 + $0x8] sm:$0xff] %v924_v53  ;;  %v891_v38 = vadd.f32 %v890_v63, %v853_v58  ;;  %v1968_v63 = vld [vmem:[%s3594_s3 + $0x1c8] sm:$0xff]  ;;  %v1904_v53 = vld [vmem:[%s3594_s3 + $0x38] sm:$0xff]  ;;  %v204_v58 = vadd.f32 %v2903_v20, %v2898_v13  ;;  %v700_v43 = vmax.f32 %v491_v50, %v688_v5  ;;  %v653_v50 = vadd.f32 %v3075_v46, %v615_v41 }
 0x15f   :  { %964 = vmatpush.msrb.mxu3 %v1904_v53  ;;  %v1983_v46 = vld [vmem:[%s3594_s3 + $0x228] sm:$0xff]  ;;  %v2005_v5 = vld [vmem:[%s3594_s3 + $0x2b8] sm:$0xff]  ;;  %v2009_v53 = vld [vmem:[%s3594_s3 + $0x2d0] sm:$0xff] }
 0x160   :  { %v907_v36 = vmax.f32 %v698_v24, %v891_v38  ;;  %v893_v18 = vpop.f32.mrf.mxu2  ;;  %v1980_v38 = vld [vmem:[%s3594_s3 + $0x218] sm:$0xff]  ;;  %v242_v13 = vadd.f32 %v2917_v30, %v204_v58  ;;  %v1903_v30 = vld [vmem:[%s3594_s3 + $0x30] sm:$0xff] }
 0x161   :  { %v817_v45 = vpop.f32.mrf.mxu0  ;;  %965 = vmatpush.msrb.mxu3 %v1903_v30  ;;  %v2007_v30 = vld [vmem:[%s3594_s3 + $0x2c0] sm:$0xff] }
 0x162   :  { %v918_v31 = vadd.f32 %v3174_v48, %v907_v36  ;;  %v818_v59 = vadd.f32 %v817_v45, %v779_v54  ;;  %v855_v17 = vpop.f32.mrf.mxu1  ;;  %v699_v54 = vmax.f32 %v490_v21, %v685_v55  ;;  %v1958_v21 = vld [vmem:[%s3594_s3 + $0x188] sm:$0xff]  ;;  %v1990_v36 = vld [vmem:[%s3594_s3 + $0x258] sm:$0xff]  ;;  %v1979_v55 = vld [vmem:[%s3594_s3 + $0x210] sm:$0xff] }
 0x163   :  { %966 = vmatpush.msrb.mxu3 %v1902_v61  ;;  %v2019_v61 = vld [vmem:[%s3594_s3 + $0x310] sm:$0xff] }
 0x164   :  { %v925_v33 = vmax.f32 %v918_v31, 0.0  ;;  %v856_v0 = vadd.f32 %v855_v17, %v818_v59  ;;  %v1978_v17 = vld [vmem:[%s3594_s3 + $0x208] sm:$0xff] }
 0x165   :  { %v1055_v47 = vld [vmem:[#allocation2 + $0x8] sm:$0x3]  ;;  %v1115_v22 = vld [vmem:[#allocation2 + $0xc] sm:$0x3] }
 0x166   :  { %v3195_v57 = vpop.f32.mrf.mxu3  ;;  %932 = vst [vmem:[#allocation2 + $0x10] sm:$0xff] %v925_v33  ;;  %v894_v40 = vadd.f32 %v893_v18, %v856_v0  ;;  %1921 = vmatmul.msk.f32.vlgmr.msrb.gmra.mxu0 %vm948_vm1, %v1055_v47  ;;  %1931 = vmatmul.msk.f32.vlgmr.msra.gmra.mxu2 %vm948_vm1, %v1115_v22  ;;  %v280_v33 = vadd.f32 %v2870_v3, %v242_v13  ;;  %v1977_v3 = vld [vmem:[%s3594_s3 + $0x200] sm:$0xff]  ;;  %v2008_v13 = vld [vmem:[%s3594_s3 + $0x2c8] sm:$0xff] }
 0x167   :  { %1316 = vmatpush.msrb.mxu0 %v1960_v6  ;;  %1376 = vmatpush.msra.mxu2 %v1970_v25  ;;  %v1988_v25 = vld [vmem:[%s3594_s3 + $0x248] sm:$0xff]  ;;  %v691_v47 = vadd.f32 %v3085_v51, %v653_v50 }
 0x168   :  { %v908_v14 = vmax.f32 %v699_v54, %v894_v40  ;;  %v896_v37 = vpop.f32.mrf.mxu2  ;;  %v492_v51 = vmax.f32 %v280_v33, %v3028_v49  ;;  %v939_v50 = vld [vmem:[%s3594_s3 + $0x8] sm:$0xff]  ;;  %v938_v33 = vld [vmem:[%s3594_s3] sm:$0xff] }
 0x169   :  { %v820_v42 = vpop.f32.mrf.mxu0  ;;  %1317 = vmatpush.msrb.mxu0 %v1959_v23  ;;  %1377 = vmatpush.msra.mxu2 %v1969_v10  ;;  %v1901_v23 = vld [vmem:[%s3594_s3 + $0x20] sm:$0xff]  ;;  %v207_v10 = vadd.f32 %v2924_v8, %v2919_v2  ;;  %v2000_v2 = vld [vmem:[%s3594_s3 + $0x298] sm:$0xff] }
 0x16a   :  { %v919_v12 = vadd.f32 %v3174_v48, %v908_v14  ;;  %v821_v16 = vadd.f32 %v820_v42, %v782_v52  ;;  %v858_v28 = vpop.f32.mrf.mxu1  ;;  %967 = vmatpush.msrb.mxu3 %v1901_v23 }
 0x16b   :  { %1318 = vmatpush.msrb.mxu0 %v1958_v21  ;;  %1378 = vmatpush.msra.mxu2 %v1968_v63  ;;  %v1987_v21 = vld [vmem:[%s3594_s3 + $0x240] sm:$0xff]  ;;  %v245_v8 = vadd.f32 %v2936_v34, %v207_v10  ;;  %v701_v63 = vmax.f32 %v492_v51, %v691_v47  ;;  %v2010_v34 = vld [vmem:[%s3594_s3 + $0x2d8] sm:$0xff] }
 0x16c   :  { %v926_v52 = vmax.f32 %v919_v12, 0.0  ;;  %v859_v24 = vadd.f32 %v858_v28, %v821_v16  ;;  %v1999_v12 = vld [vmem:[%s3594_s3 + $0x290] sm:$0xff]  ;;  %v941_v16 = vld [vmem:[%s3594_s3 + $0x18] sm:$0xff] }
 0x16d   :  { %v1175_v20 = vld [vmem:[#allocation2 + $0x10] sm:$0x3]  ;;  %v1205_v18 = vld [vmem:[#allocation2 + $0x12] sm:$0x3]  ;;  %v1235_v62 = vld [vmem:[#allocation2 + $0x14] sm:$0x3]  ;;  %1319 = vmatpush.msrb.mxu0 %v1957_v26  ;;  %1379 = vmatpush.msra.mxu2 %v1967_v56  ;;  %v283_v58 = vadd.f32 %v2891_v7, %v245_v8 }
 0x16e   :  { %933 = vst [vmem:[#allocation2 + $0x18] sm:$0xff] %v926_v52  ;;  %v897_v45 = vadd.f32 %v896_v37, %v859_v24  ;;  %1941 = vmatmul.msk.f32.vlgmr.msra.gmra.mxu0 %vm948_vm1, %v1175_v20  ;;  %1946 = vmatmul.msk.f32.vlgmr.msra.gmra.mxu1 %vm948_vm1, %v1205_v18  ;;  %v3252_v31 = vpop.f32.mrf.mxu3  ;;  %v1982_v37 = vld [vmem:[%s3594_s3 + $0x220] sm:$0xff]  ;;  %v2004_v56 = vld [vmem:[%s3594_s3 + $0x2b0] sm:$0xff]  ;;  %v2003_v7 = vld [vmem:[%s3594_s3 + $0x2a8] sm:$0xff] }
 0x16f   :  { %1951 = vmatmul.msk.f32.vlgmr.msrb.gmra.mxu2 %vm948_vm1, %v1235_v62  ;;  %1436 = vmatpush.msra.mxu0 %v1980_v38  ;;  %v940_v24 = vld [vmem:[%s3594_s3 + $0x10] sm:$0xff]  ;;  %v493_v18 = vmax.f32 %v283_v58, %v3034_v60  ;;  %v1910_v51 = vld [vmem:[%s3594_s3 + $0x58] sm:$0xff]  ;;  %v1913_v8 = vld [vmem:[%s3594_s3 + $0x68] sm:$0xff] }
 0x170   :  { %v909_v59 = vmax.f32 %v700_v43, %v897_v45  ;;  %1466 = vmatpush.msra.mxu1 %v1985_v15  ;;  %1496 = vmatpush.msrb.mxu2 %v1990_v36  ;;  %v899_v6 = vpop.f32.mrf.mxu2  ;;  %v1997_v45 = vld [vmem:[%s3594_s3 + $0x280] sm:$0xff]  ;;  %v1954_v58 = vld [vmem:[%s3594_s3 + $0x170] sm:$0xff] }
 0x171   :  { %v823_v0 = vpop.f32.mrf.mxu0  ;;  %1437 = vmatpush.msra.mxu0 %v1979_v55  ;;  %987 = vmatpush.msra.mxu3 %v941_v16  ;;  %v2002_v55 = vld [vmem:[%s3594_s3 + $0x2a0] sm:$0xff]  ;;  %v1934_v16 = vld [vmem:[%s3594_s3 + $0xf0] sm:$0xff] }
 0x172   :  { %v920_v22 = vadd.f32 %v3174_v48, %v909_v59  ;;  %v824_v54 = vadd.f32 %v823_v0, %v3195_v57  ;;  %v861_v40 = vpop.f32.mrf.mxu1  ;;  %1467 = vmatpush.msra.mxu1 %v1984_v29  ;;  %1497 = vmatpush.msrb.mxu2 %v1989_v44  ;;  %v618_v57 = vadd.f32 %v3087_v19, %v3069_v35  ;;  %v2020_v44 = vld [vmem:[%s3594_s3 + $0x318] sm:$0xff] }
 0x173   :  { %1438 = vmatpush.msra.mxu0 %v1978_v17  ;;  %988 = vmatpush.msra.mxu3 %v940_v24  ;;  %v1145_v24 = vld [vmem:[#allocation2 + $0xe] sm:$0x3] }
 0x174   :  { %v927_v11 = vmax.f32 %v920_v22, 0.0  ;;  %v862_v14 = vadd.f32 %v861_v40, %v824_v54  ;;  %1468 = vmatpush.msra.mxu1 %v1983_v46  ;;  %1498 = vmatpush.msrb.mxu2 %v1988_v25  ;;  %v656_v28 = vadd.f32 %v3095_v39, %v618_v57  ;;  %v1998_v39 = vld [vmem:[%s3594_s3 + $0x288] sm:$0xff]  ;;  %v2017_v22 = vld [vmem:[%s3594_s3 + $0x300] sm:$0xff] }
 0x175   :  { %v1295_v49 = vld [vmem:[#allocation2 + $0x18] sm:$0x3]  ;;  %v1325_v35 = vld [vmem:[#allocation2 + $0x1a] sm:$0x3]  ;;  %v1355_v19 = vld [vmem:[#allocation2 + $0x1c] sm:$0x3]  ;;  %1439 = vmatpush.msra.mxu0 %v1977_v3  ;;  %989 = vmatpush.msra.mxu3 %v939_v50 }
 0x176   :  { %934 = vst [vmem:[#allocation2 + $0x20] sm:$0xff] %v927_v11  ;;  %v900_v42 = vadd.f32 %v899_v6, %v862_v14  ;;  %1961 = vmatmul.msk.f32.vlgmr.msrb.gmra.mxu0 %vm948_vm1, %v1295_v49  ;;  %1966 = vmatmul.msk.f32.vlgmr.msrb.gmra.mxu1 %vm948_vm1, %v1325_v35  ;;  %v864_v52 = vpop.f32.mrf.mxu3  ;;  %v694_v38 = vadd.f32 %v3118_v1, %v656_v28  ;;  %v1908_v11 = vld [vmem:[%s3594_s3 + $0x48] sm:$0xff]  ;;  %v1907_v14 = vld [vmem:[%s3594_s3 + $0x40] sm:$0xff]  ;;  %v1925_v35 = vld [vmem:[%s3594_s3 + $0xb8] sm:$0xff] }
 0x177   :  { %1971 = vmatmul.msk.f32.vlgmr.msra.gmra.mxu2 %vm948_vm1, %v1355_v19  ;;  %1469 = vmatpush.msra.mxu1 %v1982_v37  ;;  %v809_v1 = vadd.f32 %v3120_v4, %v3077_v32  ;;  %v1915_v37 = vld [vmem:[%s3594_s3 + $0x78] sm:$0xff]  ;;  %v1912_v49 = vld [vmem:[%s3594_s3 + $0x60] sm:$0xff]  ;;  %v1933_v28 = vld [vmem:[%s3594_s3 + $0xe8] sm:$0xff] }
 0x178   :  { %v910_v26 = vmax.f32 %v701_v63, %v900_v42  ;;  %1499 = vmatpush.msrb.mxu2 %v1987_v21  ;;  %1556 = vmatpush.msrb.mxu0 %v2000_v2  ;;  %v902_v20 = vpop.f32.mrf.mxu2  ;;  %v702_v32 = vmax.f32 %v493_v18, %v694_v38  ;;  %v1914_v2 = vld [vmem:[%s3594_s3 + $0x70] sm:$0xff]  ;;  %v1923_v42 = vld [vmem:[%s3594_s3 + $0xa8] sm:$0xff] }
 0x179   :  { %v826_v41 = vpop.f32.mrf.mxu0  ;;  %1586 = vmatpush.msrb.mxu1 %v2005_v5  ;;  %v847_v59 = vadd.f32 %v3131_v9, %v809_v1  ;;  %v2018_v9 = vld [vmem:[%s3594_s3 + $0x308] sm:$0xff]  ;;  %990 = vmatpush.msra.mxu3 %v938_v33  ;;  %v1924_v63 = vld [vmem:[%s3594_s3 + $0xb0] sm:$0xff]  ;;  %v1922_v5 = vld [vmem:[%s3594_s3 + $0xa0] sm:$0xff] }
 0x17a   :  { %1616 = vmatpush.msra.mxu2 %v2010_v34  ;;  %v921_v15 = vadd.f32 %v3174_v48, %v910_v26  ;;  %v827_v36 = vadd.f32 %v826_v41, %v3252_v31  ;;  %1557 = vmatpush.msrb.mxu0 %v1999_v12  ;;  %v1935_v34 = vld [vmem:[%s3594_s3 + $0xf8] sm:$0xff]  ;;  %v1932_v26 = vld [vmem:[%s3594_s3 + $0xe0] sm:$0xff]  ;;  %v1953_v41 = vld [vmem:[%s3594_s3 + $0x168] sm:$0xff] }
 0x17b   :  { %1587 = vmatpush.msrb.mxu1 %v2004_v56  ;;  %v1955_v56 = vld [vmem:[%s3594_s3 + $0x178] sm:$0xff]  ;;  %v1974_v38 = vld [vmem:[%s3594_s3 + $0x1f0] sm:$0xff]  ;;  %v1993_v18 = vld [vmem:[%s3594_s3 + $0x268] sm:$0xff] }
 0x17c   :  { %1617 = vmatpush.msra.mxu2 %v2009_v53  ;;  %v928_v62 = vmax.f32 %v921_v15, 0.0  ;;  %v865_v43 = vadd.f32 %v864_v52, %v827_v36  ;;  %1558 = vmatpush.msrb.mxu0 %v1998_v39  ;;  %v1085_v53 = vld [vmem:[#allocation2 + $0xa] sm:$0x3]  ;;  %v1952_v52 = vld [vmem:[%s3594_s3 + $0x160] sm:$0xff]  ;;  %v1975_v39 = vld [vmem:[%s3594_s3 + $0x1f8] sm:$0xff] }
 0x17d   :  { %v1415_v60 = vld [vmem:[#allocation2 + $0x20] sm:$0x3]  ;;  %v1445_v31 = vld [vmem:[#allocation2 + $0x22] sm:$0x3]  ;;  %v1475_v29 = vld [vmem:[#allocation2 + $0x24] sm:$0x3]  ;;  %1588 = vmatpush.msrb.mxu1 %v2003_v7 }
 0x17e   :  { %1618 = vmatpush.msra.mxu2 %v2008_v13  ;;  %935 = vst [vmem:[#allocation2 + $0x28] sm:$0xff] %v928_v62  ;;  %v903_v4 = vadd.f32 %v902_v20, %v865_v43  ;;  %1981 = vmatmul.msk.f32.vlgmr.msra.gmra.mxu0 %vm948_vm1, %v1415_v60  ;;  %v1973_v15 = vld [vmem:[%s3594_s3 + $0x1e8] sm:$0xff]  ;;  %v1972_v36 = vld [vmem:[%s3594_s3 + $0x1e0] sm:$0xff]  ;;  %v1995_v7 = vld [vmem:[%s3594_s3 + $0x278] sm:$0xff] }
 0x17f   :  { %1986 = vmatmul.msk.f32.vlgmr.msra.gmra.mxu1 %vm948_vm1, %v1445_v31  ;;  %1991 = vmatmul.msk.f32.vlgmr.msrb.gmra.mxu2 %vm948_vm1, %v1475_v29  ;;  %v1265_v13 = vld [vmem:[#allocation2 + $0x16] sm:$0x3]  ;;  %v1992_v1 = vld [vmem:[%s3594_s3 + $0x260] sm:$0xff]  ;;  %v2015_v62 = vld [vmem:[%s3594_s3 + $0x2f8] sm:$0xff] }
 0x180   :  { %1559 = vmatpush.msrb.mxu0 %v1997_v45  ;;  %v911_v17 = vmax.f32 %v702_v32, %v903_v4  ;;  %1589 = vmatpush.msrb.mxu1 %v2002_v55  ;;  %v1994_v20 = vld [vmem:[%s3594_s3 + $0x270] sm:$0xff]  ;;  %v1385_v43 = vld [vmem:[#allocation2 + $0x1e] sm:$0x3]  ;;  %v2013_v55 = vld [vmem:[%s3594_s3 + $0x2e8] sm:$0xff] }
 0x181   :  { %1619 = vmatpush.msra.mxu2 %v2007_v30  ;;  %v884_v0 = vpop.f32.mrf.mxu0  ;;  %v2014_v45 = vld [vmem:[%s3594_s3 + $0x2f0] sm:$0xff]  ;;  %v2012_v30 = vld [vmem:[%s3594_s3 + $0x2e0] sm:$0xff] }
 0x182   :  { %1676 = vmatpush.msra.mxu0 %v2020_v44  ;;  %v922_v6 = vadd.f32 %v3174_v48, %v911_v17  ;;  %v885_v46 = vadd.f32 %v884_v0, %v847_v59  ;;  %v1505_v60 = vld [vmem:[#allocation2 + $0x26] sm:$0x3]  ;;  %v1706_v44 = vld [vmem:[%s3596_s5 + $0x78] sm:$0xff]  ;;  %v1705_v50 = vld [vmem:[%s3596_s5 + $0x70] sm:$0xff] }
 0x183   :  { %1711 = vmatpush.msra.mxu1 %v1706_v44  ;;  %v1704_v59 = vld [vmem:[%s3596_s5 + $0x68] sm:$0xff]  ;;  %v1703_v0 = vld [vmem:[%s3596_s5 + $0x60] sm:$0xff] }
 0x184   :  { %1677 = vmatpush.msra.mxu0 %v2019_v61  ;;  %v929_v25 = vmax.f32 %v922_v6, 0.0  ;;  %v905_v47 = vmax.f32 %v3043_v27, %v885_v46  ;;  %v1702_v46 = vld [vmem:[%s3596_s5 + $0x58] sm:$0xff]  ;;  %v1737_v44 = vld [vmem:[%s3598_s7 + $0x28] sm:$0xff] }
 0x185   :  { %v1535_v54 = vld [vmem:[#allocation2 + $0x28] sm:$0x3]  ;;  %v1565_v40 = vld [vmem:[#allocation2 + $0x2a] sm:$0x3]  ;;  %v1595_v3 = vld [vmem:[#allocation2 + $0x2c] sm:$0x3]  ;;  %1712 = vmatpush.msra.mxu1 %v1705_v50 }
 0x186   :  { %1678 = vmatpush.msra.mxu0 %v2018_v9  ;;  %936 = vst [vmem:[#allocation2 + $0x30] sm:$0x3] %v929_v25  ;;  %v916_v23 = vadd.f32 %v3174_v48, %v905_v47  ;;  %v1909_v48 = vld [vmem:[%s3594_s3 + $0x50] sm:$0xff]  ;;  %v1625_v31 = vld [vmem:[#allocation2 + $0x2e] sm:$0x3] }
 0x187   :  { %2001 = vmatmul.msk.f32.vlgmr.msrb.gmra.mxu0 %vm948_vm1, %v1535_v54  ;;  %2006 = vmatmul.msk.f32.vlgmr.msrb.gmra.mxu1 %vm948_vm1, %v1565_v40  ;;  %v1701_v9 = vld [vmem:[%s3596_s5 + $0x50] sm:$0xff]  ;;  %v1700_v47 = vld [vmem:[%s3596_s5 + $0x48] sm:$0xff] }
 0x188   :  { %2011 = vmatmul.msk.f32.vlgmr.msra.gmra.mxu2 %vm948_vm1, %v1595_v3  ;;  %1679 = vmatpush.msra.mxu0 %v2017_v22  ;;  %v923_v10 = vmax.f32 %v916_v23, 0.0  ;;  %v1699_v3 = vld [vmem:[%s3596_s5 + $0x40] sm:$0xff] }
 0x189   :  { %1713 = vmatpush.msra.mxu1 %v1704_v59 }
 0x18a   :  { %930 = vst [vmem:[#allocation2] sm:$0xff] %v923_v10 }
 0x18b   :  { %1714 = vmatpush.msra.mxu1 %v1703_v0  ;;  %v1735_v0 = vld [vmem:[%s3598_s7 + $0x18] sm:$0xff] }
 0x18d   :  { %v1655_v27 = vld [vmem:[#allocation2 + $0x30] sm:$0x3]  ;;  %1715 = vmatpush.msra.mxu1 %v1702_v46 }
 0x18f   :  { %2021 = vmatmul.msk.f32.vlgmr.msra.gmra.mxu0 %vm948_vm1, %v1655_v27  ;;  %1716 = vmatpush.msra.mxu1 %v1701_v9  ;;  %v1698_v27 = vld [vmem:[%s3596_s5 + $0x38] sm:$0xff]  ;;  %v2042_v9 = vld [vmem:[%s3595_s4] ss:$0 sm:$0xff] }
 0x191   :  { %v942_v57 = vld [vmem:[#allocation2 + $0x2] sm:$0x3]  ;;  %v937_v21 = vld [vmem:[#allocation2] sm:$0x3]  ;;  %v995_v19 = vld [vmem:[#allocation2 + $0x4] sm:$0x3]  ;;  %1717 = vmatpush.msra.mxu1 %v1700_v47 }
 0x192   :  { %1905 = vmatmul.msk.f32.vlgmr.msrb.gmra.mxu3 %vm948_vm1, %v942_v57  ;;  %v1025_v12 = vld [vmem:[#allocation2 + $0x6] sm:$0x3]  ;;  %v1696_v57 = vld [vmem:[%s3596_s5 + $0x28] sm:$0xff] }
 0x193   :  { %1016 = vmatpush.msrb.mxu3 %v1910_v51  ;;  %1718 = vmatpush.msra.mxu1 %v1699_v3  ;;  %v1697_v51 = vld [vmem:[%s3596_s5 + $0x30] sm:$0xff]  ;;  %v1733_v3 = vld [vmem:[%s3598_s7 + $0x8] sm:$0xff] }
 0x195   :  { %1017 = vmatpush.msrb.mxu3 %v1909_v48  ;;  %1719 = vmatpush.msra.mxu1 %v1698_v27 }
 0x197   :  { %1018 = vmatpush.msrb.mxu3 %v1908_v11  ;;  %1720 = vmatpush.msra.mxu1 %v1697_v51 }
 0x199   :  { %1019 = vmatpush.msrb.mxu3 %v1907_v14  ;;  %1721 = vmatpush.msra.mxu1 %v1696_v57 }
 0x19a   :  { %1906 = vmatmul.msk.f32.vlgmr.msra.gmra.mxu3 %vm948_vm1, %v937_v21 }
 0x19b   :  { %1046 = vmatpush.msra.mxu3 %v1915_v37 }
 0x19d   :  { %1047 = vmatpush.msra.mxu3 %v1914_v2  ;;  %v1695_v2 = vld [vmem:[%s3596_s5 + $0x20] sm:$0xff] }
 0x19e   :  { %1722 = vmatpush.msra.mxu1 %v1695_v2 }
 0x19f   :  { %1048 = vmatpush.msra.mxu3 %v1913_v8 }
 0x1a1   :  { %1049 = vmatpush.msra.mxu3 %v1912_v49  ;;  %v1694_v49 = vld [vmem:[%s3596_s5 + $0x18] sm:$0xff] }
 0x1a2   :  { %1911 = vmatmul.msk.f32.vlgmr.msrb.gmra.mxu3 %vm948_vm1, %v995_v19  ;;  %1723 = vmatpush.msra.mxu1 %v1694_v49 }
 0x1a3   :  { %1106 = vmatpush.msrb.mxu3 %v1925_v35 }
 0x1a5   :  { %1107 = vmatpush.msrb.mxu3 %v1924_v63  ;;  %v1693_v63 = vld [vmem:[%s3596_s5 + $0x10] sm:$0xff] }
 0x1a6   :  { %1724 = vmatpush.msra.mxu1 %v1693_v63 }
 0x1a7   :  { %1108 = vmatpush.msrb.mxu3 %v1923_v42 }
 0x1a9   :  { %1109 = vmatpush.msrb.mxu3 %v1922_v5  ;;  %v1692_v5 = vld [vmem:[%s3596_s5 + $0x8] sm:$0xff] }
 0x1aa   :  { %1916 = vmatmul.msk.f32.vlgmr.msra.gmra.mxu3 %vm948_vm1, %v1025_v12  ;;  %1725 = vmatpush.msra.mxu1 %v1692_v5 }
 0x1ab   :  { %1166 = vmatpush.msra.mxu3 %v1935_v34  ;;  %v1691_v34 = vld [vmem:[%s3596_s5] sm:$0xff] }
 0x1ac   :  { %1726 = vmatpush.msra.mxu1 %v1691_v34 }
 0x1ad   :  { %1167 = vmatpush.msra.mxu3 %v1934_v16 }
 0x1af   :  { %1168 = vmatpush.msra.mxu3 %v1933_v28 }
 0x1b1   :  { %1169 = vmatpush.msra.mxu3 %v1932_v26  ;;  %v1747_v26 = vld [vmem:[%s3598_s7 + $0x78] sm:$0xff] }
 0x1b2   :  { %1926 = vmatmul.msk.f32.vlgmr.msrb.gmra.mxu3 %vm948_vm1, %v1085_v53  ;;  %1752 = vmatpush.msrb.mxu2 %v1747_v26 }
 0x1b3   :  { %1286 = vmatpush.msrb.mxu3 %v1955_v56  ;;  %v1746_v56 = vld [vmem:[%s3598_s7 + $0x70] sm:$0xff] }
 0x1b4   :  { %1753 = vmatpush.msrb.mxu2 %v1746_v56 }
 0x1b5   :  { %1287 = vmatpush.msrb.mxu3 %v1954_v58 }
 0x1b7   :  { %1288 = vmatpush.msrb.mxu3 %v1953_v41  ;;  %v1745_v41 = vld [vmem:[%s3598_s7 + $0x68] sm:$0xff] }
 0x1b8   :  { %1754 = vmatpush.msrb.mxu2 %v1745_v41 }
 0x1b9   :  { %1289 = vmatpush.msrb.mxu3 %v1952_v52 }
 0x1ba   :  { %1936 = vmatmul.msk.f32.vlgmr.msra.gmra.mxu3 %vm948_vm1, %v1145_v24 }
 0x1bb   :  { %1406 = vmatpush.msra.mxu3 %v1975_v39  ;;  %v1744_v39 = vld [vmem:[%s3598_s7 + $0x60] sm:$0xff] }
 0x1bc   :  { %1755 = vmatpush.msrb.mxu2 %v1744_v39 }
 0x1bd   :  { %1407 = vmatpush.msra.mxu3 %v1974_v38 }
 0x1bf   :  { %1408 = vmatpush.msra.mxu3 %v1973_v15  ;;  %v1743_v15 = vld [vmem:[%s3598_s7 + $0x58] sm:$0xff] }
 0x1c0   :  { %1756 = vmatpush.msrb.mxu2 %v1743_v15 }
 0x1c1   :  { %1409 = vmatpush.msra.mxu3 %v1972_v36 }
 0x1c2   :  { %1956 = vmatmul.msk.f32.vlgmr.msrb.gmra.mxu3 %vm948_vm1, %v1265_v13  ;;  %v1742_v13 = vld [vmem:[%s3598_s7 + $0x50] sm:$0xff] }
 0x1c3   :  { %1526 = vmatpush.msrb.mxu3 %v1995_v7  ;;  %1757 = vmatpush.msrb.mxu2 %v1742_v13 }
 0x1c5   :  { %1527 = vmatpush.msrb.mxu3 %v1994_v20 }
 0x1c7   :  { %1528 = vmatpush.msrb.mxu3 %v1993_v18 }
 0x1c9   :  { %1529 = vmatpush.msrb.mxu3 %v1992_v1  ;;  %v1741_v1 = vld [vmem:[%s3598_s7 + $0x48] sm:$0xff] }
 0x1ca   :  { %1976 = vmatmul.msk.f32.vlgmr.msra.gmra.mxu3 %vm948_vm1, %v1385_v43  ;;  %1758 = vmatpush.msrb.mxu2 %v1741_v1 }
 0x1cb   :  { %1646 = vmatpush.msra.mxu3 %v2015_v62 }
 0x1cd   :  { %1647 = vmatpush.msra.mxu3 %v2014_v45  ;;  %v1740_v45 = vld [vmem:[%s3598_s7 + $0x40] sm:$0xff] }
 0x1ce   :  { %1759 = vmatpush.msrb.mxu2 %v1740_v45 }
 0x1cf   :  { %1648 = vmatpush.msra.mxu3 %v2013_v55 }
 0x1d1   :  { %1649 = vmatpush.msra.mxu3 %v2012_v30  ;;  %v1739_v30 = vld [vmem:[%s3598_s7 + $0x38] sm:$0xff] }
 0x1d2   :  { %1996 = vmatmul.msk.f32.vlgmr.msrb.gmra.mxu3 %vm948_vm1, %v1505_v60  ;;  %1760 = vmatpush.msrb.mxu2 %v1739_v30 }
 0x1da   :  { %2016 = vmatmul.msk.f32.vlgmr.msra.gmra.mxu3 %vm948_vm1, %v1625_v31 }
 0x1e3   :  { %v1081_v17 = vpop.f32.mrf.mxu0 }
 0x1e9   :  { %v1141_v22 = vpop.f32.mrf.mxu2 }
 0x1eb   :  { %v1201_v23 = vpop.f32.mrf.mxu0  ;;  %v1231_v48 = vpop.f32.mrf.mxu1 }
 0x1f2   :  { %v1261_v14 = vpop.f32.mrf.mxu2 }
 0x1f3   :  { %v1321_v35 = vpop.f32.mrf.mxu0  ;;  %v1351_v12 = vpop.f32.mrf.mxu1 }
 0x1fa   :  { %v1381_v53 = vpop.f32.mrf.mxu2 }
 0x1fb   :  { %v1441_v24 = vpop.f32.mrf.mxu0 }
 0x1fc   :  { %v1471_v20 = vpop.f32.mrf.mxu1 }
 0x202   :  { %v1501_v62 = vpop.f32.mrf.mxu2 }
 0x204   :  { %v1561_v60 = vpop.f32.mrf.mxu0  ;;  %v1591_v50 = vpop.f32.mrf.mxu1 }
 0x215   :  { %v969_v29 = vpop.f32.mrf.mxu3 }
 0x21d   :  { %v992_v32 = vpop.f32.mrf.mxu3 }
 0x21e   :  { %v993_v33 = vadd.f32 %v992_v32, %v969_v29  ;;  %v1738_v32 = vld [vmem:[%s3598_s7 + $0x30] sm:$0xff] }
 0x21f   :  { %1761 = vmatpush.msrb.mxu2 %v1738_v32 }
 0x221   :  { %1762 = vmatpush.msrb.mxu2 %v1737_v44 }
 0x225   :  { %v1021_v4 = vpop.f32.mrf.mxu3 }
 0x226   :  { %v1024_v6 = vadd.f32 %v1021_v4, %v993_v33 }
 0x22d   :  { %v1051_v61 = vpop.f32.mrf.mxu3 }
 0x22e   :  { %v1054_v25 = vadd.f32 %v1051_v61, %v1024_v6  ;;  %v1621_v61 = vpop.f32.mrf.mxu2 }
 0x230   :  { %v1084_v40 = vadd.f32 %v1081_v17, %v1054_v25  ;;  %v1736_v17 = vld [vmem:[%s3598_s7 + $0x20] sm:$0xff]  ;;  %v1681_v25 = vpop.f32.mrf.mxu0 }
 0x231   :  { %1763 = vmatpush.msrb.mxu2 %v1736_v17 }
 0x233   :  { %1764 = vmatpush.msrb.mxu2 %v1735_v0 }
 0x235   :  { %v1111_v54 = vpop.f32.mrf.mxu3 }
 0x236   :  { %v1114_v10 = vadd.f32 %v1111_v54, %v1084_v40  ;;  %v1734_v40 = vld [vmem:[%s3598_s7 + $0x10] sm:$0xff] }
 0x237   :  { %1765 = vmatpush.msrb.mxu2 %v1734_v40 }
 0x238   :  { %v1144_v11 = vadd.f32 %v1141_v22, %v1114_v10  ;;  %v2043_v10 = vld [vmem:[%s3597_s6] ss:$0 sm:$0xff] }
 0x239   :  { %1766 = vmatpush.msrb.mxu2 %v1733_v3 }
 0x23d   :  { %v1171_v37 = vpop.f32.mrf.mxu3 }
 0x23e   :  { %v1174_v21 = vadd.f32 %v1171_v37, %v1144_v11 }
 0x240   :  { %v1204_v8 = vadd.f32 %v1201_v23, %v1174_v21  ;;  %v1732_v23 = vld [vmem:[%s3598_s7] sm:$0xff]  ;;  %s1780_s7 = sshll.u32 %s3600_s9, 4  ;;  %s1781_s7 = int_to_ptr.hbm [resolvable:$true] %s1780_s7 }
 0x241   :  { %1767 = vmatpush.msrb.mxu2 %v1732_v23 }
 0x242   :  { %v1234_v19 = vadd.f32 %v1231_v48, %v1204_v8  ;;  %v2044_v48 = vld [vmem:[%s3599_s8] ss:$0 sm:$0xff] }
 0x244   :  { %v1264_v42 = vadd.f32 %v1261_v14, %v1234_v19 }
 0x245   :  { %v1291_v16 = vpop.f32.mrf.mxu3 }
 0x246   :  { %v1294_v28 = vadd.f32 %v1291_v16, %v1264_v42 }
 0x248   :  { %v1324_v58 = vadd.f32 %v1321_v35, %v1294_v28 }
 0x24a   :  { %v1354_v52 = vadd.f32 %v1351_v12, %v1324_v58 }
 0x24c   :  { %v1384_v38 = vadd.f32 %v1381_v53, %v1354_v52 }
 0x24d   :  { %v1411_v36 = vpop.f32.mrf.mxu3 }
 0x24e   :  { %v1414_v7 = vadd.f32 %v1411_v36, %v1384_v38 }
 0x250   :  { %v1444_v18 = vadd.f32 %v1441_v24, %v1414_v7 }
 0x252   :  { %v1474_v43 = vadd.f32 %v1471_v20, %v1444_v18 }
 0x254   :  { %v1504_v55 = vadd.f32 %v1501_v62, %v1474_v43 }
 0x255   :  { %v1531_v31 = vpop.f32.mrf.mxu3 }
 0x256   :  { %v1534_v29 = vadd.f32 %v1531_v31, %v1504_v55 }
 0x258   :  { %v1564_v4 = vadd.f32 %v1561_v60, %v1534_v29 }
 0x25a   :  { %v1594_v59 = vadd.f32 %v1591_v50, %v1564_v4 }
 0x25c   :  { %v1624_v33 = vadd.f32 %v1621_v61, %v1594_v59 }
 0x25d   :  { %v1651_v6 = vpop.f32.mrf.mxu3 }
 0x25e   :  { %v1654_v46 = vadd.f32 %v1651_v6, %v1624_v33 }
 0x260   :  { %v1684_v47 = vadd.f32 %v1681_v25, %v1654_v46 }
 0x262   :  { %v1689_v22 = vadd.f32 %v2042_v9, %v1684_v47 }
 0x264   :  { %v1690_v54 = vmax.f32 %v1689_v22, 0.0 }
 0x266   :  { %1727 = vmatmul.f32.vlgmr.msra.gmra.mxu1 %v1690_v54 }
 0x2e3   :  { %v1728_v27 = vpop.f32.mrf.mxu1 }
 0x2e4   :  { %v1729_v51 = vadd.f32 %v2043_v10, %v1728_v27 }
 0x2e6   :  { %v1731_v57 = vmax.f32 %v1729_v51, 0.0 }
 0x2e8   :  { %1768 = vmatmul.f32.vlgmr.msrb.gmra.mxu2 %v1731_v57 }
 0x36b   :  { %v1769_v11 = vpop.f32.mrf.mxu2 }
 0x36c   :  { %v1770_v14 = vadd.f32 %v2044_v48, %v1769_v11 }
 0x36e   :  { %1772 = vst [vmem:[#allocation3] sm:$0x3] %v1770_v14 }
 0x36f   :  { %1783 = dma.vmem_to_hbm [thread:$0]  %s1779_s11, 32, %s1781_s7, [#allocation4]  }
 0x370   :  { %2069 = dma.done.wait [#allocation4], 32  }
 0x371   :  { %2070 = vsyncadd [#allocation4], 4294967264 }
 0x372   :  { %1788 = vsyncpa [#allocation4], 1 }

</bundles_post_ra>
